<compile_context>
chip_gen: v7x
topology: tpu7x:2x2x1
jax: 0.10.0
libtpu: 0.0.40
codegen_flags: <defaults>
</compile_context>

<pallas_src>
import functools

import jax
import jax.numpy as jnp
import numpy as np
from jax.experimental import pallas as pl
from jax.experimental.pallas import tpu as pltpu


# ------------------------------------------------------------------ helpers
def _cdiv(a, b):
    return (a + b - 1) // b


def _round_up(x, m):
    return _cdiv(x, m) * m


def _vmem_plan():
    """Generation-aware (tile_budget_bytes, vmem_limit_bytes)."""
    cap = None
    try:
        cap = getattr(pltpu.get_tpu_info(), "vmem_capacity_bytes", None)
    except Exception:
        cap = None
    if cap is None:
        cap = 64 * 1024 * 1024                  # assume smallest (v7x-class) VMEM
    if cap >= 96 * 1024 * 1024:                 # v5e / v6e: 128 MiB physical
        return 80 * 1024 * 1024, 100 * 1024 * 1024
    return 36 * 1024 * 1024, 52 * 1024 * 1024   # v7x-class: 64 MiB physical


def _extract_patches_nhwc(x_nhwc, k, stride, pad):
    """NHWC im2col. pad = (top, bottom, left, right); feature order (kh, kw, C)."""
    t, b, l, r = pad
    xp = jnp.pad(x_nhwc, ((0, 0), (t, b), (l, r), (0, 0)))
    N, H, W, C = xp.shape
    OH = (H - k) // stride + 1
    OW = (W - k) // stride + 1
    cols = []
    for i in range(k):
        for j in range(k):
            cols.append(xp[:, i:i + stride * OH:stride, j:j + stride * OW:stride, :])
    p = jnp.stack(cols, axis=3)                  # (N, OH, OW, k*k, C)
    p = p.reshape(N, OH * OW, k * k * C)
    return p, OH, OW


# ---------------------------------------------------------------------------
# Kernel A: layer 1 (no norm). Batch folded into M, weight/bias resident.
#   p_ref (tm, CK) bf16, w_ref (CK, Coutp) bf16, b_ref (1, Coutp) f32,
#   o_ref (tm, Coutp) bf16.  Single K block (CK is tiny), fused bias+LeakyReLU.
# ---------------------------------------------------------------------------
def _l1_kernel(p_ref, w_ref, b_ref, o_ref):
    y = jnp.dot(p_ref[...], w_ref[...], preferred_element_type=jnp.float32)
    y = y + b_ref[...]
    y = jnp.where(y > 0.0, y, 0.2 * y)           # LeakyReLU(0.2)
    o_ref[...] = y.astype(o_ref.dtype)


def _conv_layer1_pallas(x_nhwc, w, b, *, stride, pad, compute_dtype, budget,
                        vmem_limit):
    Cout, Cin, k, _ = w.shape
    patches, OH, OW = _extract_patches_nhwc(x_nhwc, k, stride, pad)   # (N, P, CK)
    N, P, CK = patches.shape
    M = N * P
    Coutp = _round_up(Cout, 128)                 # lane-dense output stores

    # M-tile selection from the VMEM budget; prefer >=4 pipeline/megacore steps.
    per_row = 2 * CK * 2 + 2 * Coutp * 2
    fixed = 2 * CK * Coutp * 2 + 2 * Coutp * 4
    tm_cap = max(16, (budget - fixed) // per_row)
    tm_cap = max(16, min((int(tm_cap) // 16) * 16, 2048))
    tm = min(_round_up(M, 16), tm_cap)
    if _cdiv(M, tm) < 4 and M >= 4 * 16:
        tm = min(tm, _round_up(_cdiv(M, 4), 16))
    m_tiles = _cdiv(M, tm)
    Mp = m_tiles * tm

    pm = patches.reshape(M, CK)
    if Mp != M:
        pm = jnp.pad(pm, ((0, Mp - M), (0, 0)))
    pm = pm.astype(compute_dtype)

    wm = jnp.transpose(w, (2, 3, 1, 0)).reshape(CK, Cout)             # (CK, Cout)
    wm = jnp.pad(wm, ((0, 0), (0, Coutp - Cout))).astype(compute_dtype)
    bm = jnp.pad(jnp.asarray(b, jnp.float32), (0, Coutp - Cout)).reshape(1, Coutp)

    out = pl.pallas_call(
        _l1_kernel,
        out_shape=jax.ShapeDtypeStruct((Mp, Coutp), compute_dtype),
        grid=(m_tiles,),
        in_specs=[
            pl.BlockSpec((tm, CK), lambda m: (m, 0)),
            pl.BlockSpec((CK, Coutp), lambda m: (0, 0)),   # resident weight
            pl.BlockSpec((1, Coutp), lambda m: (0, 0)),    # resident bias
        ],
        out_specs=pl.BlockSpec((tm, Coutp), lambda m: (m, 0)),
        compiler_params=pltpu.CompilerParams(
            dimension_semantics=("parallel",),
            vmem_limit_bytes=vmem_limit),
    )(pm, wm, bm)

    return out[:M, :Cout].reshape(N, OH, OW, Cout)


# ---------------------------------------------------------------------------
# Kernel B: norm layers 2-4, pass 1 (matmul + cross-M-tile stats).
# Grid (N, M_tiles, K_tiles); weight resident, bias skipped (norm cancels it).
#   p_ref (1, tm, tk) bf16, w_ref (CKp, Cout) bf16,
#   y_ref (1, tm, Cout) f32, sum_ref/ssq_ref (1, 1, Cout) f32 (revisited),
#   acc_ref (tm, Cout) f32 scratch.
# ---------------------------------------------------------------------------
def _norm_mm_kernel(p_ref, w_ref, y_ref, sum_ref, ssq_ref, acc_ref, *, tk):
    m = pl.program_id(1)
    kk = pl.program_id(2)
    nk = pl.num_programs(2)

    @pl.when((m == 0) & (kk == 0))
    def _init_stats():
        sum_ref[...] = jnp.zeros_like(sum_ref)
        ssq_ref[...] = jnp.zeros_like(ssq_ref)

    @pl.when(kk == 0)
    def _init_acc():
        acc_ref[...] = jnp.zeros_like(acc_ref)

    koff = pl.multiple_of(kk * tk, tk)
    acc_ref[...] += jnp.dot(p_ref[0], w_ref[pl.ds(koff, tk), :],
                            preferred_element_type=jnp.float32)

    @pl.when(kk == nk - 1)
    def _finalize():
        y = acc_ref[...]                                   # (tm, Cout) f32
        y_ref[0] = y
        sum_ref[0] += jnp.sum(y, axis=0, keepdims=True)    # padded rows are 0
        ssq_ref[0] += jnp.sum(y * y, axis=0, keepdims=True)


# ---------------------------------------------------------------------------
# Kernel C: norm layers pass 2 (InstanceNorm + LeakyReLU), elementwise.
# ---------------------------------------------------------------------------
def _inorm_lrelu_kernel(y_ref, sum_ref, ssq_ref, o_ref, *, inv_p):
    y = y_ref[0]                                           # (tm, Cout) f32
    mean = sum_ref[0] * inv_p                              # (1, Cout)
    var = ssq_ref[0] * inv_p - mean * mean
    y = (y - mean) * jax.lax.rsqrt(var + 1e-5)
    y = jnp.where(y > 0.0, y, 0.2 * y)
    o_ref[0] = y.astype(o_ref.dtype)


def _conv_norm_layer_pallas(x_nhwc, w, *, stride, pad, compute_dtype, budget,
                            vmem_limit):
    Cout, Cin, k, _ = w.shape
    patches, OH, OW = _extract_patches_nhwc(x_nhwc, k, stride, pad)   # (N, P, CK)
    N, P, CK = patches.shape

    # K tile over the patch stream (512 divides every norm-layer CK here).
    for tk in (512, 256, 128):
        if CK % tk == 0:
            CKp = CK
            break
    else:
        tk, CKp = 128, _round_up(CK, 128)
    k_tiles = CKp // tk

    # M (spatial) tile from the VMEM budget.
    fixed = 2 * CKp * Cout * 2                          # resident weight (dbuf)
    per_row = 2 * tk * 2 + 2 * Cout * 4 + Cout * 4      # patches + y out + acc
    tm_cap = max(16, (budget - fixed) // per_row)
    tm_cap = max(16, min((int(tm_cap) // 16) * 16, 2048))
    tm = min(_round_up(P, 16), tm_cap)
    m_tiles = _cdiv(P, tm)
    Mp = m_tiles * tm

    if Mp != P or CKp != CK:
        patches = jnp.pad(patches, ((0, 0), (0, Mp - P), (0, CKp - CK)))
    patches = patches.astype(compute_dtype)

    wm = jnp.transpose(w, (2, 3, 1, 0)).reshape(CK, Cout)
    if CKp != CK:
        wm = jnp.pad(wm, ((0, CKp - CK), (0, 0)))
    wm = wm.astype(compute_dtype)

    y_raw, ysum, yssq = pl.pallas_call(
        functools.partial(_norm_mm_kernel, tk=tk),
        out_shape=(
            jax.ShapeDtypeStruct((N, Mp, Cout), jnp.float32),
            jax.ShapeDtypeStruct((N, 1, Cout), jnp.float32),
            jax.ShapeDtypeStruct((N, 1, Cout), jnp.float32),
        ),
        grid=(N, m_tiles, k_tiles),
        in_specs=[
            pl.BlockSpec((1, tm, tk), lambda n, m, kk: (n, m, kk)),
            pl.BlockSpec((CKp, Cout), lambda n, m, kk: (0, 0)),   # resident weight
        ],
        out_specs=[
            pl.BlockSpec((1, tm, Cout), lambda n, m, kk: (n, m, 0)),
            pl.BlockSpec((1, 1, Cout), lambda n, m, kk: (n, 0, 0)),
            pl.BlockSpec((1, 1, Cout), lambda n, m, kk: (n, 0, 0)),
        ],
        scratch_shapes=[pltpu.VMEM((tm, Cout), jnp.float32)],
        compiler_params=pltpu.CompilerParams(
            dimension_semantics=("parallel", "arbitrary", "arbitrary"),
            vmem_limit_bytes=vmem_limit),
    )(patches, wm)

    out = pl.pallas_call(
        functools.partial(_inorm_lrelu_kernel, inv_p=1.0 / float(P)),
        out_shape=jax.ShapeDtypeStruct((N, Mp, Cout), compute_dtype),
        grid=(N, m_tiles),
        in_specs=[
            pl.BlockSpec((1, tm, Cout), lambda n, m: (n, m, 0)),
            pl.BlockSpec((1, 1, Cout), lambda n, m: (n, 0, 0)),
            pl.BlockSpec((1, 1, Cout), lambda n, m: (n, 0, 0)),
        ],
        out_specs=pl.BlockSpec((1, tm, Cout), lambda n, m: (n, m, 0)),
        compiler_params=pltpu.CompilerParams(
            dimension_semantics=("parallel", "parallel"),
            vmem_limit_bytes=vmem_limit),
    )(y_raw, ysum, yssq)

    return out[:, :P, :].reshape(N, OH, OW, Cout)


# ---------------------------------------------------------------------------
# Full discriminator forward (Pallas path). Interface: NCHW in / NCHW out.
# ---------------------------------------------------------------------------
def discriminator_forward(x_nchw, params, compute_dtype=jnp.bfloat16):
    (w1, b1), (w2, _b2), (w3, _b3), (w4, _b4), (w5, b5) = params
    budget, vmem_limit = _vmem_plan()

    y = jnp.transpose(x_nchw, (0, 2, 3, 1)).astype(compute_dtype)     # NHWC bf16
    y = _conv_layer1_pallas(y, w1, b1, stride=2, pad=(1, 1, 1, 1),
                            compute_dtype=compute_dtype, budget=budget,
                            vmem_limit=vmem_limit)
    for w in (w2, w3, w4):
        # InstanceNorm2d(affine=False) exactly cancels a per-channel conv bias,
        # so the bias (and its DMA) is skipped for these layers.
        y = _conv_norm_layer_pallas(y, w, stride=2, pad=(1, 1, 1, 1),
                                    compute_dtype=compute_dtype, budget=budget,
                                    vmem_limit=vmem_limit)

    # ZeroPad2d((1,0,1,0)) + Conv2d(512, 1, 4, padding=1) -> pad (t=2,b=1,l=2,r=1).
    # Cout=1 is MXU/store-hostile in Pallas; the layer is tiny, so it stays a
    # plain einsum (bf16 operands, f32 accumulation).
    patches, OH, OW = _extract_patches_nhwc(y, 4, 1, (2, 1, 2, 1))
    w5m = jnp.transpose(w5, (2, 3, 1, 0)).reshape(-1, 1).astype(compute_dtype)
    out = jnp.einsum("npc,co->npo", patches, w5m,
                     preferred_element_type=jnp.float32)
    out = out + jnp.asarray(b5, jnp.float32).reshape(1, 1, 1)
    out = out.reshape(y.shape[0], OH, OW, 1)
    return jnp.transpose(out, (0, 3, 1, 2))                 # NCHW, f32


# ---------------------------------------------------------------------------
# Pure-JAX reference. compute_dtype=float32 reproduces the PyTorch module;
# compute_dtype=bfloat16 mirrors the kernel's precision policy (bf16 matmul
# operands, f32 accumulation, bf16 inter-layer activations).
# ---------------------------------------------------------------------------
def discriminator_reference(x, params, compute_dtype=jnp.float32):
    def conv(x, w, b, stride, padding):
        y = jax.lax.conv_general_dilated(
            x.astype(compute_dtype), w.astype(compute_dtype),
            (stride, stride), padding,
            dimension_numbers=("NCHW", "OIHW", "NCHW"),
            preferred_element_type=jnp.float32)
        return y + jnp.asarray(b, jnp.float32).reshape(1, -1, 1, 1)

    def inorm(y):
        m = y.mean(axis=(2, 3), keepdims=True)
        v = ((y - m) ** 2).mean(axis=(2, 3), keepdims=True)
        return (y - m) * jax.lax.rsqrt(v + 1e-5)

    def lrelu(y):
        return jnp.where(y > 0, y, 0.2 * y)

    def recast(y):  # inter-layer activation storage precision
        return y.astype(compute_dtype).astype(jnp.float32)

    (w1, b1), (w2, b2), (w3, b3), (w4, b4), (w5, b5) = params
    y = recast(lrelu(conv(x, w1, b1, 2, [(1, 1), (1, 1)])))
    y = recast(lrelu(inorm(conv(y, w2, b2, 2, [(1, 1), (1, 1)]))))
    y = recast(lrelu(inorm(conv(y, w3, b3, 2, [(1, 1), (1, 1)]))))
    y = recast(lrelu(inorm(conv(y, w4, b4, 2, [(1, 1), (1, 1)]))))
    y = jnp.pad(y, ((0, 0), (0, 0), (1, 0), (1, 0)))         # ZeroPad2d((1,0,1,0))
    y = conv(y, w5, b5, 1, [(1, 1), (1, 1)])
    return y


def init_params(key, in_channels):
    shapes = [
        (64, in_channels, 4, 4),
        (128, 64, 4, 4),
        (256, 128, 4, 4),
        (512, 256, 4, 4),
        (1, 512, 4, 4),
    ]
    params = []
    for i, s in enumerate(shapes):
        kw, kb = jax.random.split(jax.random.fold_in(key, i))
        fan_in = s[1] * s[2] * s[3]
        w = jax.random.normal(kw, s, jnp.float32) * (1.0 / np.sqrt(fan_in))
        b = jax.random.normal(kb, (s[0],), jnp.float32) * 0.01
        params.append((w, b))
    return params


if __name__ == "__main__":
    key = jax.random.PRNGKey(0)
    N, C, H, W = 2, 3, 32, 32            # module output_shape: (1, H//16, W//16)
    x = jax.random.normal(jax.random.fold_in(key, 100), (N, C, H, W), jnp.float32)
    params = init_params(key, C)

    fwd = jax.jit(discriminator_forward)
    out = jax.block_until_ready(fwd(x, params))
    assert out.shape == (N, 1, H // 16, W // 16), out.shape

    # (1) Kernel correctness at matched precision (bf16 operands, f32 accum).
    ref_bf16 = jax.block_until_ready(
        discriminator_reference(x, params, jnp.bfloat16))
    np.testing.assert_allclose(np.asarray(out), np.asarray(ref_bf16),
                               rtol=1e-2, atol=1e-2)

    # (2) End-to-end sanity vs the full-f32 PyTorch-equivalent reference.
    ref_f32 = jax.block_until_ready(
        discriminator_reference(x, params, jnp.float32))
    np.testing.assert_allclose(np.asarray(out), np.asarray(ref_f32),
                               rtol=5e-2, atol=5e-2)

    print("KERNEL_OK")
</pallas_src>

<mosaic_0001>
module attributes {stable_mosaic.version = 11 : i64} {
  func.func @_l1_kernel(%arg0: i32, %arg1: memref<128x48xbf16, #tpu.memory_space<vmem>>, %arg2: memref<48x128xbf16, #tpu.memory_space<vmem>>, %arg3: memref<1x128xf32, #tpu.memory_space<vmem>>, %arg4: memref<128x128xbf16, #tpu.memory_space<vmem>>) attributes {dimension_semantics = [#tpu.dimension_semantics<parallel>], iteration_bounds = array<i64: 4>, scalar_prefetch = 0 : i64, scratch_operands = 0 : i64, tpu.core_type = #tpu.core_type<tc>, window_params = [{transform_indices = @transform_0, window_bounds = array<i64: 128, 48>}, {pipeline_mode = #tpu.pipeline_mode<synchronous>, transform_indices = @transform_1, window_bounds = array<i64: 48, 128>}, {pipeline_mode = #tpu.pipeline_mode<synchronous>, transform_indices = @transform_2, window_bounds = array<i64: 1, 128>}, {transform_indices = @transform_3, window_bounds = array<i64: 128, 128>}]} {
    %c0 = arith.constant 0 : index
    %c0_0 = arith.constant 0 : index
    %0 = vector.load %arg1[%c0, %c0_0] : memref<128x48xbf16, #tpu.memory_space<vmem>>, vector<128x48xbf16>
    %c0_1 = arith.constant 0 : index
    %c0_2 = arith.constant 0 : index
    %1 = vector.load %arg2[%c0_1, %c0_2] : memref<48x128xbf16, #tpu.memory_space<vmem>>, vector<48x128xbf16>
    %cst = arith.constant dense<0.000000e+00> : vector<128x128xf32>
    %2 = tpu.matmul %0, %1, %cst {dimension_numbers = #tpu.dot_dimension_numbers<[1], [0], [0], [1], [0, 0, 1, 1], [], []>} : vector<128x48xbf16>, vector<48x128xbf16>, vector<128x128xf32> -> vector<128x128xf32>
    %c0_3 = arith.constant 0 : index
    %c0_4 = arith.constant 0 : index
    %3 = vector.load %arg3[%c0_3, %c0_4] : memref<1x128xf32, #tpu.memory_space<vmem>>, vector<1x128xf32>
    %4 = vector.broadcast %3 : vector<1x128xf32> to vector<128x128xf32>
    %5 = arith.addf %2, %4 : vector<128x128xf32>
    %cst_5 = arith.constant 0.000000e+00 : f32
    %6 = vector.broadcast %cst_5 : f32 to vector<128x128xf32>
    %7 = arith.cmpf ogt, %5, %6 : vector<128x128xf32>
    %cst_6 = arith.constant 2.000000e-01 : f32
    %8 = vector.broadcast %cst_6 : f32 to vector<128x128xf32>
    %9 = arith.mulf %8, %5 : vector<128x128xf32>
    %10 = arith.select %7, %5, %9 : vector<128x128xi1>, vector<128x128xf32>
    %11 = arith.truncf %10 : vector<128x128xf32> to vector<128x128xbf16>
    %c0_7 = arith.constant 0 : index
    %c0_8 = arith.constant 0 : index
    %12 = vector.load %arg4[%c0_7, %c0_8] : memref<128x128xbf16, #tpu.memory_space<vmem>>, vector<128x128xbf16>
    tpu.vector_store %arg4[%c0_7, %c0_8], %11 {strides = array<i32>} : memref<128x128xbf16, #tpu.memory_space<vmem>>, vector<128x128xbf16>,
    return
  }
  func.func @transform_0(%arg0: i32) -> (i32, i32) {
    %c0_i32 = arith.constant 0 : i32
    %c0_i32_0 = arith.constant 0 : i32
    return %arg0, %c0_i32 : i32, i32
  }
  func.func @transform_1(%arg0: i32) -> (i32, i32) {
    %c0_i32 = arith.constant 0 : i32
    %c0_i32_0 = arith.constant 0 : i32
    %c0_i32_1 = arith.constant 0 : i32
    return %c0_i32, %c0_i32_0 : i32, i32
  }
  func.func @transform_2(%arg0: i32) -> (i32, i32) {
    %c0_i32 = arith.constant 0 : i32
    %c0_i32_0 = arith.constant 0 : i32
    %c0_i32_1 = arith.constant 0 : i32
    return %c0_i32, %c0_i32_0 : i32, i32
  }
  func.func @transform_3(%arg0: i32) -> (i32, i32) {
    %c0_i32 = arith.constant 0 : i32
    %c0_i32_0 = arith.constant 0 : i32
    return %arg0, %c0_i32 : i32, i32
  }
}

module attributes {stable_mosaic.version = 11 : i64} {
  func.func @_norm_mm_kernel(%arg0: i32, %arg1: i32, %arg2: i32, %arg3: memref<1x64x512xbf16, #tpu.memory_space<vmem>>, %arg4: memref<1024x128xbf16, #tpu.memory_space<vmem>>, %arg5: memref<1x64x128xf32, #tpu.memory_space<vmem>>, %arg6: memref<1x1x128xf32, #tpu.memory_space<vmem>>, %arg7: memref<1x1x128xf32, #tpu.memory_space<vmem>>, %arg8: memref<64x128xf32, #tpu.memory_space<vmem>>) attributes {dimension_semantics = [#tpu.dimension_semantics<parallel>, #tpu.dimension_semantics<arbitrary>, #tpu.dimension_semantics<arbitrary>], iteration_bounds = array<i64: 2, 1, 2>, scalar_prefetch = 0 : i64, scratch_operands = 1 : i64, tpu.core_type = #tpu.core_type<tc>, window_params = [{transform_indices = @transform_0, window_bounds = array<i64: 1, 64, 512>}, {pipeline_mode = #tpu.pipeline_mode<synchronous>, transform_indices = @transform_1, window_bounds = array<i64: 1024, 128>}, {transform_indices = @transform_2, window_bounds = array<i64: 1, 64, 128>}, {transform_indices = @transform_3, window_bounds = array<i64: 1, 1, 128>}, {transform_indices = @transform_4, window_bounds = array<i64: 1, 1, 128>}]} {
    %c0_i32 = arith.constant 0 : i32
    %0 = arith.cmpi eq, %arg1, %c0_i32 : i32
    %c0_i32_0 = arith.constant 0 : i32
    %1 = arith.cmpi eq, %arg2, %c0_i32_0 : i32
    %2 = arith.andi %0, %1 : i1
    %3 = arith.extui %2 : i1 to i32
    %c0_i32_1 = arith.constant 0 : i32
    %4 = arith.cmpi ne, %3, %c0_i32_1 : i32
    scf.if %4 {
      %cst_12 = arith.constant 0.000000e+00 : f32
      %21 = vector.broadcast %cst_12 : f32 to vector<1x1x128xf32>
      %c0_13 = arith.constant 0 : index
      %c0_14 = arith.constant 0 : index
      %c0_15 = arith.constant 0 : index
      %22 = vector.load %arg6[%c0_13, %c0_14, %c0_15] : memref<1x1x128xf32, #tpu.memory_space<vmem>>, vector<1x1x128xf32>
      tpu.vector_store %arg6[%c0_13, %c0_14, %c0_15], %21 {strides = array<i32>} : memref<1x1x128xf32, #tpu.memory_space<vmem>>, vector<1x1x128xf32>,
      %cst_16 = arith.constant 0.000000e+00 : f32
      %23 = vector.broadcast %cst_16 : f32 to vector<1x1x128xf32>
      %c0_17 = arith.constant 0 : index
      %c0_18 = arith.constant 0 : index
      %c0_19 = arith.constant 0 : index
      %24 = vector.load %arg7[%c0_17, %c0_18, %c0_19] : memref<1x1x128xf32, #tpu.memory_space<vmem>>, vector<1x1x128xf32>
      tpu.vector_store %arg7[%c0_17, %c0_18, %c0_19], %23 {strides = array<i32>} : memref<1x1x128xf32, #tpu.memory_space<vmem>>, vector<1x1x128xf32>,
    } else {
    }
    %c0_i32_2 = arith.constant 0 : i32
    %5 = arith.cmpi eq, %arg2, %c0_i32_2 : i32
    %6 = arith.extui %5 : i1 to i32
    %c0_i32_3 = arith.constant 0 : i32
    %7 = arith.cmpi ne, %6, %c0_i32_3 : i32
    scf.if %7 {
      %cst_12 = arith.constant 0.000000e+00 : f32
      %21 = vector.broadcast %cst_12 : f32 to vector<64x128xf32>
      %c0_13 = arith.constant 0 : index
      %c0_14 = arith.constant 0 : index
      %22 = vector.load %arg8[%c0_13, %c0_14] : memref<64x128xf32, #tpu.memory_space<vmem>>, vector<64x128xf32>
      tpu.vector_store %arg8[%c0_13, %c0_14], %21 {strides = array<i32>} : memref<64x128xf32, #tpu.memory_space<vmem>>, vector<64x128xf32>,
    } else {
    }
    %c512_i32 = arith.constant 512 : i32
    %8 = arith.muli %arg2, %c512_i32 : i32
    %9 = tpu.assume_multiple %8, 512 : i32
    %c0 = arith.constant 0 : index
    %c0_4 = arith.constant 0 : index
    %10 = vector.load %arg8[%c0, %c0_4] : memref<64x128xf32, #tpu.memory_space<vmem>>, vector<64x128xf32>
    %c0_5 = arith.constant 0 : index
    %c0_6 = arith.constant 0 : index
    %c0_7 = arith.constant 0 : index
    %11 = vector.load %arg3[%c0_5, %c0_6, %c0_7] : memref<1x64x512xbf16, #tpu.memory_space<vmem>>, vector<1x64x512xbf16>
    %12 = vector.shape_cast %11 : vector<1x64x512xbf16> to vector<64x512xbf16>
    %13 = arith.index_cast %9 : i32 to index
    %c0_8 = arith.constant 0 : index
    %14 = vector.load %arg4[%13, %c0_8] : memref<1024x128xbf16, #tpu.memory_space<vmem>>, vector<512x128xbf16>
    %cst = arith.constant dense<0.000000e+00> : vector<64x128xf32>
    %15 = tpu.matmul %12, %14, %cst {dimension_numbers = #tpu.dot_dimension_numbers<[1], [0], [0], [1], [0, 0, 1, 1], [], []>} : vector<64x512xbf16>, vector<512x128xbf16>, vector<64x128xf32> -> vector<64x128xf32>
    %16 = arith.addf %10, %15 : vector<64x128xf32>
    %c0_9 = arith.constant 0 : index
    %c0_10 = arith.constant 0 : index
    %17 = vector.load %arg8[%c0_9, %c0_10] : memref<64x128xf32, #tpu.memory_space<vmem>>, vector<64x128xf32>
    tpu.vector_store %arg8[%c0_9, %c0_10], %16 {strides = array<i32>} : memref<64x128xf32, #tpu.memory_space<vmem>>, vector<64x128xf32>,
    %c1_i32 = arith.constant 1 : i32
    %18 = arith.cmpi eq, %arg2, %c1_i32 : i32
    %19 = arith.extui %18 : i1 to i32
    %c0_i32_11 = arith.constant 0 : i32
    %20 = arith.cmpi ne, %19, %c0_i32_11 : i32
    scf.if %20 {
      %c0_12 = arith.constant 0 : index
      %c0_13 = arith.constant 0 : index
      %21 = vector.load %arg8[%c0_12, %c0_13] : memref<64x128xf32, #tpu.memory_space<vmem>>, vector<64x128xf32>
      %c0_14 = arith.constant 0 : index
      %c0_15 = arith.constant 0 : index
      %c0_16 = arith.constant 0 : index
      %22 = vector.load %arg5[%c0_14, %c0_15, %c0_16] : memref<1x64x128xf32, #tpu.memory_space<vmem>>, vector<1x64x128xf32>
      %23 = vector.shape_cast %22 : vector<1x64x128xf32> to vector<64x128xf32>
      %24 = vector.shape_cast %21 : vector<64x128xf32> to vector<1x64x128xf32>
      tpu.vector_store %arg5[%c0_14, %c0_15, %c0_16], %24 {strides = array<i32>} : memref<1x64x128xf32, #tpu.memory_space<vmem>>, vector<1x64x128xf32>,
      %c0_17 = arith.constant 0 : index
      %c0_18 = arith.constant 0 : index
      %c0_19 = arith.constant 0 : index
      %25 = vector.load %arg6[%c0_17, %c0_18, %c0_19] : memref<1x1x128xf32, #tpu.memory_space<vmem>>, vector<1x1x128xf32>
      %26 = vector.shape_cast %25 : vector<1x1x128xf32> to vector<1x128xf32>
      %cst_20 = arith.constant dense<0.000000e+00> : vector<128xf32>
      %27 = vector.multi_reduction <add>, %21, %cst_20 [0] : vector<64x128xf32> to vector<128xf32>
      %28 = vector.shape_cast %27 : vector<128xf32> to vector<1x128xf32>
      %29 = arith.addf %26, %28 : vector<1x128xf32>
      %c0_21 = arith.constant 0 : index
      %c0_22 = arith.constant 0 : index
      %c0_23 = arith.constant 0 : index
      %30 = vector.load %arg6[%c0_21, %c0_22, %c0_23] : memref<1x1x128xf32, #tpu.memory_space<vmem>>, vector<1x1x128xf32>
      %31 = vector.shape_cast %30 : vector<1x1x128xf32> to vector<1x128xf32>
      %32 = vector.shape_cast %29 : vector<1x128xf32> to vector<1x1x128xf32>
      tpu.vector_store %arg6[%c0_21, %c0_22, %c0_23], %32 {strides = array<i32>} : memref<1x1x128xf32, #tpu.memory_space<vmem>>, vector<1x1x128xf32>,
      %c0_24 = arith.constant 0 : index
      %c0_25 = arith.constant 0 : index
      %c0_26 = arith.constant 0 : index
      %33 = vector.load %arg7[%c0_24, %c0_25, %c0_26] : memref<1x1x128xf32, #tpu.memory_space<vmem>>, vector<1x1x128xf32>
      %34 = vector.shape_cast %33 : vector<1x1x128xf32> to vector<1x128xf32>
      %35 = arith.mulf %21, %21 : vector<64x128xf32>
      %cst_27 = arith.constant dense<0.000000e+00> : vector<128xf32>
      %36 = vector.multi_reduction <add>, %35, %cst_27 [0] : vector<64x128xf32> to vector<128xf32>
      %37 = vector.shape_cast %36 : vector<128xf32> to vector<1x128xf32>
      %38 = arith.addf %34, %37 : vector<1x128xf32>
      %c0_28 = arith.constant 0 : index
      %c0_29 = arith.constant 0 : index
      %c0_30 = arith.constant 0 : index
      %39 = vector.load %arg7[%c0_28, %c0_29, %c0_30] : memref<1x1x128xf32, #tpu.memory_space<vmem>>, vector<1x1x128xf32>
      %40 = vector.shape_cast %39 : vector<1x1x128xf32> to vector<1x128xf32>
      %41 = vector.shape_cast %38 : vector<1x128xf32> to vector<1x1x128xf32>
      tpu.vector_store %arg7[%c0_28, %c0_29, %c0_30], %41 {strides = array<i32>} : memref<1x1x128xf32, #tpu.memory_space<vmem>>, vector<1x1x128xf32>,
    } else {
    }
    return
  }
  func.func @transform_0(%arg0: i32, %arg1: i32, %arg2: i32) -> (i32, i32, i32) {
    %c0_i32 = arith.constant 0 : i32
    return %arg0, %arg1, %arg2 : i32, i32, i32
  }
  func.func @transform_1(%arg0: i32, %arg1: i32, %arg2: i32) -> (i32, i32) {
    %c0_i32 = arith.constant 0 : i32
    %c0_i32_0 = arith.constant 0 : i32
    %c0_i32_1 = arith.constant 0 : i32
    return %c0_i32, %c0_i32_0 : i32, i32
  }
  func.func @transform_2(%arg0: i32, %arg1: i32, %arg2: i32) -> (i32, i32, i32) {
    %c0_i32 = arith.constant 0 : i32
    %c0_i32_0 = arith.constant 0 : i32
    return %arg0, %arg1, %c0_i32 : i32, i32, i32
  }
  func.func @transform_3(%arg0: i32, %arg1: i32, %arg2: i32) -> (i32, i32, i32) {
    %c0_i32 = arith.constant 0 : i32
    %c0_i32_0 = arith.constant 0 : i32
    %c0_i32_1 = arith.constant 0 : i32
    return %arg0, %c0_i32, %c0_i32_0 : i32, i32, i32
  }
  func.func @transform_4(%arg0: i32, %arg1: i32, %arg2: i32) -> (i32, i32, i32) {
    %c0_i32 = arith.constant 0 : i32
    %c0_i32_0 = arith.constant 0 : i32
    %c0_i32_1 = arith.constant 0 : i32
    return %arg0, %c0_i32, %c0_i32_0 : i32, i32, i32
  }
}

module attributes {stable_mosaic.version = 11 : i64} {
  func.func @_inorm_lrelu_kernel(%arg0: i32, %arg1: i32, %arg2: memref<1x64x128xf32, #tpu.memory_space<vmem>>, %arg3: memref<1x1x128xf32, #tpu.memory_space<vmem>>, %arg4: memref<1x1x128xf32, #tpu.memory_space<vmem>>, %arg5: memref<1x64x128xbf16, #tpu.memory_space<vmem>>) attributes {dimension_semantics = [#tpu.dimension_semantics<parallel>, #tpu.dimension_semantics<parallel>], iteration_bounds = array<i64: 2, 1>, scalar_prefetch = 0 : i64, scratch_operands = 0 : i64, tpu.core_type = #tpu.core_type<tc>, window_params = [{transform_indices = @transform_0, window_bounds = array<i64: 1, 64, 128>}, {transform_indices = @transform_1, window_bounds = array<i64: 1, 1, 128>}, {transform_indices = @transform_2, window_bounds = array<i64: 1, 1, 128>}, {transform_indices = @transform_3, window_bounds = array<i64: 1, 64, 128>}]} {
    %c0 = arith.constant 0 : index
    %c0_0 = arith.constant 0 : index
    %c0_1 = arith.constant 0 : index
    %0 = vector.load %arg2[%c0, %c0_0, %c0_1] : memref<1x64x128xf32, #tpu.memory_space<vmem>>, vector<1x64x128xf32>
    %1 = vector.shape_cast %0 : vector<1x64x128xf32> to vector<64x128xf32>
    %c0_2 = arith.constant 0 : index
    %c0_3 = arith.constant 0 : index
    %c0_4 = arith.constant 0 : index
    %2 = vector.load %arg3[%c0_2, %c0_3, %c0_4] : memref<1x1x128xf32, #tpu.memory_space<vmem>>, vector<1x1x128xf32>
    %3 = vector.shape_cast %2 : vector<1x1x128xf32> to vector<1x128xf32>
    %cst = arith.constant 1.562500e-02 : f32
    %4 = vector.broadcast %cst : f32 to vector<1x128xf32>
    %5 = arith.mulf %3, %4 : vector<1x128xf32>
    %c0_5 = arith.constant 0 : index
    %c0_6 = arith.constant 0 : index
    %c0_7 = arith.constant 0 : index
    %6 = vector.load %arg4[%c0_5, %c0_6, %c0_7] : memref<1x1x128xf32, #tpu.memory_space<vmem>>, vector<1x1x128xf32>
    %7 = vector.shape_cast %6 : vector<1x1x128xf32> to vector<1x128xf32>
    %cst_8 = arith.constant 1.562500e-02 : f32
    %8 = vector.broadcast %cst_8 : f32 to vector<1x128xf32>
    %9 = arith.mulf %7, %8 : vector<1x128xf32>
    %10 = arith.mulf %5, %5 : vector<1x128xf32>
    %11 = arith.subf %9, %10 : vector<1x128xf32>
    %12 = vector.broadcast %5 : vector<1x128xf32> to vector<64x128xf32>
    %13 = arith.subf %1, %12 : vector<64x128xf32>
    %cst_9 = arith.constant 9.99999974E-6 : f32
    %14 = vector.broadcast %cst_9 : f32 to vector<1x128xf32>
    %15 = arith.addf %11, %14 : vector<1x128xf32>
    %16 = math.rsqrt %15 : vector<1x128xf32>
    %17 = vector.broadcast %16 : vector<1x128xf32> to vector<64x128xf32>
    %18 = arith.mulf %13, %17 : vector<64x128xf32>
    %cst_10 = arith.constant 0.000000e+00 : f32
    %19 = vector.broadcast %cst_10 : f32 to vector<64x128xf32>
    %20 = arith.cmpf ogt, %18, %19 : vector<64x128xf32>
    %cst_11 = arith.constant 2.000000e-01 : f32
    %21 = vector.broadcast %cst_11 : f32 to vector<64x128xf32>
    %22 = arith.mulf %21, %18 : vector<64x128xf32>
    %23 = arith.select %20, %18, %22 : vector<64x128xi1>, vector<64x128xf32>
    %24 = arith.truncf %23 : vector<64x128xf32> to vector<64x128xbf16>
    %c0_12 = arith.constant 0 : index
    %c0_13 = arith.constant 0 : index
    %c0_14 = arith.constant 0 : index
    %25 = vector.load %arg5[%c0_12, %c0_13, %c0_14] : memref<1x64x128xbf16, #tpu.memory_space<vmem>>, vector<1x64x128xbf16>
    %26 = vector.shape_cast %25 : vector<1x64x128xbf16> to vector<64x128xbf16>
    %27 = vector.shape_cast %24 : vector<64x128xbf16> to vector<1x64x128xbf16>
    tpu.vector_store %arg5[%c0_12, %c0_13, %c0_14], %27 {strides = array<i32>} : memref<1x64x128xbf16, #tpu.memory_space<vmem>>, vector<1x64x128xbf16>,
    return
  }
  func.func @transform_0(%arg0: i32, %arg1: i32) -> (i32, i32, i32) {
    %c0_i32 = arith.constant 0 : i32
    %c0_i32_0 = arith.constant 0 : i32
    return %arg0, %arg1, %c0_i32 : i32, i32, i32
  }
  func.func @transform_1(%arg0: i32, %arg1: i32) -> (i32, i32, i32) {
    %c0_i32 = arith.constant 0 : i32
    %c0_i32_0 = arith.constant 0 : i32
    %c0_i32_1 = arith.constant 0 : i32
    return %arg0, %c0_i32, %c0_i32_0 : i32, i32, i32
  }
  func.func @transform_2(%arg0: i32, %arg1: i32) -> (i32, i32, i32) {
    %c0_i32 = arith.constant 0 : i32
    %c0_i32_0 = arith.constant 0 : i32
    %c0_i32_1 = arith.constant 0 : i32
    return %arg0, %c0_i32, %c0_i32_0 : i32, i32, i32
  }
  func.func @transform_3(%arg0: i32, %arg1: i32) -> (i32, i32, i32) {
    %c0_i32 = arith.constant 0 : i32
    %c0_i32_0 = arith.constant 0 : i32
    return %arg0, %arg1, %c0_i32 : i32, i32, i32
  }
}

module attributes {stable_mosaic.version = 11 : i64} {
  func.func @_norm_mm_kernel(%arg0: i32, %arg1: i32, %arg2: i32, %arg3: memref<1x16x512xbf16, #tpu.memory_space<vmem>>, %arg4: memref<2048x256xbf16, #tpu.memory_space<vmem>>, %arg5: memref<1x16x256xf32, #tpu.memory_space<vmem>>, %arg6: memref<1x1x256xf32, #tpu.memory_space<vmem>>, %arg7: memref<1x1x256xf32, #tpu.memory_space<vmem>>, %arg8: memref<16x256xf32, #tpu.memory_space<vmem>>) attributes {dimension_semantics = [#tpu.dimension_semantics<parallel>, #tpu.dimension_semantics<arbitrary>, #tpu.dimension_semantics<arbitrary>], iteration_bounds = array<i64: 2, 1, 4>, scalar_prefetch = 0 : i64, scratch_operands = 1 : i64, tpu.core_type = #tpu.core_type<tc>, window_params = [{transform_indices = @transform_0, window_bounds = array<i64: 1, 16, 512>}, {pipeline_mode = #tpu.pipeline_mode<synchronous>, transform_indices = @transform_1, window_bounds = array<i64: 2048, 256>}, {transform_indices = @transform_2, window_bounds = array<i64: 1, 16, 256>}, {transform_indices = @transform_3, window_bounds = array<i64: 1, 1, 256>}, {transform_indices = @transform_4, window_bounds = array<i64: 1, 1, 256>}]} {
    %c0_i32 = arith.constant 0 : i32
    %0 = arith.cmpi eq, %arg1, %c0_i32 : i32
    %c0_i32_0 = arith.constant 0 : i32
    %1 = arith.cmpi eq, %arg2, %c0_i32_0 : i32
    %2 = arith.andi %0, %1 : i1
    %3 = arith.extui %2 : i1 to i32
    %c0_i32_1 = arith.constant 0 : i32
    %4 = arith.cmpi ne, %3, %c0_i32_1 : i32
    scf.if %4 {
      %cst_12 = arith.constant 0.000000e+00 : f32
      %21 = vector.broadcast %cst_12 : f32 to vector<1x1x256xf32>
      %c0_13 = arith.constant 0 : index
      %c0_14 = arith.constant 0 : index
      %c0_15 = arith.constant 0 : index
      %22 = vector.load %arg6[%c0_13, %c0_14, %c0_15] : memref<1x1x256xf32, #tpu.memory_space<vmem>>, vector<1x1x256xf32>
      tpu.vector_store %arg6[%c0_13, %c0_14, %c0_15], %21 {strides = array<i32>} : memref<1x1x256xf32, #tpu.memory_space<vmem>>, vector<1x1x256xf32>,
      %cst_16 = arith.constant 0.000000e+00 : f32
      %23 = vector.broadcast %cst_16 : f32 to vector<1x1x256xf32>
      %c0_17 = arith.constant 0 : index
      %c0_18 = arith.constant 0 : index
      %c0_19 = arith.constant 0 : index
      %24 = vector.load %arg7[%c0_17, %c0_18, %c0_19] : memref<1x1x256xf32, #tpu.memory_space<vmem>>, vector<1x1x256xf32>
      tpu.vector_store %arg7[%c0_17, %c0_18, %c0_19], %23 {strides = array<i32>} : memref<1x1x256xf32, #tpu.memory_space<vmem>>, vector<1x1x256xf32>,
    } else {
    }
    %c0_i32_2 = arith.constant 0 : i32
    %5 = arith.cmpi eq, %arg2, %c0_i32_2 : i32
    %6 = arith.extui %5 : i1 to i32
    %c0_i32_3 = arith.constant 0 : i32
    %7 = arith.cmpi ne, %6, %c0_i32_3 : i32
    scf.if %7 {
      %cst_12 = arith.constant 0.000000e+00 : f32
      %21 = vector.broadcast %cst_12 : f32 to vector<16x256xf32>
      %c0_13 = arith.constant 0 : index
      %c0_14 = arith.constant 0 : index
      %22 = vector.load %arg8[%c0_13, %c0_14] : memref<16x256xf32, #tpu.memory_space<vmem>>, vector<16x256xf32>
      tpu.vector_store %arg8[%c0_13, %c0_14], %21 {strides = array<i32>} : memref<16x256xf32, #tpu.memory_space<vmem>>, vector<16x256xf32>,
    } else {
    }
    %c512_i32 = arith.constant 512 : i32
    %8 = arith.muli %arg2, %c512_i32 : i32
    %9 = tpu.assume_multiple %8, 512 : i32
    %c0 = arith.constant 0 : index
    %c0_4 = arith.constant 0 : index
    %10 = vector.load %arg8[%c0, %c0_4] : memref<16x256xf32, #tpu.memory_space<vmem>>, vector<16x256xf32>
    %c0_5 = arith.constant 0 : index
    %c0_6 = arith.constant 0 : index
    %c0_7 = arith.constant 0 : index
    %11 = vector.load %arg3[%c0_5, %c0_6, %c0_7] : memref<1x16x512xbf16, #tpu.memory_space<vmem>>, vector<1x16x512xbf16>
    %12 = vector.shape_cast %11 : vector<1x16x512xbf16> to vector<16x512xbf16>
    %13 = arith.index_cast %9 : i32 to index
    %c0_8 = arith.constant 0 : index
    %14 = vector.load %arg4[%13, %c0_8] : memref<2048x256xbf16, #tpu.memory_space<vmem>>, vector<512x256xbf16>
    %cst = arith.constant dense<0.000000e+00> : vector<16x256xf32>
    %15 = tpu.matmul %12, %14, %cst {dimension_numbers = #tpu.dot_dimension_numbers<[1], [0], [0], [1], [0, 0, 1, 1], [], []>} : vector<16x512xbf16>, vector<512x256xbf16>, vector<16x256xf32> -> vector<16x256xf32>
    %16 = arith.addf %10, %15 : vector<16x256xf32>
    %c0_9 = arith.constant 0 : index
    %c0_10 = arith.constant 0 : index
    %17 = vector.load %arg8[%c0_9, %c0_10] : memref<16x256xf32, #tpu.memory_space<vmem>>, vector<16x256xf32>
    tpu.vector_store %arg8[%c0_9, %c0_10], %16 {strides = array<i32>} : memref<16x256xf32, #tpu.memory_space<vmem>>, vector<16x256xf32>,
    %c3_i32 = arith.constant 3 : i32
    %18 = arith.cmpi eq, %arg2, %c3_i32 : i32
    %19 = arith.extui %18 : i1 to i32
    %c0_i32_11 = arith.constant 0 : i32
    %20 = arith.cmpi ne, %19, %c0_i32_11 : i32
    scf.if %20 {
      %c0_12 = arith.constant 0 : index
      %c0_13 = arith.constant 0 : index
      %21 = vector.load %arg8[%c0_12, %c0_13] : memref<16x256xf32, #tpu.memory_space<vmem>>, vector<16x256xf32>
      %c0_14 = arith.constant 0 : index
      %c0_15 = arith.constant 0 : index
      %c0_16 = arith.constant 0 : index
      %22 = vector.load %arg5[%c0_14, %c0_15, %c0_16] : memref<1x16x256xf32, #tpu.memory_space<vmem>>, vector<1x16x256xf32>
      %23 = vector.shape_cast %22 : vector<1x16x256xf32> to vector<16x256xf32>
      %24 = vector.shape_cast %21 : vector<16x256xf32> to vector<1x16x256xf32>
      tpu.vector_store %arg5[%c0_14, %c0_15, %c0_16], %24 {strides = array<i32>} : memref<1x16x256xf32, #tpu.memory_space<vmem>>, vector<1x16x256xf32>,
      %c0_17 = arith.constant 0 : index
      %c0_18 = arith.constant 0 : index
      %c0_19 = arith.constant 0 : index
      %25 = vector.load %arg6[%c0_17, %c0_18, %c0_19] : memref<1x1x256xf32, #tpu.memory_space<vmem>>, vector<1x1x256xf32>
      %26 = vector.shape_cast %25 : vector<1x1x256xf32> to vector<1x256xf32>
      %cst_20 = arith.constant dense<0.000000e+00> : vector<256xf32>
      %27 = vector.multi_reduction <add>, %21, %cst_20 [0] : vector<16x256xf32> to vector<256xf32>
      %28 = vector.shape_cast %27 : vector<256xf32> to vector<1x256xf32>
      %29 = arith.addf %26, %28 : vector<1x256xf32>
      %c0_21 = arith.constant 0 : index
      %c0_22 = arith.constant 0 : index
      %c0_23 = arith.constant 0 : index
      %30 = vector.load %arg6[%c0_21, %c0_22, %c0_23] : memref<1x1x256xf32, #tpu.memory_space<vmem>>, vector<1x1x256xf32>
      %31 = vector.shape_cast %30 : vector<1x1x256xf32> to vector<1x256xf32>
      %32 = vector.shape_cast %29 : vector<1x256xf32> to vector<1x1x256xf32>
      tpu.vector_store %arg6[%c0_21, %c0_22, %c0_23], %32 {strides = array<i32>} : memref<1x1x256xf32, #tpu.memory_space<vmem>>, vector<1x1x256xf32>,
      %c0_24 = arith.constant 0 : index
      %c0_25 = arith.constant 0 : index
      %c0_26 = arith.constant 0 : index
      %33 = vector.load %arg7[%c0_24, %c0_25, %c0_26] : memref<1x1x256xf32, #tpu.memory_space<vmem>>, vector<1x1x256xf32>
      %34 = vector.shape_cast %33 : vector<1x1x256xf32> to vector<1x256xf32>
      %35 = arith.mulf %21, %21 : vector<16x256xf32>
      %cst_27 = arith.constant dense<0.000000e+00> : vector<256xf32>
      %36 = vector.multi_reduction <add>, %35, %cst_27 [0] : vector<16x256xf32> to vector<256xf32>
      %37 = vector.shape_cast %36 : vector<256xf32> to vector<1x256xf32>
      %38 = arith.addf %34, %37 : vector<1x256xf32>
      %c0_28 = arith.constant 0 : index
      %c0_29 = arith.constant 0 : index
      %c0_30 = arith.constant 0 : index
      %39 = vector.load %arg7[%c0_28, %c0_29, %c0_30] : memref<1x1x256xf32, #tpu.memory_space<vmem>>, vector<1x1x256xf32>
      %40 = vector.shape_cast %39 : vector<1x1x256xf32> to vector<1x256xf32>
      %41 = vector.shape_cast %38 : vector<1x256xf32> to vector<1x1x256xf32>
      tpu.vector_store %arg7[%c0_28, %c0_29, %c0_30], %41 {strides = array<i32>} : memref<1x1x256xf32, #tpu.memory_space<vmem>>, vector<1x1x256xf32>,
    } else {
    }
    return
  }
  func.func @transform_0(%arg0: i32, %arg1: i32, %arg2: i32) -> (i32, i32, i32) {
    %c0_i32 = arith.constant 0 : i32
    return %arg0, %arg1, %arg2 : i32, i32, i32
  }
  func.func @transform_1(%arg0: i32, %arg1: i32, %arg2: i32) -> (i32, i32) {
    %c0_i32 = arith.constant 0 : i32
    %c0_i32_0 = arith.constant 0 : i32
    %c0_i32_1 = arith.constant 0 : i32
    return %c0_i32, %c0_i32_0 : i32, i32
  }
  func.func @transform_2(%arg0: i32, %arg1: i32, %arg2: i32) -> (i32, i32, i32) {
    %c0_i32 = arith.constant 0 : i32
    %c0_i32_0 = arith.constant 0 : i32
    return %arg0, %arg1, %c0_i32 : i32, i32, i32
  }
  func.func @transform_3(%arg0: i32, %arg1: i32, %arg2: i32) -> (i32, i32, i32) {
    %c0_i32 = arith.constant 0 : i32
    %c0_i32_0 = arith.constant 0 : i32
    %c0_i32_1 = arith.constant 0 : i32
    return %arg0, %c0_i32, %c0_i32_0 : i32, i32, i32
  }
  func.func @transform_4(%arg0: i32, %arg1: i32, %arg2: i32) -> (i32, i32, i32) {
    %c0_i32 = arith.constant 0 : i32
    %c0_i32_0 = arith.constant 0 : i32
    %c0_i32_1 = arith.constant 0 : i32
    return %arg0, %c0_i32, %c0_i32_0 : i32, i32, i32
  }
}

module attributes {stable_mosaic.version = 11 : i64} {
  func.func @_inorm_lrelu_kernel(%arg0: i32, %arg1: i32, %arg2: memref<1x16x256xf32, #tpu.memory_space<vmem>>, %arg3: memref<1x1x256xf32, #tpu.memory_space<vmem>>, %arg4: memref<1x1x256xf32, #tpu.memory_space<vmem>>, %arg5: memref<1x16x256xbf16, #tpu.memory_space<vmem>>) attributes {dimension_semantics = [#tpu.dimension_semantics<parallel>, #tpu.dimension_semantics<parallel>], iteration_bounds = array<i64: 2, 1>, scalar_prefetch = 0 : i64, scratch_operands = 0 : i64, tpu.core_type = #tpu.core_type<tc>, window_params = [{transform_indices = @transform_0, window_bounds = array<i64: 1, 16, 256>}, {transform_indices = @transform_1, window_bounds = array<i64: 1, 1, 256>}, {transform_indices = @transform_2, window_bounds = array<i64: 1, 1, 256>}, {transform_indices = @transform_3, window_bounds = array<i64: 1, 16, 256>}]} {
    %c0 = arith.constant 0 : index
    %c0_0 = arith.constant 0 : index
    %c0_1 = arith.constant 0 : index
    %0 = vector.load %arg2[%c0, %c0_0, %c0_1] : memref<1x16x256xf32, #tpu.memory_space<vmem>>, vector<1x16x256xf32>
    %1 = vector.shape_cast %0 : vector<1x16x256xf32> to vector<16x256xf32>
    %c0_2 = arith.constant 0 : index
    %c0_3 = arith.constant 0 : index
    %c0_4 = arith.constant 0 : index
    %2 = vector.load %arg3[%c0_2, %c0_3, %c0_4] : memref<1x1x256xf32, #tpu.memory_space<vmem>>, vector<1x1x256xf32>
    %3 = vector.shape_cast %2 : vector<1x1x256xf32> to vector<1x256xf32>
    %cst = arith.constant 6.250000e-02 : f32
    %4 = vector.broadcast %cst : f32 to vector<1x256xf32>
    %5 = arith.mulf %3, %4 : vector<1x256xf32>
    %c0_5 = arith.constant 0 : index
    %c0_6 = arith.constant 0 : index
    %c0_7 = arith.constant 0 : index
    %6 = vector.load %arg4[%c0_5, %c0_6, %c0_7] : memref<1x1x256xf32, #tpu.memory_space<vmem>>, vector<1x1x256xf32>
    %7 = vector.shape_cast %6 : vector<1x1x256xf32> to vector<1x256xf32>
    %cst_8 = arith.constant 6.250000e-02 : f32
    %8 = vector.broadcast %cst_8 : f32 to vector<1x256xf32>
    %9 = arith.mulf %7, %8 : vector<1x256xf32>
    %10 = arith.mulf %5, %5 : vector<1x256xf32>
    %11 = arith.subf %9, %10 : vector<1x256xf32>
    %12 = vector.broadcast %5 : vector<1x256xf32> to vector<16x256xf32>
    %13 = arith.subf %1, %12 : vector<16x256xf32>
    %cst_9 = arith.constant 9.99999974E-6 : f32
    %14 = vector.broadcast %cst_9 : f32 to vector<1x256xf32>
    %15 = arith.addf %11, %14 : vector<1x256xf32>
    %16 = math.rsqrt %15 : vector<1x256xf32>
    %17 = vector.broadcast %16 : vector<1x256xf32> to vector<16x256xf32>
    %18 = arith.mulf %13, %17 : vector<16x256xf32>
    %cst_10 = arith.constant 0.000000e+00 : f32
    %19 = vector.broadcast %cst_10 : f32 to vector<16x256xf32>
    %20 = arith.cmpf ogt, %18, %19 : vector<16x256xf32>
    %cst_11 = arith.constant 2.000000e-01 : f32
    %21 = vector.broadcast %cst_11 : f32 to vector<16x256xf32>
    %22 = arith.mulf %21, %18 : vector<16x256xf32>
    %23 = arith.select %20, %18, %22 : vector<16x256xi1>, vector<16x256xf32>
    %24 = arith.truncf %23 : vector<16x256xf32> to vector<16x256xbf16>
    %c0_12 = arith.constant 0 : index
    %c0_13 = arith.constant 0 : index
    %c0_14 = arith.constant 0 : index
    %25 = vector.load %arg5[%c0_12, %c0_13, %c0_14] : memref<1x16x256xbf16, #tpu.memory_space<vmem>>, vector<1x16x256xbf16>
    %26 = vector.shape_cast %25 : vector<1x16x256xbf16> to vector<16x256xbf16>
    %27 = vector.shape_cast %24 : vector<16x256xbf16> to vector<1x16x256xbf16>
    tpu.vector_store %arg5[%c0_12, %c0_13, %c0_14], %27 {strides = array<i32>} : memref<1x16x256xbf16, #tpu.memory_space<vmem>>, vector<1x16x256xbf16>,
    return
  }
  func.func @transform_0(%arg0: i32, %arg1: i32) -> (i32, i32, i32) {
    %c0_i32 = arith.constant 0 : i32
    %c0_i32_0 = arith.constant 0 : i32
    return %arg0, %arg1, %c0_i32 : i32, i32, i32
  }
  func.func @transform_1(%arg0: i32, %arg1: i32) -> (i32, i32, i32) {
    %c0_i32 = arith.constant 0 : i32
    %c0_i32_0 = arith.constant 0 : i32
    %c0_i32_1 = arith.constant 0 : i32
    return %arg0, %c0_i32, %c0_i32_0 : i32, i32, i32
  }
  func.func @transform_2(%arg0: i32, %arg1: i32) -> (i32, i32, i32) {
    %c0_i32 = arith.constant 0 : i32
    %c0_i32_0 = arith.constant 0 : i32
    %c0_i32_1 = arith.constant 0 : i32
    return %arg0, %c0_i32, %c0_i32_0 : i32, i32, i32
  }
  func.func @transform_3(%arg0: i32, %arg1: i32) -> (i32, i32, i32) {
    %c0_i32 = arith.constant 0 : i32
    %c0_i32_0 = arith.constant 0 : i32
    return %arg0, %arg1, %c0_i32 : i32, i32, i32
  }
}

module attributes {stable_mosaic.version = 11 : i64} {
  func.func @_norm_mm_kernel(%arg0: i32, %arg1: i32, %arg2: i32, %arg3: memref<1x16x512xbf16, #tpu.memory_space<vmem>>, %arg4: memref<4096x512xbf16, #tpu.memory_space<vmem>>, %arg5: memref<1x16x512xf32, #tpu.memory_space<vmem>>, %arg6: memref<1x1x512xf32, #tpu.memory_space<vmem>>, %arg7: memref<1x1x512xf32, #tpu.memory_space<vmem>>, %arg8: memref<16x512xf32, #tpu.memory_space<vmem>>) attributes {dimension_semantics = [#tpu.dimension_semantics<parallel>, #tpu.dimension_semantics<arbitrary>, #tpu.dimension_semantics<arbitrary>], iteration_bounds = array<i64: 2, 1, 8>, scalar_prefetch = 0 : i64, scratch_operands = 1 : i64, tpu.core_type = #tpu.core_type<tc>, window_params = [{transform_indices = @transform_0, window_bounds = array<i64: 1, 16, 512>}, {pipeline_mode = #tpu.pipeline_mode<synchronous>, transform_indices = @transform_1, window_bounds = array<i64: 4096, 512>}, {transform_indices = @transform_2, window_bounds = array<i64: 1, 16, 512>}, {transform_indices = @transform_3, window_bounds = array<i64: 1, 1, 512>}, {transform_indices = @transform_4, window_bounds = array<i64: 1, 1, 512>}]} {
    %c0_i32 = arith.constant 0 : i32
    %0 = arith.cmpi eq, %arg1, %c0_i32 : i32
    %c0_i32_0 = arith.constant 0 : i32
    %1 = arith.cmpi eq, %arg2, %c0_i32_0 : i32
    %2 = arith.andi %0, %1 : i1
    %3 = arith.extui %2 : i1 to i32
    %c0_i32_1 = arith.constant 0 : i32
    %4 = arith.cmpi ne, %3, %c0_i32_1 : i32
    scf.if %4 {
      %cst_12 = arith.constant 0.000000e+00 : f32
      %21 = vector.broadcast %cst_12 : f32 to vector<1x1x512xf32>
      %c0_13 = arith.constant 0 : index
      %c0_14 = arith.constant 0 : index
      %c0_15 = arith.constant 0 : index
      %22 = vector.load %arg6[%c0_13, %c0_14, %c0_15] : memref<1x1x512xf32, #tpu.memory_space<vmem>>, vector<1x1x512xf32>
      tpu.vector_store %arg6[%c0_13, %c0_14, %c0_15], %21 {strides = array<i32>} : memref<1x1x512xf32, #tpu.memory_space<vmem>>, vector<1x1x512xf32>,
      %cst_16 = arith.constant 0.000000e+00 : f32
      %23 = vector.broadcast %cst_16 : f32 to vector<1x1x512xf32>
      %c0_17 = arith.constant 0 : index
      %c0_18 = arith.constant 0 : index
      %c0_19 = arith.constant 0 : index
      %24 = vector.load %arg7[%c0_17, %c0_18, %c0_19] : memref<1x1x512xf32, #tpu.memory_space<vmem>>, vector<1x1x512xf32>
      tpu.vector_store %arg7[%c0_17, %c0_18, %c0_19], %23 {strides = array<i32>} : memref<1x1x512xf32, #tpu.memory_space<vmem>>, vector<1x1x512xf32>,
    } else {
    }
    %c0_i32_2 = arith.constant 0 : i32
    %5 = arith.cmpi eq, %arg2, %c0_i32_2 : i32
    %6 = arith.extui %5 : i1 to i32
    %c0_i32_3 = arith.constant 0 : i32
    %7 = arith.cmpi ne, %6, %c0_i32_3 : i32
    scf.if %7 {
      %cst_12 = arith.constant 0.000000e+00 : f32
      %21 = vector.broadcast %cst_12 : f32 to vector<16x512xf32>
      %c0_13 = arith.constant 0 : index
      %c0_14 = arith.constant 0 : index
      %22 = vector.load %arg8[%c0_13, %c0_14] : memref<16x512xf32, #tpu.memory_space<vmem>>, vector<16x512xf32>
      tpu.vector_store %arg8[%c0_13, %c0_14], %21 {strides = array<i32>} : memref<16x512xf32, #tpu.memory_space<vmem>>, vector<16x512xf32>,
    } else {
    }
    %c512_i32 = arith.constant 512 : i32
    %8 = arith.muli %arg2, %c512_i32 : i32
    %9 = tpu.assume_multiple %8, 512 : i32
    %c0 = arith.constant 0 : index
    %c0_4 = arith.constant 0 : index
    %10 = vector.load %arg8[%c0, %c0_4] : memref<16x512xf32, #tpu.memory_space<vmem>>, vector<16x512xf32>
    %c0_5 = arith.constant 0 : index
    %c0_6 = arith.constant 0 : index
    %c0_7 = arith.constant 0 : index
    %11 = vector.load %arg3[%c0_5, %c0_6, %c0_7] : memref<1x16x512xbf16, #tpu.memory_space<vmem>>, vector<1x16x512xbf16>
    %12 = vector.shape_cast %11 : vector<1x16x512xbf16> to vector<16x512xbf16>
    %13 = arith.index_cast %9 : i32 to index
    %c0_8 = arith.constant 0 : index
    %14 = vector.load %arg4[%13, %c0_8] : memref<4096x512xbf16, #tpu.memory_space<vmem>>, vector<512x512xbf16>
    %cst = arith.constant dense<0.000000e+00> : vector<16x512xf32>
    %15 = tpu.matmul %12, %14, %cst {dimension_numbers = #tpu.dot_dimension_numbers<[1], [0], [0], [1], [0, 0, 1, 1], [], []>} : vector<16x512xbf16>, vector<512x512xbf16>, vector<16x512xf32> -> vector<16x512xf32>
    %16 = arith.addf %10, %15 : vector<16x512xf32>
    %c0_9 = arith.constant 0 : index
    %c0_10 = arith.constant 0 : index
    %17 = vector.load %arg8[%c0_9, %c0_10] : memref<16x512xf32, #tpu.memory_space<vmem>>, vector<16x512xf32>
    tpu.vector_store %arg8[%c0_9, %c0_10], %16 {strides = array<i32>} : memref<16x512xf32, #tpu.memory_space<vmem>>, vector<16x512xf32>,
    %c7_i32 = arith.constant 7 : i32
    %18 = arith.cmpi eq, %arg2, %c7_i32 : i32
    %19 = arith.extui %18 : i1 to i32
    %c0_i32_11 = arith.constant 0 : i32
    %20 = arith.cmpi ne, %19, %c0_i32_11 : i32
    scf.if %20 {
      %c0_12 = arith.constant 0 : index
      %c0_13 = arith.constant 0 : index
      %21 = vector.load %arg8[%c0_12, %c0_13] : memref<16x512xf32, #tpu.memory_space<vmem>>, vector<16x512xf32>
      %c0_14 = arith.constant 0 : index
      %c0_15 = arith.constant 0 : index
      %c0_16 = arith.constant 0 : index
      %22 = vector.load %arg5[%c0_14, %c0_15, %c0_16] : memref<1x16x512xf32, #tpu.memory_space<vmem>>, vector<1x16x512xf32>
      %23 = vector.shape_cast %22 : vector<1x16x512xf32> to vector<16x512xf32>
      %24 = vector.shape_cast %21 : vector<16x512xf32> to vector<1x16x512xf32>
      tpu.vector_store %arg5[%c0_14, %c0_15, %c0_16], %24 {strides = array<i32>} : memref<1x16x512xf32, #tpu.memory_space<vmem>>, vector<1x16x512xf32>,
      %c0_17 = arith.constant 0 : index
      %c0_18 = arith.constant 0 : index
      %c0_19 = arith.constant 0 : index
      %25 = vector.load %arg6[%c0_17, %c0_18, %c0_19] : memref<1x1x512xf32, #tpu.memory_space<vmem>>, vector<1x1x512xf32>
      %26 = vector.shape_cast %25 : vector<1x1x512xf32> to vector<1x512xf32>
      %cst_20 = arith.constant dense<0.000000e+00> : vector<512xf32>
      %27 = vector.multi_reduction <add>, %21, %cst_20 [0] : vector<16x512xf32> to vector<512xf32>
      %28 = vector.shape_cast %27 : vector<512xf32> to vector<1x512xf32>
      %29 = arith.addf %26, %28 : vector<1x512xf32>
      %c0_21 = arith.constant 0 : index
      %c0_22 = arith.constant 0 : index
      %c0_23 = arith.constant 0 : index
      %30 = vector.load %arg6[%c0_21, %c0_22, %c0_23] : memref<1x1x512xf32, #tpu.memory_space<vmem>>, vector<1x1x512xf32>
      %31 = vector.shape_cast %30 : vector<1x1x512xf32> to vector<1x512xf32>
      %32 = vector.shape_cast %29 : vector<1x512xf32> to vector<1x1x512xf32>
      tpu.vector_store %arg6[%c0_21, %c0_22, %c0_23], %32 {strides = array<i32>} : memref<1x1x512xf32, #tpu.memory_space<vmem>>, vector<1x1x512xf32>,
      %c0_24 = arith.constant 0 : index
      %c0_25 = arith.constant 0 : index
      %c0_26 = arith.constant 0 : index
      %33 = vector.load %arg7[%c0_24, %c0_25, %c0_26] : memref<1x1x512xf32, #tpu.memory_space<vmem>>, vector<1x1x512xf32>
      %34 = vector.shape_cast %33 : vector<1x1x512xf32> to vector<1x512xf32>
      %35 = arith.mulf %21, %21 : vector<16x512xf32>
      %cst_27 = arith.constant dense<0.000000e+00> : vector<512xf32>
      %36 = vector.multi_reduction <add>, %35, %cst_27 [0] : vector<16x512xf32> to vector<512xf32>
      %37 = vector.shape_cast %36 : vector<512xf32> to vector<1x512xf32>
      %38 = arith.addf %34, %37 : vector<1x512xf32>
      %c0_28 = arith.constant 0 : index
      %c0_29 = arith.constant 0 : index
      %c0_30 = arith.constant 0 : index
      %39 = vector.load %arg7[%c0_28, %c0_29, %c0_30] : memref<1x1x512xf32, #tpu.memory_space<vmem>>, vector<1x1x512xf32>
      %40 = vector.shape_cast %39 : vector<1x1x512xf32> to vector<1x512xf32>
      %41 = vector.shape_cast %38 : vector<1x512xf32> to vector<1x1x512xf32>
      tpu.vector_store %arg7[%c0_28, %c0_29, %c0_30], %41 {strides = array<i32>} : memref<1x1x512xf32, #tpu.memory_space<vmem>>, vector<1x1x512xf32>,
    } else {
    }
    return
  }
  func.func @transform_0(%arg0: i32, %arg1: i32, %arg2: i32) -> (i32, i32, i32) {
    %c0_i32 = arith.constant 0 : i32
    return %arg0, %arg1, %arg2 : i32, i32, i32
  }
  func.func @transform_1(%arg0: i32, %arg1: i32, %arg2: i32) -> (i32, i32) {
    %c0_i32 = arith.constant 0 : i32
    %c0_i32_0 = arith.constant 0 : i32
    %c0_i32_1 = arith.constant 0 : i32
    return %c0_i32, %c0_i32_0 : i32, i32
  }
  func.func @transform_2(%arg0: i32, %arg1: i32, %arg2: i32) -> (i32, i32, i32) {
    %c0_i32 = arith.constant 0 : i32
    %c0_i32_0 = arith.constant 0 : i32
    return %arg0, %arg1, %c0_i32 : i32, i32, i32
  }
  func.func @transform_3(%arg0: i32, %arg1: i32, %arg2: i32) -> (i32, i32, i32) {
    %c0_i32 = arith.constant 0 : i32
    %c0_i32_0 = arith.constant 0 : i32
    %c0_i32_1 = arith.constant 0 : i32
    return %arg0, %c0_i32, %c0_i32_0 : i32, i32, i32
  }
  func.func @transform_4(%arg0: i32, %arg1: i32, %arg2: i32) -> (i32, i32, i32) {
    %c0_i32 = arith.constant 0 : i32
    %c0_i32_0 = arith.constant 0 : i32
    %c0_i32_1 = arith.constant 0 : i32
    return %arg0, %c0_i32, %c0_i32_0 : i32, i32, i32
  }
}

module attributes {stable_mosaic.version = 11 : i64} {
  func.func @_inorm_lrelu_kernel(%arg0: i32, %arg1: i32, %arg2: memref<1x16x512xf32, #tpu.memory_space<vmem>>, %arg3: memref<1x1x512xf32, #tpu.memory_space<vmem>>, %arg4: memref<1x1x512xf32, #tpu.memory_space<vmem>>, %arg5: memref<1x16x512xbf16, #tpu.memory_space<vmem>>) attributes {dimension_semantics = [#tpu.dimension_semantics<parallel>, #tpu.dimension_semantics<parallel>], iteration_bounds = array<i64: 2, 1>, scalar_prefetch = 0 : i64, scratch_operands = 0 : i64, tpu.core_type = #tpu.core_type<tc>, window_params = [{transform_indices = @transform_0, window_bounds = array<i64: 1, 16, 512>}, {transform_indices = @transform_1, window_bounds = array<i64: 1, 1, 512>}, {transform_indices = @transform_2, window_bounds = array<i64: 1, 1, 512>}, {transform_indices = @transform_3, window_bounds = array<i64: 1, 16, 512>}]} {
    %c0 = arith.constant 0 : index
    %c0_0 = arith.constant 0 : index
    %c0_1 = arith.constant 0 : index
    %0 = vector.load %arg2[%c0, %c0_0, %c0_1] : memref<1x16x512xf32, #tpu.memory_space<vmem>>, vector<1x16x512xf32>
    %1 = vector.shape_cast %0 : vector<1x16x512xf32> to vector<16x512xf32>
    %c0_2 = arith.constant 0 : index
    %c0_3 = arith.constant 0 : index
    %c0_4 = arith.constant 0 : index
    %2 = vector.load %arg3[%c0_2, %c0_3, %c0_4] : memref<1x1x512xf32, #tpu.memory_space<vmem>>, vector<1x1x512xf32>
    %3 = vector.shape_cast %2 : vector<1x1x512xf32> to vector<1x512xf32>
    %cst = arith.constant 2.500000e-01 : f32
    %4 = vector.broadcast %cst : f32 to vector<1x512xf32>
    %5 = arith.mulf %3, %4 : vector<1x512xf32>
    %c0_5 = arith.constant 0 : index
    %c0_6 = arith.constant 0 : index
    %c0_7 = arith.constant 0 : index
    %6 = vector.load %arg4[%c0_5, %c0_6, %c0_7] : memref<1x1x512xf32, #tpu.memory_space<vmem>>, vector<1x1x512xf32>
    %7 = vector.shape_cast %6 : vector<1x1x512xf32> to vector<1x512xf32>
    %cst_8 = arith.constant 2.500000e-01 : f32
    %8 = vector.broadcast %cst_8 : f32 to vector<1x512xf32>
    %9 = arith.mulf %7, %8 : vector<1x512xf32>
    %10 = arith.mulf %5, %5 : vector<1x512xf32>
    %11 = arith.subf %9, %10 : vector<1x512xf32>
    %12 = vector.broadcast %5 : vector<1x512xf32> to vector<16x512xf32>
    %13 = arith.subf %1, %12 : vector<16x512xf32>
    %cst_9 = arith.constant 9.99999974E-6 : f32
    %14 = vector.broadcast %cst_9 : f32 to vector<1x512xf32>
    %15 = arith.addf %11, %14 : vector<1x512xf32>
    %16 = math.rsqrt %15 : vector<1x512xf32>
    %17 = vector.broadcast %16 : vector<1x512xf32> to vector<16x512xf32>
    %18 = arith.mulf %13, %17 : vector<16x512xf32>
    %cst_10 = arith.constant 0.000000e+00 : f32
    %19 = vector.broadcast %cst_10 : f32 to vector<16x512xf32>
    %20 = arith.cmpf ogt, %18, %19 : vector<16x512xf32>
    %cst_11 = arith.constant 2.000000e-01 : f32
    %21 = vector.broadcast %cst_11 : f32 to vector<16x512xf32>
    %22 = arith.mulf %21, %18 : vector<16x512xf32>
    %23 = arith.select %20, %18, %22 : vector<16x512xi1>, vector<16x512xf32>
    %24 = arith.truncf %23 : vector<16x512xf32> to vector<16x512xbf16>
    %c0_12 = arith.constant 0 : index
    %c0_13 = arith.constant 0 : index
    %c0_14 = arith.constant 0 : index
    %25 = vector.load %arg5[%c0_12, %c0_13, %c0_14] : memref<1x16x512xbf16, #tpu.memory_space<vmem>>, vector<1x16x512xbf16>
    %26 = vector.shape_cast %25 : vector<1x16x512xbf16> to vector<16x512xbf16>
    %27 = vector.shape_cast %24 : vector<16x512xbf16> to vector<1x16x512xbf16>
    tpu.vector_store %arg5[%c0_12, %c0_13, %c0_14], %27 {strides = array<i32>} : memref<1x16x512xbf16, #tpu.memory_space<vmem>>, vector<1x16x512xbf16>,
    return
  }
  func.func @transform_0(%arg0: i32, %arg1: i32) -> (i32, i32, i32) {
    %c0_i32 = arith.constant 0 : i32
    %c0_i32_0 = arith.constant 0 : i32
    return %arg0, %arg1, %c0_i32 : i32, i32, i32
  }
  func.func @transform_1(%arg0: i32, %arg1: i32) -> (i32, i32, i32) {
    %c0_i32 = arith.constant 0 : i32
    %c0_i32_0 = arith.constant 0 : i32
    %c0_i32_1 = arith.constant 0 : i32
    return %arg0, %c0_i32, %c0_i32_0 : i32, i32, i32
  }
  func.func @transform_2(%arg0: i32, %arg1: i32) -> (i32, i32, i32) {
    %c0_i32 = arith.constant 0 : i32
    %c0_i32_0 = arith.constant 0 : i32
    %c0_i32_1 = arith.constant 0 : i32
    return %arg0, %c0_i32, %c0_i32_0 : i32, i32, i32
  }
  func.func @transform_3(%arg0: i32, %arg1: i32) -> (i32, i32, i32) {
    %c0_i32 = arith.constant 0 : i32
    %c0_i32_0 = arith.constant 0 : i32
    return %arg0, %arg1, %c0_i32 : i32, i32, i32
  }
}

</mosaic_0001>

<bundles_post_ra>
// kernel: discriminator_forward.7
= control target key start
LH: loop header
LB: loop body
LE: loop exit
PB: predicated region body
PF: predicated region fallthrough
CT: control target
= control target key end

     0   :  { %s764_s12 = smov 0   ;;  %s840_s0 = inlined_call_operand.vmem [shape: bf16[512,48], index: 0, kind: input, shape index: {}]   ;;  %s841_s1 = inlined_call_operand.vmem [shape: bf16[48,128], index: 1, kind: input, shape index: {}]   ;;  %s842_s2 = inlined_call_operand.vmem [shape: f32[1,128], index: 2, kind: input, shape index: {}]   ;;  %s843_s3 = inlined_call_operand.vmem [shape: bf16[512,128], index: 3, kind: output, shape index: {}]  }
   0x1 LB: > { %s568_s13 = sadd.s32 4294967295, %s742_s12   ;;  %p572_p0 = scmp.ge.s32.totalorder %s742_s12, 1  ;;  %s742_s12 = sphi %s764_s12, %s13_s12  }
   0x2   : > { %p138_p1 = scmp.lt.s32.totalorder %s742_s12, 5 }
   0x4   : > { %p139_p2 = pnand %p572_p0, %p138_p1 }
   0x5   : > { %v725_v0 = vld [vmem:[%s841_s1] sm:$0xff] (!%p139_p2)   ;;  %s573_s16 = sshll.u32 (!%p139_p2), %s568_s13, 4  ;;  %v726_v1 = vld [vmem:[%s841_s1 + $0x8] sm:$0xff] (!%p139_p2)   ;;  %v727_v2 = vld [vmem:[%s841_s1 + $0x10] sm:$0xff] (!%p139_p2)   ;;  %vm262_vm0 = vcmask (!%p139_p2), 392192  }
   0x6   : > { %142 = sbr.rel (%p139_p2) target bundleno = 254 (0xfe), region = 32  ;;  %p163_p3 = scmp.lt.s32.totalorder (!%p139_p2), %s573_s16, 63  ;;  %689 = vmatprep.subr.bf16.mxu0 (!%p139_p2), %v725_v0  ;;  %711 = vmatprep.subr.bf16.mxu1 (!%p139_p2), %v725_v0  ;;  %v800_v11 = vld [vmem:[%s842_s2] ss:$0 sm:$0xff] (!%p139_p2) }
   0x7   : > { %690 = vmatpush3.bf16.msra.mxu0 (!%p139_p2), %v725_v0  ;;  %714 = vmatpush3.bf16.msra.mxu1 (!%p139_p2), %v725_v0 }
   0x8   : > { %691 = vmatprep.subr.bf16.mxu0 (!%p139_p2), %v726_v1  ;;  %712 = vmatprep.subr.bf16.mxu1 (!%p139_p2), %v726_v1 }
   0xb   : > { %692 = vmatpush3.bf16.msra.mxu0 (!%p139_p2), %v726_v1  ;;  %715 = vmatpush3.bf16.msra.mxu1 (!%p139_p2), %v726_v1 }
   0xc   : > { %693 = vmatprep.subr.bf16.mxu0 (!%p139_p2), %v727_v2  ;;  %713 = vmatprep.subr.bf16.mxu1 (!%p139_p2), %v727_v2 }
   0xd   : > { %s845_s16 = smov (!%p163_p3, %s573_s16), 63 }
   0xe   : > { %s574_s21 = sshll.u32 %s845_s16, 2 }
   0xf   : > { %s166_s24 = scalar_lea.vmem %s840_s0, %s574_s21  ;;  %694 = vmatpush3.bf16.msra.mxu0 %v727_v2  ;;  %716 = vmatpush3.bf16.msra.mxu1 %v727_v2  ;;  %s817_s29 = scalar_lea.vmem %s843_s3, %s574_s21 }
  0x10   : > { %v728_v3 = vld [vmem:[%s166_s24] sm:$0xff]   ;;  %v730_v5 = vld [vmem:[%s166_s24 + $0x8] sm:$0xff]   ;;  %v732_v7 = vld [vmem:[%s166_s24 + $0x10] sm:$0xff]  }
  0x11   : > { %v729_v4 = vld [vmem:[%s166_s24 + $0x20] sm:$0xff]   ;;  %695 = vmatprep.mubr.msk.bf16.mxu0 %vm262_vm0, %v728_v3  ;;  %v731_v6 = vld [vmem:[%s166_s24 + $0x28] sm:$0xff]   ;;  %v733_v8 = vld [vmem:[%s166_s24 + $0x30] sm:$0xff]  }
  0x12   : > { %703 = vmatprep.mubr.msk.bf16.mxu1 %vm262_vm0, %v729_v4  ;;  %696 = vmatmul.mubr.msk.bf16.vlgmr.msra.gmra.mrb[0].mxu0 %vm262_vm0, %v730_v5  ;;  %v734_v9 = vld [vmem:[%s166_s24 + $0x18] sm:$0xff]  }
  0x13   : > { %704 = vmatmul.mubr.msk.bf16.vlgmr.msra.gmra.mrb[0].mxu1 %vm262_vm0, %v731_v6  ;;  %699 = vmatprep.mubr.msk.bf16.mxu0 %vm262_vm0, %v732_v7  ;;  %v735_v10 = vld [vmem:[%s166_s24 + $0x38] sm:$0xff]  }
  0x14   : > { %707 = vmatprep.mubr.msk.bf16.mxu1 %vm262_vm0, %v733_v8 }
  0x1a   : > { %700 = vmatmul.mubr.msk.bf16.gmra.mrb[4].mxu0 %vm262_vm0, %v734_v9 }
  0x1b   : > { %708 = vmatmul.mubr.msk.bf16.gmra.mrb[4].mxu1 %vm262_vm0, %v735_v10 }
  0xe5   : > { %v697_v12 = vpop.f32.mrb[0].mxu0 }
  0xe6   : > { %v705_v13 = vpop.f32.mrb[0].mxu1  ;;  %v330_v14 = vadd.f32 %v697_v12, %v800_v11  ;;  %v321_v16 = vpop.f32.mrb[1].mxu0 }
  0xe7   : > { %v362_v15 = vadd.f32 %v705_v13, %v800_v11  ;;  %v353_v17 = vpop.f32.mrb[1].mxu1  ;;  %v322_v18 = vadd.f32 %v800_v11, %v321_v16  ;;  %v698_v20 = vpop.f32.mrb[2].mxu0 }
  0xe8   : > { %v354_v19 = vadd.f32 %v800_v11, %v353_v17  ;;  %v706_v21 = vpop.f32.mrb[2].mxu1  ;;  %vm386_vm1 = vcmp.gt.f32.partialorder %v330_v14, 0.0  ;;  %v402_v22 = vmul.f32 0.2, %v330_v14  ;;  %v333_v26 = vadd.f32 %v698_v20, %v800_v11  ;;  %v324_v28 = vpop.f32.mrb[3].mxu0 }
  0xe9   : > { %vm394_vm2 = vcmp.gt.f32.partialorder %v362_v15, 0.0  ;;  %v410_v23 = vmul.f32 0.2, %v362_v15  ;;  %vm384_vm3 = vcmp.gt.f32.partialorder %v322_v18, 0.0  ;;  %v400_v24 = vmul.f32 0.2, %v322_v18 }
  0xea   : > { %vm392_vm4 = vcmp.gt.f32.partialorder %v354_v19, 0.0  ;;  %v408_v25 = vmul.f32 0.2, %v354_v19  ;;  %v365_v27 = vadd.f32 %v706_v21, %v800_v11  ;;  %v356_v29 = vpop.f32.mrb[3].mxu1  ;;  %v418_v30 = vsel %vm386_vm1, %v330_v14, %v402_v22 }
  0xeb   : > { %v426_v31 = vsel %vm394_vm2, %v362_v15, %v410_v23  ;;  %v325_v32 = vadd.f32 %v800_v11, %v324_v28  ;;  %v357_v33 = vadd.f32 %v800_v11, %v356_v29  ;;  %vm387_vm5 = vcmp.gt.f32.partialorder %v333_v26, 0.0 }
  0xec   : > { %v403_v34 = vmul.f32 0.2, %v333_v26  ;;  %vm395_vm6 = vcmp.gt.f32.partialorder %v365_v27, 0.0  ;;  %v411_v35 = vmul.f32 0.2, %v365_v27  ;;  %v416_v38 = vsel %vm384_vm3, %v322_v18, %v400_v24 }
  0xed   : > { %vm385_vm7 = vcmp.gt.f32.partialorder %v325_v32, 0.0  ;;  %v401_v36 = vmul.f32 0.2, %v325_v32  ;;  %vm393_vm8 = vcmp.gt.f32.partialorder %v357_v33, 0.0  ;;  %v409_v37 = vmul.f32 0.2, %v357_v33 }
  0xee   : > { %v424_v39 = vsel %vm392_vm4, %v354_v19, %v408_v25  ;;  %v419_v40 = vsel %vm387_vm5, %v333_v26, %v403_v34  ;;  %v427_v41 = vsel %vm395_vm6, %v365_v27, %v411_v35  ;;  %v701_v42 = vpop.f32.mrb[4].mxu0  ;;  %v709_v43 = vpop.f32.mrb[4].mxu1 }
  0xef   : > { %v639_v44 = vpack.c.bf16 %v419_v40, %v418_v30  ;;  %v659_v45 = vpack.c.bf16 %v427_v41, %v426_v31  ;;  %v417_v46 = vsel %vm385_vm7, %v325_v32, %v401_v36  ;;  %v425_v47 = vsel %vm393_vm8, %v357_v33, %v409_v37  ;;  %v337_v48 = vpop.f32.mrb[5].mxu0  ;;  %v369_v49 = vpop.f32.mrb[5].mxu1 }
  0xf0   : > { %v634_v50 = vpack.c.bf16 %v417_v46, %v416_v38  ;;  %v654_v51 = vpack.c.bf16 %v425_v47, %v424_v39  ;;  %v346_v52 = vadd.f32 %v701_v42, %v800_v11  ;;  %v378_v53 = vadd.f32 %v709_v43, %v800_v11  ;;  %v702_v54 = vpop.f32.mrb[6].mxu0  ;;  %v710_v55 = vpop.f32.mrb[6].mxu1 }
  0xf1   : > { %671 = vst [vmem:[%s817_s29 + $0x8] sm:$0xff] %v639_v44   ;;  %675 = vst [vmem:[%s817_s29 + $0x28] sm:$0xff] %v659_v45   ;;  %v338_v56 = vadd.f32 %v800_v11, %v337_v48  ;;  %v370_v57 = vadd.f32 %v800_v11, %v369_v49  ;;  %v349_v58 = vadd.f32 %v702_v54, %v800_v11  ;;  %v340_v60 = vpop.f32.mrb[7].mxu0  ;;  %v372_v61 = vpop.f32.mrb[7].mxu1 }
  0xf2   : > { %v381_v59 = vadd.f32 %v710_v55, %v800_v11  ;;  %635 = vst [vmem:[%s817_s29] sm:$0xff] %v634_v50   ;;  %674 = vst [vmem:[%s817_s29 + $0x20] sm:$0xff] %v654_v51   ;;  %v406_v62 = vmul.f32 0.2, %v346_v52  ;;  %vm390_vm9 = vcmp.gt.f32.partialorder %v346_v52, 0.0  ;;  %v414_v63 = vmul.f32 0.2, %v378_v53 }
  0xf3   : > { %vm398_vm10 = vcmp.gt.f32.partialorder %v378_v53, 0.0  ;;  %vm388_vm11 = vcmp.gt.f32.partialorder %v338_v56, 0.0  ;;  %vm391_vm12 = vcmp.gt.f32.partialorder %v349_v58, 0.0  ;;  %v407_v0 = vmul.f32 0.2, %v349_v58 }
  0xf4   : > { %v404_v1 = vmul.f32 0.2, %v338_v56  ;;  %vm396_vm13 = vcmp.gt.f32.partialorder %v370_v57, 0.0  ;;  %vm399_vm14 = vcmp.gt.f32.partialorder %v381_v59, 0.0  ;;  %v415_v2 = vmul.f32 0.2, %v381_v59 }
  0xf5   : > { %v422_v3 = vsel %vm390_vm9, %v346_v52, %v406_v62  ;;  %v423_v4 = vsel %vm391_vm12, %v349_v58, %v407_v0  ;;  %v341_v5 = vadd.f32 %v800_v11, %v340_v60  ;;  %v373_v6 = vadd.f32 %v800_v11, %v372_v61 }
  0xf6   : > { %v430_v7 = vsel %vm398_vm10, %v378_v53, %v414_v63  ;;  %v412_v8 = vmul.f32 0.2, %v370_v57  ;;  %v649_v9 = vpack.c.bf16 %v423_v4, %v422_v3  ;;  %v431_v10 = vsel %vm399_vm14, %v381_v59, %v415_v2 }
  0xf7   : > { %v669_v12 = vpack.c.bf16 %v431_v10, %v430_v7  ;;  %vm389_vm15 = vcmp.gt.f32.partialorder %v341_v5, 0.0  ;;  %v405_v13 = vmul.f32 0.2, %v341_v5  ;;  %vm397_vm0 = vcmp.gt.f32.partialorder %v373_v6, 0.0 }
  0xf8   : > { %673 = vst [vmem:[%s817_s29 + $0x18] sm:$0xff] %v649_v9   ;;  %v413_v14 = vmul.f32 0.2, %v373_v6  ;;  %v420_v15 = vsel %vm388_vm11, %v338_v56, %v404_v1  ;;  %v428_v17 = vsel %vm396_vm13, %v370_v57, %v412_v8 }
  0xf9   : > { %677 = vst [vmem:[%s817_s29 + $0x38] sm:$0xff] %v669_v12   ;;  %v421_v16 = vsel %vm389_vm15, %v341_v5, %v405_v13 }
  0xfa   : > { %v644_v18 = vpack.c.bf16 %v421_v16, %v420_v15  ;;  %v429_v11 = vsel %vm397_vm0, %v373_v6, %v413_v14 }
  0xfb   : > { %v664_v19 = vpack.c.bf16 %v429_v11, %v428_v17 }
  0xfc   : > { %672 = vst [vmem:[%s817_s29 + $0x10] sm:$0xff] %v644_v18  }
  0xfd   : > { %676 = vst [vmem:[%s817_s29 + $0x30] sm:$0xff] %v664_v19  }
  0xfe PF: > { %s13_s12 = sadd.s32 1, %s742_s12  }
  0xff   : > { %p10_p4 = scmp.ge.s32.totalorder %s13_s12, 6  }
 0x101   :  { %12 = sbr.rel (!%p10_p4) target bundleno = 1 (0x1), region = 62 }

// kernel: discriminator_forward.8
= control target key start
LH: loop header
LB: loop body
LE: loop exit
PB: predicated region body
PF: predicated region fallthrough
CT: control target
= control target key end

     0   :  { %s1393_s15 = smov 0   ;;  %s1395_s16 = smov 0   ;;  %s1585_s0 = inlined_call_operand.vmem [shape: bf16[2,64,1024], index: 0, kind: input, shape index: {}]   ;;  %s1586_s1 = inlined_call_operand.vmem [shape: bf16[1024,128], index: 1, kind: input, shape index: {}]   ;;  %s1587_s2 = inlined_call_operand.vmem [shape: f32[2,64,128], index: 2, kind: output, shape index: {0}]   ;;  %s1588_s3 = inlined_call_operand.vmem [shape: f32[2,1,128], index: 3, kind: output, shape index: {1}]   ;;  %s1589_s4 = inlined_call_operand.vmem [shape: f32[2,1,128], index: 4, kind: output, shape index: {2}]  }
   0x1   :  { %s1397_s17 = smov 0   ;;  %s1399_s18 = smov 0  }
   0x2   :  { %s1401_s19 = smov 0   ;;  %s1403_s20 = smov 0  }
   0x3   :  { %s1405_s21 = smov 0  }
   0x4 LB: > { %s27_s22 = sadd.s32 1, %s1356_s19  ;;  %s34_s23 = sadd.s32 1, %s1360_s20  ;;  %s1364_s21 = sphi %s1405_s21, %s15_s21   ;;  %s1360_s20 = sphi %s1403_s20, %s1595_s20   ;;  %s1356_s19 = sphi %s1401_s19, %s1594_s19   ;;  %s1352_s18 = sphi %s1399_s18, %s1593_s18   ;;  %s1348_s17 = sphi %s1397_s17, %s1592_s17   ;;  %s1344_s16 = sphi %s1395_s16, %s1591_s16   ;;  %s1340_s15 = sphi %s1393_s15, %s1590_s15  }
   0x5   : > { %p28_p0 = scmp.ge.s32.totalorder %s27_s22, 2  ;;  %p52_p1 = scmp.ne.s32.totalorder %s1344_s16, %s1340_s15 }
   0x6   : > { %p53_p2 = scmp.eq.s32.totalorder %s1364_s21, 0  ;;  %s45_s27 = sadd.s32 1, %s1344_s16 }
   0x7   : > { %s1597_s22 = smov (%p28_p0, %s27_s22), 0  ;;  %s1599_s23 = smov (!%p28_p0, %s34_s23), %s1360_s20 }
   0x8   : > { %p54_p3 = por %p53_p2, %p52_p1  ;;  %p36_p4 = scmp.ge.s32.totalorder %s1599_s23, 2 }
   0x9   : > { %s41_s24 = ssub.s32 %s1356_s19, %s1597_s22  ;;  %p1050_p6 = scmp.ge.s32.totalorder %s1364_s21, 4 }
   0xa   : > { %s1601_s23 = smov (%p36_p4, %s1599_s23), 0 }
   0xb   : > { %s38_s25 = ssub.s32 %s1360_s20, %s1601_s23  ;;  %182 = sbr.rel (%p1050_p6) target bundleno = 33 (0x21), region = 20 }
   0xc   : > { %s42_s26 = sor.u32 %s41_s24, %s38_s25 }
   0xd   : > { %p43_p5 = scmp.eq.s32.totalorder %s42_s26, 0 }
   0xf   : > { %s1444_s28 = scalar_select %p43_p5, %s1344_s16, %s45_s27  }
  0x12   : > { %185 = sbr.rel (!%p54_p3) target bundleno = 33 (0x21), region = 24  ;;  %s187_s29 = sand.u32 (%p54_p3), 1, %s1344_s16  }
  0x13   : > { %s1052_s30 = sshll.u32 (%p54_p3), %s1356_s19, 2  ;;  %s1051_s5 = sshll.u32 (%p54_p3), %s187_s29, 7 }
  0x14   : > { %s1053_s6 = sshll.u32 (%p54_p3), %s1360_s20, 6  ;;  %s189_s12 = scalar_lea.vmem (%p54_p3), [#allocation3], %s1051_s5 }
  0x15   : > { %s195_s7 = sadd.s32 (%p54_p3), %s1053_s6, %s1052_s30 }
  0x16   : > { %s1054_s8 = sshll.u32 (%p54_p3), %s195_s7, 2 }
  0x17   : > { %s1453_s11 = scalar_lea.vmem (%p54_p3), %s1585_s0, %s1054_s8 }
  0x18   : > { %v210_v0 = vld [vmem:[%s1453_s11] sm:$0xff] (%p54_p3)  ;;  %v212_v1 = vld [vmem:[%s1453_s11 + $0x8] sm:$0xff] (%p54_p3) }
  0x19   : > { %v214_v2 = vld [vmem:[%s1453_s11 + $0x20] sm:$0xff]  ;;  %211 = vst [vmem:[%s189_s12] sm:$0xff] %v210_v0  ;;  %213 = vst [vmem:[%s189_s12 + $0x8] sm:$0xff] %v212_v1  ;;  %v216_v3 = vld [vmem:[%s1453_s11 + $0x28] sm:$0xff] }
  0x1a   : > { %215 = vst [vmem:[%s189_s12 + $0x10] sm:$0xff] %v214_v2  ;;  %v218_v4 = vld [vmem:[%s1453_s11 + $0x40] sm:$0xff]  ;;  %v220_v5 = vld [vmem:[%s1453_s11 + $0x48] sm:$0xff]  ;;  %217 = vst [vmem:[%s189_s12 + $0x18] sm:$0xff] %v216_v3 }
  0x1b   : > { %219 = vst [vmem:[%s189_s12 + $0x20] sm:$0xff] %v218_v4  ;;  %221 = vst [vmem:[%s189_s12 + $0x28] sm:$0xff] %v220_v5  ;;  %v222_v6 = vld [vmem:[%s1453_s11 + $0x60] sm:$0xff]  ;;  %v224_v7 = vld [vmem:[%s1453_s11 + $0x68] sm:$0xff] }
  0x1c   : > { %v226_v8 = vld [vmem:[%s1453_s11 + $0x80] sm:$0xff]  ;;  %223 = vst [vmem:[%s189_s12 + $0x30] sm:$0xff] %v222_v6  ;;  %225 = vst [vmem:[%s189_s12 + $0x38] sm:$0xff] %v224_v7  ;;  %v228_v9 = vld [vmem:[%s1453_s11 + $0x88] sm:$0xff] }
  0x1d   : > { %227 = vst [vmem:[%s189_s12 + $0x40] sm:$0xff] %v226_v8  ;;  %v230_v10 = vld [vmem:[%s1453_s11 + $0xa0] sm:$0xff]  ;;  %v232_v11 = vld [vmem:[%s1453_s11 + $0xa8] sm:$0xff]  ;;  %229 = vst [vmem:[%s189_s12 + $0x48] sm:$0xff] %v228_v9 }
  0x1e   : > { %231 = vst [vmem:[%s189_s12 + $0x50] sm:$0xff] %v230_v10  ;;  %233 = vst [vmem:[%s189_s12 + $0x58] sm:$0xff] %v232_v11  ;;  %v234_v12 = vld [vmem:[%s1453_s11 + $0xc0] sm:$0xff]  ;;  %v236_v13 = vld [vmem:[%s1453_s11 + $0xc8] sm:$0xff] }
  0x1f   : > { %v238_v14 = vld [vmem:[%s1453_s11 + $0xe0] sm:$0xff]  ;;  %235 = vst [vmem:[%s189_s12 + $0x60] sm:$0xff] %v234_v12  ;;  %237 = vst [vmem:[%s189_s12 + $0x68] sm:$0xff] %v236_v13  ;;  %v240_v15 = vld [vmem:[%s1453_s11 + $0xe8] sm:$0xff] }
  0x20   : > { %239 = vst [vmem:[%s189_s12 + $0x70] sm:$0xff] %v238_v14  ;;  %241 = vst [vmem:[%s189_s12 + $0x78] sm:$0xff] %v240_v15 }
  0x21 PF: > { %p1055_p7 = scmp.ge.s32.totalorder %s1364_s21, 1  ;;  %p246_p8 = scmp.lt.s32.totalorder %s1364_s21, 5 }
  0x23   : > { %p247_p9 = pnand %p1055_p7, %p246_p8 }
  0x24   : > { %s253_s13 = sand.u32 (!%p247_p9), 1, %s1340_s15   ;;  %p291_p10 = scmp.lt.s32.totalorder (!%p247_p9), %s1352_s18, 1 }
  0x25   : > { %250 = sbr.rel (%p247_p9) target bundleno = 371 (0x173), region = 47  ;;  %s1056_s14 = sshll.u32 (!%p247_p9), %s253_s13, 7 }
  0x26   : > { %p308_p11 = scmp.eq.s32.totalorder (!%p247_p9), %s1348_s17, 0  ;;  %s1492_s15 = scalar_lea.vmem (!%p247_p9), [#allocation3], %s1056_s14 }
  0x2c   : > { %s1603_s18 = smov (!%p291_p10, %s1352_s18), 1  ;;  %312 = sbr.rel (!%p308_p11) target bundleno = 51 (0x33), region = 55 }
  0x2d   : > { %s1114_s24 = sshll.u32 %s1603_s18, 6  ;;  %s1480_s27 = scalar_lea.vmem %s1588_s3, %s1603_s18  ;;  %v1366_v16 = vmov (%p308_p11), 0.0  }
  0x2e   : > { %s1485_s5 = scalar_lea.vmem %s1587_s2, %s1114_s24  ;;  %s1490_s8 = scalar_lea.vmem %s1589_s4, %s1603_s18  ;;  %313 = vst [vmem:[%s1480_s27] sm:$0x1] (%p308_p11), %v1366_v16 }
  0x2f   : > { %314 = vst [vmem:[%s1490_s8] sm:$0x1] (%p308_p11), %v1366_v16 }
  0x33 PF: > { %p1060_p12 = scmp.ne.s32.totalorder %s1348_s17, 0 }
  0x34   : > { %v1367_v17 = vmov (!%p1060_p12), 0.0  }
  0x35   : > { %317 = sbr.rel (%p1060_p12) target bundleno = 60 (0x3c), region = 59  ;;  %318 = vst [vmem:[#allocation2] sm:$0xff] (!%p1060_p12), %v1367_v17  ;;  %319 = vst [vmem:[#allocation2 + $0x8] sm:$0xff] (!%p1060_p12), %v1367_v17 }
  0x36   : > { %320 = vst [vmem:[#allocation2 + $0x10] sm:$0xff] (!%p1060_p12), %v1367_v17  ;;  %321 = vst [vmem:[#allocation2 + $0x18] sm:$0xff] (!%p1060_p12), %v1367_v17 }
  0x37   : > { %322 = vst [vmem:[#allocation2 + $0x20] sm:$0xff] (!%p1060_p12), %v1367_v17  ;;  %323 = vst [vmem:[#allocation2 + $0x28] sm:$0xff] (!%p1060_p12), %v1367_v17 }
  0x38   : > { %324 = vst [vmem:[#allocation2 + $0x30] sm:$0xff] (!%p1060_p12), %v1367_v17  ;;  %325 = vst [vmem:[#allocation2 + $0x38] sm:$0xff] (!%p1060_p12), %v1367_v17 }
  0x3c PF: > { %s1061_s18 = sshll.u32 %s1348_s17, 9  ;;  %v1288_v18 = vld [vmem:[%s1492_s15 + $0x4] ss:$16 sps:$4 sm:$0xff]   ;;  %v1291_v19 = vld [vmem:[%s1492_s15 + $0xc] ss:$16 sps:$4 sm:$0xff]   ;;  %p1111_p13 = scmp.ne.s32.totalorder %s1348_s17, 1 }
  0x3d   : > { %s351_s9 = sshra.s32 %s1061_s18, 3  ;;  %723 = vmatprep.mubr.bf16.mxu0 %v1288_v18  ;;  %788 = vmatprep.mubr.bf16.mxu1 %v1291_v19  ;;  %v1286_v50 = vld [vmem:[%s1492_s15] ss:$16 sps:$4 sm:$0xff]   ;;  %v1289_v53 = vld [vmem:[%s1492_s15 + $0x8] ss:$16 sps:$4 sm:$0xff]  }
  0x3e   : > { %s1062_s10 = sshll.u32 %s351_s9, 2  ;;  %v1292_v54 = vld [vmem:[%s1492_s15 + $0x24] ss:$16 sps:$4 sm:$0xff]   ;;  %v1294_v55 = vld [vmem:[%s1492_s15 + $0x2c] ss:$16 sps:$4 sm:$0xff]  }
  0x3f   : > { %s1503_s13 = scalar_lea.vmem %s1586_s1, %s1062_s10  ;;  %v1296_v56 = vld [vmem:[%s1492_s15 + $0x20] ss:$16 sps:$4 sm:$0xff]   ;;  %v1297_v57 = vld [vmem:[%s1492_s15 + $0x28] ss:$16 sps:$4 sm:$0xff]   ;;  %v1298_v58 = vld [vmem:[%s1492_s15 + $0x44] ss:$16 sps:$4 sm:$0xff]  }
  0x40   : > { %v1254_v20 = vld [vmem:[%s1503_s13 + $0x40] sm:$0xff]   ;;  %v1258_v24 = vld [vmem:[%s1503_s13 + $0x48] sm:$0xff]   ;;  %v1262_v28 = vld [vmem:[%s1503_s13 + $0x50] sm:$0xff]  }
  0x41   : > { %v1255_v21 = vld [vmem:[%s1503_s13 + $0xc0] sm:$0xff]   ;;  %1116 = vmatprep.subr.bf16.mxu0 %v1254_v20  ;;  %v1259_v25 = vld [vmem:[%s1503_s13 + $0xc8] sm:$0xff]   ;;  %v1263_v29 = vld [vmem:[%s1503_s13 + $0xd0] sm:$0xff]  }
  0x42   : > { %v1256_v22 = vld [vmem:[%s1503_s13] sm:$0xff]   ;;  %1156 = vmatprep.subr.bf16.mxu1 %v1255_v21  ;;  %v1260_v26 = vld [vmem:[%s1503_s13 + $0x8] sm:$0xff]   ;;  %v1264_v30 = vld [vmem:[%s1503_s13 + $0x10] sm:$0xff]  }
  0x43   : > { %v1257_v23 = vld [vmem:[%s1503_s13 + $0x80] sm:$0xff]   ;;  %1117 = vmatpush3.bf16.msra.mxu0 %v1256_v22  ;;  %v1261_v27 = vld [vmem:[%s1503_s13 + $0x88] sm:$0xff]   ;;  %v1265_v31 = vld [vmem:[%s1503_s13 + $0x90] sm:$0xff]  }
  0x44   : > { %1157 = vmatpush3.bf16.msra.mxu1 %v1257_v23  ;;  %1118 = vmatprep.subr.bf16.mxu0 %v1258_v24  ;;  %v1266_v32 = vld [vmem:[%s1503_s13 + $0x58] sm:$0xff]   ;;  %v1270_v36 = vld [vmem:[%s1503_s13 + $0x60] sm:$0xff]   ;;  %v1274_v40 = vld [vmem:[%s1503_s13 + $0x68] sm:$0xff]  }
  0x45   : > { %1158 = vmatprep.subr.bf16.mxu1 %v1259_v25  ;;  %v1267_v33 = vld [vmem:[%s1503_s13 + $0xd8] sm:$0xff]   ;;  %v1271_v37 = vld [vmem:[%s1503_s13 + $0xe0] sm:$0xff]   ;;  %v1275_v41 = vld [vmem:[%s1503_s13 + $0xe8] sm:$0xff]  }
  0x46   : > { %v1268_v34 = vld [vmem:[%s1503_s13 + $0x18] sm:$0xff]   ;;  %v1272_v38 = vld [vmem:[%s1503_s13 + $0x20] sm:$0xff]   ;;  %v1276_v42 = vld [vmem:[%s1503_s13 + $0x28] sm:$0xff]  }
  0x47   : > { %1119 = vmatpush3.bf16.msra.mxu0 %v1260_v26  ;;  %v1269_v35 = vld [vmem:[%s1503_s13 + $0x98] sm:$0xff]   ;;  %v1273_v39 = vld [vmem:[%s1503_s13 + $0xa0] sm:$0xff]   ;;  %v1277_v43 = vld [vmem:[%s1503_s13 + $0xa8] sm:$0xff]  }
  0x48   : > { %1159 = vmatpush3.bf16.msra.mxu1 %v1261_v27  ;;  %1120 = vmatprep.subr.bf16.mxu0 %v1262_v28  ;;  %v1278_v44 = vld [vmem:[%s1503_s13 + $0x70] sm:$0xff]   ;;  %v1282_v48 = vld [vmem:[%s1503_s13 + $0x78] sm:$0xff]   ;;  %v327_v11 = vld [vmem:[#allocation2] sm:$0xff] }
  0x49   : > { %1160 = vmatprep.subr.bf16.mxu1 %v1263_v29  ;;  %v1279_v45 = vld [vmem:[%s1503_s13 + $0xf0] sm:$0xff]   ;;  %v1283_v49 = vld [vmem:[%s1503_s13 + $0xf8] sm:$0xff]   ;;  %v328_v16 = vld [vmem:[#allocation2 + $0x8] sm:$0xff] }
  0x4a   : > { %v1280_v46 = vld [vmem:[%s1503_s13 + $0x30] sm:$0xff]   ;;  %v1284_v51 = vld [vmem:[%s1503_s13 + $0x38] sm:$0xff]  }
  0x4b   : > { %1121 = vmatpush3.bf16.msra.mxu0 %v1264_v30  ;;  %v1281_v47 = vld [vmem:[%s1503_s13 + $0xb0] sm:$0xff]   ;;  %v1285_v52 = vld [vmem:[%s1503_s13 + $0xb8] sm:$0xff]  }
  0x4c   : > { %1161 = vmatpush3.bf16.msra.mxu1 %v1265_v31  ;;  %1122 = vmatprep.subr.bf16.mxu0 %v1266_v32  ;;  %v1300_v59 = vld [vmem:[%s1492_s15 + $0x4c] ss:$16 sps:$4 sm:$0xff]   ;;  %v1302_v60 = vld [vmem:[%s1492_s15 + $0x40] ss:$16 sps:$4 sm:$0xff]   ;;  %v1303_v61 = vld [vmem:[%s1492_s15 + $0x48] ss:$16 sps:$4 sm:$0xff]  }
  0x4d   : > { %1162 = vmatprep.subr.bf16.mxu1 %v1267_v33  ;;  %v1304_v62 = vld [vmem:[%s1492_s15 + $0x64] ss:$16 sps:$4 sm:$0xff]   ;;  %v1306_v63 = vld [vmem:[%s1492_s15 + $0x6c] ss:$16 sps:$4 sm:$0xff]   ;;  %v1308_v0 = vld [vmem:[%s1492_s15 + $0x60] ss:$16 sps:$4 sm:$0xff]  }
  0x4e   : > { %v1309_v1 = vld [vmem:[%s1492_s15 + $0x68] ss:$16 sps:$4 sm:$0xff]   ;;  %v329_v29 = vld [vmem:[#allocation2 + $0x10] sm:$0xff] }
  0x4f   : > { %1123 = vmatpush3.bf16.msra.mxu0 %v1268_v34  ;;  %v330_v34 = vld [vmem:[#allocation2 + $0x18] sm:$0xff] }
  0x50   : > { %1163 = vmatpush3.bf16.msra.mxu1 %v1269_v35  ;;  %1124 = vmatprep.subr.bf16.mxu0 %v1270_v36 }
  0x51   : > { %1164 = vmatprep.subr.bf16.mxu1 %v1271_v37 }
  0x53   : > { %1125 = vmatpush3.bf16.msra.mxu0 %v1272_v38 }
  0x54   : > { %1165 = vmatpush3.bf16.msra.mxu1 %v1273_v39  ;;  %1126 = vmatprep.subr.bf16.mxu0 %v1274_v40 }
  0x55   : > { %1166 = vmatprep.subr.bf16.mxu1 %v1275_v41 }
  0x57   : > { %1127 = vmatpush3.bf16.msra.mxu0 %v1276_v42 }
  0x58   : > { %1167 = vmatpush3.bf16.msra.mxu1 %v1277_v43  ;;  %1128 = vmatprep.subr.bf16.mxu0 %v1278_v44 }
  0x59   : > { %1168 = vmatprep.subr.bf16.mxu1 %v1279_v45 }
  0x5b   : > { %1129 = vmatpush3.bf16.msra.mxu0 %v1280_v46 }
  0x5c   : > { %1169 = vmatpush3.bf16.msra.mxu1 %v1281_v47  ;;  %1130 = vmatprep.subr.bf16.mxu0 %v1282_v48  ;;  %v331_v47 = vld [vmem:[#allocation2 + $0x20] sm:$0xff] }
  0x5d   : > { %1170 = vmatprep.subr.bf16.mxu1 %v1283_v49 }
  0x5f   : > { %1131 = vmatpush3.bf16.msra.mxu0 %v1284_v51 }
  0x60   : > { %1171 = vmatpush3.bf16.msra.mxu1 %v1285_v52  ;;  %v332_v52 = vld [vmem:[#allocation2 + $0x28] sm:$0xff] }
  0x62   : > { %724 = vmatmul.mubr.bf16.vlgmr.msra.gmra.mrb[0].mxu0 %v1286_v50 }
  0x63   : > { %789 = vmatmul.mubr.bf16.vlgmr.msra.gmra.mrb[0].mxu1 %v1289_v53  ;;  %731 = vmatprep.mubr.bf16.mxu0 %v1292_v54 }
  0x64   : > { %796 = vmatprep.mubr.bf16.mxu1 %v1294_v55 }
  0x6a   : > { %732 = vmatmul.mubr.bf16.gmra.mrb[4].mxu0 %v1296_v56 }
  0x6b   : > { %797 = vmatmul.mubr.bf16.gmra.mrb[4].mxu1 %v1297_v57  ;;  %739 = vmatprep.mubr.bf16.mxu0 %v1298_v58 }
  0x6c   : > { %804 = vmatprep.mubr.bf16.mxu1 %v1300_v59 }
  0x72   : > { %740 = vmatmul.mubr.bf16.gmra.mrb[8].mxu0 %v1302_v60 }
  0x73   : > { %805 = vmatmul.mubr.bf16.gmra.mrb[8].mxu1 %v1303_v61  ;;  %747 = vmatprep.mubr.bf16.mxu0 %v1304_v62 }
  0x74   : > { %812 = vmatprep.mubr.bf16.mxu1 %v1306_v63 }
  0x7a   : > { %748 = vmatmul.mubr.bf16.gmra.mrb[12].mxu0 %v1308_v0 }
  0x7b   : > { %813 = vmatmul.mubr.bf16.gmra.mrb[12].mxu1 %v1309_v1  ;;  %v333_v1 = vld [vmem:[#allocation2 + $0x30] sm:$0xff] }
 0x135   : > { %v1132_v2 = vpop.f32.mrb[0].mxu0 }
 0x136   : > { %v1172_v3 = vpop.f32.mrb[0].mxu1  ;;  %v1133_v4 = vpop.f32.mrb[1].mxu0 }
 0x137   : > { %v1134_v5 = vadd.f32 %v1133_v4, %v1132_v2  ;;  %v1173_v6 = vpop.f32.mrb[1].mxu1  ;;  %v1135_v7 = vpop.f32.mrb[2].mxu0 }
 0x138   : > { %v1174_v8 = vadd.f32 %v1173_v6, %v1172_v3  ;;  %v1175_v9 = vpop.f32.mrb[2].mxu1  ;;  %v1136_v10 = vpop.f32.mrb[3].mxu0  ;;  %v334_v6 = vld [vmem:[#allocation2 + $0x38] sm:$0xff] }
 0x139   : > { %v1137_v12 = vadd.f32 %v1136_v10, %v1135_v7  ;;  %v1176_v13 = vpop.f32.mrb[3].mxu1 }
 0x13a   : > { %v791_v14 = vadd.f32 %v1174_v8, %v1134_v5  ;;  %v1177_v15 = vadd.f32 %v1176_v13, %v1175_v9 }
 0x13c   : > { %v821_v17 = vadd.f32 %v791_v14, %v327_v11  ;;  %v794_v18 = vadd.f32 %v1177_v15, %v1137_v12 }
 0x13d   : > { %v1138_v19 = vpop.f32.mrb[4].mxu0 }
 0x13e   : > { %829 = vst [vmem:[#allocation2] sm:$0xff] %v821_v17  ;;  %v822_v20 = vadd.f32 %v794_v18, %v328_v16  ;;  %v1178_v21 = vpop.f32.mrb[4].mxu1  ;;  %v1139_v22 = vpop.f32.mrb[5].mxu0 }
 0x13f   : > { %v1140_v23 = vadd.f32 %v1139_v22, %v1138_v19  ;;  %v1179_v24 = vpop.f32.mrb[5].mxu1  ;;  %v1141_v25 = vpop.f32.mrb[6].mxu0 }
 0x140   : > { %830 = vst [vmem:[#allocation2 + $0x8] sm:$0xff] %v822_v20  ;;  %v1180_v26 = vadd.f32 %v1179_v24, %v1178_v21  ;;  %v1181_v27 = vpop.f32.mrb[6].mxu1  ;;  %v1142_v28 = vpop.f32.mrb[7].mxu0 }
 0x141   : > { %v1143_v30 = vadd.f32 %v1142_v28, %v1141_v25  ;;  %v1182_v31 = vpop.f32.mrb[7].mxu1 }
 0x142   : > { %v799_v32 = vadd.f32 %v1180_v26, %v1140_v23  ;;  %v1183_v33 = vadd.f32 %v1182_v31, %v1181_v27 }
 0x144   : > { %v823_v35 = vadd.f32 %v799_v32, %v329_v29  ;;  %v802_v36 = vadd.f32 %v1183_v33, %v1143_v30 }
 0x145   : > { %v1144_v37 = vpop.f32.mrb[8].mxu0  ;;  %v841_v10 = vld [vmem:[#allocation2] sm:$0xff] (!%p1111_p13) }
 0x146   : > { %831 = vst [vmem:[#allocation2 + $0x10] sm:$0xff] %v823_v35  ;;  %v824_v38 = vadd.f32 %v802_v36, %v330_v34  ;;  %v1184_v39 = vpop.f32.mrb[8].mxu1  ;;  %v1145_v40 = vpop.f32.mrb[9].mxu0  ;;  %849 = vst [vmem:[%s1485_s5] sm:$0xff] (!%p1111_p13), %v841_v10  ;;  %v874_v13 = vmul.f32 (!%p1111_p13), %v841_v10, %v841_v10 }
 0x147   : > { %v1146_v41 = vadd.f32 %v1145_v40, %v1144_v37  ;;  %v1185_v42 = vpop.f32.mrb[9].mxu1  ;;  %v1147_v43 = vpop.f32.mrb[10].mxu0  ;;  %v842_v11 = vld [vmem:[#allocation2 + $0x8] sm:$0xff] (!%p1111_p13) }
 0x148   : > { %832 = vst [vmem:[#allocation2 + $0x18] sm:$0xff] %v824_v38  ;;  %v1186_v44 = vadd.f32 %v1185_v42, %v1184_v39  ;;  %v1187_v45 = vpop.f32.mrb[10].mxu1  ;;  %v1148_v46 = vpop.f32.mrb[11].mxu0  ;;  %850 = vst [vmem:[%s1485_s5 + $0x8] sm:$0xff] (!%p1111_p13), %v842_v11  ;;  %v858_v14 = vadd.f32 (!%p1111_p13), %v842_v11, %v841_v10  ;;  %v875_v15 = vmul.f32 (!%p1111_p13), %v842_v11, %v842_v11 }
 0x149   : > { %v1149_v48 = vadd.f32 %v1148_v46, %v1147_v43  ;;  %v1188_v49 = vpop.f32.mrb[11].mxu1 }
 0x14a   : > { %v807_v50 = vadd.f32 %v1186_v44, %v1146_v41  ;;  %v1189_v51 = vadd.f32 %v1188_v49, %v1187_v45  ;;  %v882_v22 = vadd.f32 (!%p1111_p13), %v875_v15, %v874_v13  ;;  %v857_v49 = vld [vmem:[%s1480_s27] sm:$0x1] (!%p1111_p13) }
 0x14c   : > { %v825_v53 = vadd.f32 %v807_v50, %v331_v47  ;;  %v810_v54 = vadd.f32 %v1189_v51, %v1149_v48 }
 0x14d   : > { %v1150_v55 = vpop.f32.mrb[12].mxu0  ;;  %v843_v12 = vld [vmem:[#allocation2 + $0x10] sm:$0xff] (!%p1111_p13) }
 0x14e   : > { %833 = vst [vmem:[#allocation2 + $0x20] sm:$0xff] %v825_v53  ;;  %v826_v56 = vadd.f32 %v810_v54, %v332_v52  ;;  %v1190_v57 = vpop.f32.mrb[12].mxu1  ;;  %v1151_v58 = vpop.f32.mrb[13].mxu0  ;;  %851 = vst [vmem:[%s1485_s5 + $0x10] sm:$0xff] (!%p1111_p13), %v843_v12  ;;  %v876_v16 = vmul.f32 (!%p1111_p13), %v843_v12, %v843_v12  ;;  %v859_v23 = vadd.f32 (!%p1111_p13), %v858_v14, %v843_v12  ;;  %v873_v52 = vld [vmem:[%s1490_s8] sm:$0x1] (!%p1111_p13) }
 0x14f   : > { %v1152_v59 = vadd.f32 %v1151_v58, %v1150_v55  ;;  %v1191_v60 = vpop.f32.mrb[13].mxu1  ;;  %v1153_v61 = vpop.f32.mrb[14].mxu0  ;;  %v844_v17 = vld [vmem:[#allocation2 + $0x18] sm:$0xff] (!%p1111_p13) }
 0x150   : > { %834 = vst [vmem:[#allocation2 + $0x28] sm:$0xff] %v826_v56  ;;  %v1192_v62 = vadd.f32 %v1191_v60, %v1190_v57  ;;  %v1193_v63 = vpop.f32.mrb[14].mxu1  ;;  %v1154_v0 = vpop.f32.mrb[15].mxu0  ;;  %852 = vst [vmem:[%s1485_s5 + $0x18] sm:$0xff] (!%p1111_p13), %v844_v17  ;;  %v877_v24 = vmul.f32 (!%p1111_p13), %v844_v17, %v844_v17  ;;  %v883_v25 = vadd.f32 (!%p1111_p13), %v882_v22, %v876_v16 }
 0x151   : > { %v1155_v2 = vadd.f32 %v1154_v0, %v1153_v61  ;;  %v1194_v3 = vpop.f32.mrb[15].mxu1  ;;  %v860_v26 = vadd.f32 (!%p1111_p13), %v859_v23, %v844_v17 }
 0x152   : > { %v815_v4 = vadd.f32 %v1192_v62, %v1152_v59  ;;  %v1195_v5 = vadd.f32 %v1194_v3, %v1193_v63  ;;  %840 = sbr.rel (%p1111_p13) target bundleno = 371 (0x173), region = 63  ;;  %v884_v28 = vadd.f32 (!%p1111_p13), %v883_v25, %v877_v24 }
 0x154   : > { %v827_v7 = vadd.f32 %v815_v4, %v333_v1  ;;  %v818_v8 = vadd.f32 %v1195_v5, %v1155_v2 }
 0x155   : > { %v845_v18 = vld [vmem:[#allocation2 + $0x20] sm:$0xff] (!%p1111_p13) }
 0x156   : > { %835 = vst [vmem:[#allocation2 + $0x30] sm:$0xff] %v827_v7  ;;  %v828_v9 = vadd.f32 %v818_v8, %v334_v6  ;;  %853 = vst [vmem:[%s1485_s5 + $0x20] sm:$0xff] (!%p1111_p13), %v845_v18  ;;  %v878_v27 = vmul.f32 (!%p1111_p13), %v845_v18, %v845_v18  ;;  %v861_v29 = vadd.f32 (!%p1111_p13), %v860_v26, %v845_v18 }
 0x157   : > { %v846_v19 = vld [vmem:[#allocation2 + $0x28] sm:$0xff] (!%p1111_p13) }
 0x158   : > { %836 = vst [vmem:[#allocation2 + $0x38] sm:$0xff] %v828_v9  ;;  %854 = vst [vmem:[%s1485_s5 + $0x28] sm:$0xff] (!%p1111_p13), %v846_v19  ;;  %v879_v30 = vmul.f32 (!%p1111_p13), %v846_v19, %v846_v19  ;;  %v885_v31 = vadd.f32 (!%p1111_p13), %v884_v28, %v878_v27  ;;  %v862_v32 = vadd.f32 (!%p1111_p13), %v861_v29, %v846_v19 }
 0x15a   : > { %v886_v34 = vadd.f32 %v885_v31, %v879_v30 }
 0x15d   : > { %v847_v20 = vld [vmem:[#allocation2 + $0x30] sm:$0xff] }
 0x15e   : > { %855 = vst [vmem:[%s1485_s5 + $0x30] sm:$0xff] %v847_v20  ;;  %v880_v33 = vmul.f32 %v847_v20, %v847_v20  ;;  %v863_v35 = vadd.f32 %v862_v32, %v847_v20 }
 0x15f   : > { %v848_v21 = vld [vmem:[#allocation2 + $0x38] sm:$0xff] }
 0x160   : > { %856 = vst [vmem:[%s1485_s5 + $0x38] sm:$0xff] %v848_v21  ;;  %v881_v36 = vmul.f32 %v848_v21, %v848_v21  ;;  %v887_v37 = vadd.f32 %v886_v34, %v880_v33  ;;  %v864_v38 = vadd.f32 %v863_v35, %v848_v21 }
 0x162   : > { %v865_v39 = vrot.slane %v864_v38, 4  ;;  %v888_v40 = vadd.f32 %v887_v37, %v881_v36 }
 0x164   : > { %v866_v41 = vadd.f32 %v865_v39, %v864_v38  ;;  %v889_v42 = vrot.slane %v888_v40, 4 }
 0x166   : > { %v867_v43 = vrot.slane %v866_v41, 2  ;;  %v890_v44 = vadd.f32 %v889_v42, %v888_v40 }
 0x168   : > { %v868_v45 = vadd.f32 %v867_v43, %v866_v41  ;;  %v891_v46 = vrot.slane %v890_v44, 2 }
 0x16a   : > { %v869_v47 = vrot.slane %v868_v45, 1  ;;  %v892_v48 = vadd.f32 %v891_v46, %v890_v44 }
 0x16c   : > { %v870_v50 = vadd.f32 %v869_v47, %v868_v45  ;;  %v893_v51 = vrot.slane %v892_v48, 1 }
 0x16e   : > { %v871_v53 = vadd.f32 %v870_v50, %v857_v49  ;;  %v894_v54 = vadd.f32 %v893_v51, %v892_v48 }
 0x170   : > { %872 = vst [vmem:[%s1480_s27] sm:$0x1] %v871_v53  ;;  %v895_v55 = vadd.f32 %v894_v54, %v873_v52 }
 0x172   : > { %896 = vst [vmem:[%s1490_s8] sm:$0x1] %v895_v55 }
 0x173 PF: > { %s15_s21 = sadd.s32 1, %s1364_s21   ;;  %s1590_s15 = smov %s1344_s16 }
 0x174   : > { %p12_p0 = scmp.ge.s32.totalorder %s15_s21, 6   ;;  %s1591_s16 = smov %s1444_s28 }
 0x175   : > { %s1592_s17 = smov %s1356_s19  ;;  %s1593_s18 = smov %s1360_s20 }
 0x176   : > { %s1594_s19 = smov %s1597_s22  ;;  %s1595_s20 = smov %s1601_s23 }
 0x177   :  { %14 = sbr.rel (!%p12_p0) target bundleno = 4 (0x4), region = 123 }

// kernel: discriminator_forward.9
= control target key start
LH: loop header
LB: loop body
LE: loop exit
PB: predicated region body
PF: predicated region fallthrough
CT: control target
= control target key end

     0   :  { %s573_s12 = smov 0   ;;  %s575_s13 = smov 0   ;;  %s618_s0 = inlined_call_operand.vmem [shape: f32[2,64,128], index: 0, kind: input, shape index: {}]   ;;  %s619_s1 = inlined_call_operand.vmem [shape: f32[2,1,128], index: 1, kind: input, shape index: {}]   ;;  %s620_s2 = inlined_call_operand.vmem [shape: f32[2,1,128], index: 2, kind: input, shape index: {}]   ;;  %s621_s3 = inlined_call_operand.vmem [shape: bf16[2,64,128], index: 3, kind: output, shape index: {}]  }
   0x1   :  { %s577_s14 = smov 0  }
   0x2 LB: > { %s25_s15 = sadd.s32 1, %s547_s13  ;;  %p455_p0 = scmp.ge.s32.totalorder %s551_s14, 1  ;;  %s551_s14 = sphi %s577_s14, %s13_s14   ;;  %s547_s13 = sphi %s575_s13, %s623_s13   ;;  %s543_s12 = sphi %s573_s12, %s622_s12  }
   0x3   : > { %p27_p1 = scmp.ge.s32.totalorder %s25_s15, 2  ;;  %p174_p2 = scmp.lt.s32.totalorder %s551_s14, 3 }
   0x5   : > { %s625_s15 = smov (%p27_p1, %s25_s15), 0  ;;  %p175_p3 = pnand %p455_p0, %p174_p2 }
   0x6   : > { %p213_p4 = scmp.lt.s32.totalorder (!%p175_p3), %s543_s12, 1  ;;  %v253_v4 = vlaneseq (!%p175_p3) }
   0x7   : > { %178 = sbr.rel (%p175_p3) target bundleno = 51 (0x33), region = 32 }
   0x8   : > { %v254_v7 = vshrl.u32 (!%p175_p3), %v253_v4, 7 }
   0xa   : > { %v255_v9 = vsub.s32 (!%p175_p3), 0, %v254_v7 }
   0xe   : > { %s627_s12 = smov (!%p213_p4, %s543_s12), 1 }
   0xf   : > { %s224_s18 = scalar_lea.vmem %s619_s1, %s627_s12  ;;  %s227_s21 = scalar_lea.vmem %s620_s2, %s627_s12 }
  0x10   : > { %v246_v0 = vld [vmem:[%s224_s18] sm:$0x1]  ;;  %s470_s22 = sshll.u32 %s627_s12, 6  ;;  %s471_s26 = sshll.u32 %s627_s12, 5 }
  0x11   : > { %v247_v1 = vmul.f32 0.015625, %v246_v0  ;;  %v248_v2 = vld [vmem:[%s227_s21] sm:$0x1]  ;;  %s220_s25 = scalar_lea.vmem %s618_s0, %s470_s22  ;;  %s236_s29 = scalar_lea.vmem %s621_s3, %s471_s26 }
  0x12   : > { %v249_v3 = vmul.f32 0.015625, %v248_v2  ;;  %v238_v10 = vld [vmem:[%s220_s25] sm:$0xff]  ;;  %v239_v11 = vld [vmem:[%s220_s25 + $0x8] sm:$0xff]  ;;  %v240_v13 = vld [vmem:[%s220_s25 + $0x10] sm:$0xff] }
  0x13   : > { %v250_v5 = vmul.f32 %v247_v1, %v247_v1  ;;  %v256_v12 = vrot.slane %v247_v1, %v255_v9  ;;  %v241_v14 = vld [vmem:[%s220_s25 + $0x18] sm:$0xff]  ;;  %v242_v15 = vld [vmem:[%s220_s25 + $0x20] sm:$0xff]  ;;  %v243_v16 = vld [vmem:[%s220_s25 + $0x28] sm:$0xff] }
  0x14   : > { %v244_v17 = vld [vmem:[%s220_s25 + $0x30] sm:$0xff]  ;;  %v245_v18 = vld [vmem:[%s220_s25 + $0x38] sm:$0xff] }
  0x15   : > { %v251_v6 = vsub.f32 %v249_v3, %v250_v5  ;;  %v258_v19 = vsub.f32 %v238_v10, %v256_v12  ;;  %v259_v20 = vsub.f32 %v239_v11, %v256_v12  ;;  %v260_v21 = vsub.f32 %v240_v13, %v256_v12 }
  0x16   : > { %v261_v22 = vsub.f32 %v241_v14, %v256_v12  ;;  %v262_v24 = vsub.f32 %v242_v15, %v256_v12  ;;  %v263_v25 = vsub.f32 %v243_v16, %v256_v12  ;;  %v264_v26 = vsub.f32 %v244_v17, %v256_v12 }
  0x17   : > { %v266_v8 = vadd.f32 1e-05, %v251_v6  ;;  %v265_v27 = vsub.f32 %v245_v18, %v256_v12 }
  0x19   : > { %527 = vrsqrt.f32 %v266_v8 }
  0x23   : > { %v528_v23 = vpop.eup %527 }
  0x24   : > { %v272_v28 = vrot.slane %v528_v23, %v255_v9 }
  0x26   : > { %v274_v29 = vmul.f32 %v272_v28, %v258_v19  ;;  %v275_v30 = vmul.f32 %v272_v28, %v259_v20  ;;  %v276_v31 = vmul.f32 %v272_v28, %v260_v21  ;;  %v277_v32 = vmul.f32 %v272_v28, %v261_v22 }
  0x27   : > { %v278_v33 = vmul.f32 %v272_v28, %v262_v24  ;;  %v279_v34 = vmul.f32 %v272_v28, %v263_v25  ;;  %v280_v35 = vmul.f32 %v272_v28, %v264_v26  ;;  %v281_v36 = vmul.f32 %v272_v28, %v265_v27 }
  0x28   : > { %vm282_vm0 = vcmp.gt.f32.partialorder %v274_v29, 0.0  ;;  %vm283_vm1 = vcmp.gt.f32.partialorder %v275_v30, 0.0  ;;  %v290_v37 = vmul.f32 0.2, %v274_v29  ;;  %v291_v38 = vmul.f32 0.2, %v275_v30 }
  0x29   : > { %vm284_vm2 = vcmp.gt.f32.partialorder %v276_v31, 0.0  ;;  %vm285_vm3 = vcmp.gt.f32.partialorder %v277_v32, 0.0  ;;  %v292_v39 = vmul.f32 0.2, %v276_v31  ;;  %v293_v40 = vmul.f32 0.2, %v277_v32 }
  0x2a   : > { %v298_v41 = vsel %vm282_vm0, %v274_v29, %v290_v37  ;;  %v299_v42 = vsel %vm283_vm1, %v275_v30, %v291_v38  ;;  %vm286_vm4 = vcmp.gt.f32.partialorder %v278_v33, 0.0  ;;  %vm287_vm5 = vcmp.gt.f32.partialorder %v279_v34, 0.0 }
  0x2b   : > { %v483_v43 = vpack.c.bf16 %v299_v42, %v298_v41  ;;  %v300_v44 = vsel %vm284_vm2, %v276_v31, %v292_v39  ;;  %v301_v45 = vsel %vm285_vm3, %v277_v32, %v293_v40  ;;  %v294_v46 = vmul.f32 0.2, %v278_v33 }
  0x2c   : > { %v488_v47 = vpack.c.bf16 %v301_v45, %v300_v44  ;;  %v295_v48 = vmul.f32 0.2, %v279_v34  ;;  %vm288_vm6 = vcmp.gt.f32.partialorder %v280_v35, 0.0  ;;  %vm289_vm7 = vcmp.gt.f32.partialorder %v281_v36, 0.0 }
  0x2d   : > { %484 = vst [vmem:[%s236_s29] sm:$0xff] %v483_v43   ;;  %v302_v49 = vsel %vm286_vm4, %v278_v33, %v294_v46  ;;  %v296_v50 = vmul.f32 0.2, %v280_v35  ;;  %v297_v51 = vmul.f32 0.2, %v281_v36 }
  0x2e   : > { %500 = vst [vmem:[%s236_s29 + $0x8] sm:$0xff] %v488_v47   ;;  %v303_v52 = vsel %vm287_vm5, %v279_v34, %v295_v48 }
  0x2f   : > { %v493_v53 = vpack.c.bf16 %v303_v52, %v302_v49  ;;  %v304_v54 = vsel %vm288_vm6, %v280_v35, %v296_v50  ;;  %v305_v55 = vsel %vm289_vm7, %v281_v36, %v297_v51 }
  0x30   : > { %v498_v56 = vpack.c.bf16 %v305_v55, %v304_v54 }
  0x31   : > { %501 = vst [vmem:[%s236_s29 + $0x10] sm:$0xff] %v493_v53  }
  0x32   : > { %502 = vst [vmem:[%s236_s29 + $0x18] sm:$0xff] %v498_v56  }
  0x33 PF: > { %s13_s14 = sadd.s32 1, %s551_s14   ;;  %s622_s12 = smov %s547_s13 }
  0x34   : > { %p10_p5 = scmp.ge.s32.totalorder %s13_s14, 4   ;;  %s623_s13 = smov %s625_s15 }
  0x36   :  { %12 = sbr.rel (!%p10_p5) target bundleno = 2 (0x2), region = 68 }

// kernel: discriminator_forward.11
= control target key start
LH: loop header
LB: loop body
LE: loop exit
PB: predicated region body
PF: predicated region fallthrough
CT: control target
= control target key end

     0   :  { %s526_s12 = smov 0   ;;  %s528_s13 = smov 0   ;;  %s570_s0 = inlined_call_operand.vmem [shape: f32[2,16,256], index: 0, kind: input, shape index: {}]   ;;  %s571_s1 = inlined_call_operand.vmem [shape: f32[2,1,256], index: 1, kind: input, shape index: {}]   ;;  %s572_s2 = inlined_call_operand.vmem [shape: f32[2,1,256], index: 2, kind: input, shape index: {}]   ;;  %s573_s3 = inlined_call_operand.vmem [shape: bf16[2,16,256], index: 3, kind: output, shape index: {}]  }
   0x1   :  { %s530_s14 = smov 0  }
   0x2 LB: > { %s25_s15 = sadd.s32 1, %s500_s13  ;;  %p441_p0 = scmp.ge.s32.totalorder %s504_s14, 1  ;;  %s504_s14 = sphi %s530_s14, %s13_s14   ;;  %s500_s13 = sphi %s528_s13, %s575_s13   ;;  %s496_s12 = sphi %s526_s12, %s574_s12  }
   0x3   : > { %p27_p1 = scmp.ge.s32.totalorder %s25_s15, 2  ;;  %p177_p2 = scmp.lt.s32.totalorder %s504_s14, 3 }
   0x5   : > { %s577_s15 = smov (%p27_p1, %s25_s15), 0  ;;  %p178_p3 = pnand %p441_p0, %p177_p2 }
   0x6   : > { %p220_p4 = scmp.lt.s32.totalorder (!%p178_p3), %s496_s12, 1  ;;  %v260_v4 = vlaneseq (!%p178_p3) }
   0x7   : > { %181 = sbr.rel (%p178_p3) target bundleno = 48 (0x30), region = 32 }
   0x8   : > { %v261_v7 = vshrl.u32 (!%p178_p3), %v260_v4, 7 }
   0xa   : > { %v262_v9 = vsub.s32 (!%p178_p3), 0, %v261_v7  ;;  %v266_v10 = vsub.s32 (!%p178_p3), 1, %v261_v7 }
   0xe   : > { %s579_s12 = smov (!%p220_p4, %s496_s12), 1 }
   0xf   : > { %s444_s16 = sshll.u32 %s579_s12, 1  ;;  %s452_s23 = sshll.u32 %s579_s12, 5 }
  0x10   : > { %s233_s19 = scalar_lea.vmem %s571_s1, %s444_s16  ;;  %s237_s22 = scalar_lea.vmem %s572_s2, %s444_s16 }
  0x11   : > { %v253_v0 = vld [vmem:[%s233_s19] sm:$0x3]  ;;  %s228_s26 = scalar_lea.vmem %s570_s0, %s452_s23  ;;  %s453_s27 = sshll.u32 %s579_s12, 4 }
  0x12   : > { %v254_v1 = vmul.f32 0.0625, %v253_v0  ;;  %v255_v2 = vld [vmem:[%s237_s22] sm:$0x3]  ;;  %v250_v14 = vld [vmem:[%s228_s26 + $0x8] sm:$0xff]  ;;  %v251_v15 = vld [vmem:[%s228_s26 + $0x10] sm:$0xff]  ;;  %s247_s30 = scalar_lea.vmem %s573_s3, %s453_s27 }
  0x13   : > { %v256_v3 = vmul.f32 0.0625, %v255_v2  ;;  %v249_v11 = vld [vmem:[%s228_s26] sm:$0xff]  ;;  %v252_v16 = vld [vmem:[%s228_s26 + $0x18] sm:$0xff] }
  0x14   : > { %v257_v5 = vmul.f32 %v254_v1, %v254_v1  ;;  %v263_v12 = vrot.slane %v254_v1, %v262_v9  ;;  %v267_v13 = vrot.slane %v254_v1, %v266_v10 }
  0x16   : > { %v258_v6 = vsub.f32 %v256_v3, %v257_v5  ;;  %v270_v17 = vsub.f32 %v249_v11, %v263_v12  ;;  %v271_v18 = vsub.f32 %v250_v14, %v267_v13  ;;  %v272_v19 = vsub.f32 %v251_v15, %v263_v12 }
  0x17   : > { %v273_v20 = vsub.f32 %v252_v16, %v267_v13 }
  0x18   : > { %v274_v8 = vadd.f32 1e-05, %v258_v6 }
  0x1a   : > { %480 = vrsqrt.f32 %v274_v8 }
  0x24   : > { %v481_v21 = vpop.eup %480 }
  0x25   : > { %v280_v22 = vrot.slane %v481_v21, %v262_v9  ;;  %v284_v23 = vrot.slane %v481_v21, %v266_v10 }
  0x27   : > { %v287_v24 = vmul.f32 %v280_v22, %v270_v17  ;;  %v288_v25 = vmul.f32 %v284_v23, %v271_v18  ;;  %v289_v26 = vmul.f32 %v280_v22, %v272_v19  ;;  %v290_v27 = vmul.f32 %v284_v23, %v273_v20 }
  0x29   : > { %vm291_vm0 = vcmp.gt.f32.partialorder %v287_v24, 0.0  ;;  %vm292_vm1 = vcmp.gt.f32.partialorder %v288_v25, 0.0  ;;  %v295_v28 = vmul.f32 0.2, %v287_v24  ;;  %v296_v29 = vmul.f32 0.2, %v288_v25 }
  0x2a   : > { %vm293_vm2 = vcmp.gt.f32.partialorder %v289_v26, 0.0  ;;  %vm294_vm3 = vcmp.gt.f32.partialorder %v290_v27, 0.0  ;;  %v297_v30 = vmul.f32 0.2, %v289_v26  ;;  %v298_v31 = vmul.f32 0.2, %v290_v27 }
  0x2b   : > { %v299_v32 = vsel %vm291_vm0, %v287_v24, %v295_v28  ;;  %v300_v33 = vsel %vm292_vm1, %v288_v25, %v296_v29 }
  0x2c   : > { %v454_v34 = vpack.c.bf16 %v300_v33, %v299_v32  ;;  %v301_v35 = vsel %vm293_vm2, %v289_v26, %v297_v30  ;;  %v302_v36 = vsel %vm294_vm3, %v290_v27, %v298_v31 }
  0x2d   : > { %v455_v37 = vpack.c.bf16 %v302_v36, %v301_v35 }
  0x2e   : > { %315 = vst [vmem:[%s247_s30] sm:$0xff] %v454_v34 }
  0x2f   : > { %316 = vst [vmem:[%s247_s30 + $0x8] sm:$0xff] %v455_v37 }
  0x30 PF: > { %s13_s14 = sadd.s32 1, %s504_s14   ;;  %s574_s12 = smov %s500_s13 }
  0x31   : > { %p10_p5 = scmp.ge.s32.totalorder %s13_s14, 4   ;;  %s575_s13 = smov %s577_s15 }
  0x33   :  { %12 = sbr.rel (!%p10_p5) target bundleno = 2 (0x2), region = 68 }

// kernel: discriminator_forward.10
= control target key start
LH: loop header
LB: loop body
LE: loop exit
PB: predicated region body
PF: predicated region fallthrough
CT: control target
= control target key end

     0   :  { %s1419_s15 = smov 0   ;;  %s1421_s16 = smov 0   ;;  %s1609_s0 = inlined_call_operand.vmem [shape: bf16[2,16,2048], index: 0, kind: input, shape index: {}]   ;;  %s1610_s1 = inlined_call_operand.vmem [shape: bf16[2048,256], index: 1, kind: input, shape index: {}]   ;;  %s1611_s2 = inlined_call_operand.vmem [shape: f32[2,16,256], index: 2, kind: output, shape index: {0}]   ;;  %s1612_s3 = inlined_call_operand.vmem [shape: f32[2,1,256], index: 3, kind: output, shape index: {1}]   ;;  %s1613_s4 = inlined_call_operand.vmem [shape: f32[2,1,256], index: 4, kind: output, shape index: {2}]  }
   0x1   :  { %s1423_s17 = smov 0   ;;  %s1425_s18 = smov 0  }
   0x2   :  { %s1427_s19 = smov 0   ;;  %s1429_s20 = smov 0  }
   0x3   :  { %s1431_s21 = smov 0  }
   0x4 LB: > { %s27_s22 = sadd.s32 1, %s1381_s19  ;;  %s34_s23 = sadd.s32 1, %s1385_s20  ;;  %s1389_s21 = sphi %s1431_s21, %s15_s21   ;;  %s1385_s20 = sphi %s1429_s20, %s1619_s20   ;;  %s1381_s19 = sphi %s1427_s19, %s1618_s19   ;;  %s1377_s18 = sphi %s1425_s18, %s1617_s18   ;;  %s1373_s17 = sphi %s1423_s17, %s1616_s17   ;;  %s1369_s16 = sphi %s1421_s16, %s1615_s16   ;;  %s1365_s15 = sphi %s1419_s15, %s1614_s15  }
   0x5   : > { %p28_p0 = scmp.ge.s32.totalorder %s27_s22, 4  ;;  %p52_p1 = scmp.ne.s32.totalorder %s1369_s16, %s1365_s15 }
   0x6   : > { %p53_p2 = scmp.eq.s32.totalorder %s1389_s21, 0  ;;  %s45_s27 = sadd.s32 1, %s1369_s16 }
   0x7   : > { %s1621_s22 = smov (%p28_p0, %s27_s22), 0  ;;  %s1623_s23 = smov (!%p28_p0, %s34_s23), %s1385_s20 }
   0x8   : > { %p54_p3 = por %p53_p2, %p52_p1  ;;  %p36_p4 = scmp.ge.s32.totalorder %s1623_s23, 2 }
   0x9   : > { %s41_s24 = ssub.s32 %s1381_s19, %s1621_s22  ;;  %p1080_p6 = scmp.ge.s32.totalorder %s1389_s21, 8 }
   0xa   : > { %s1625_s23 = smov (%p36_p4, %s1623_s23), 0 }
   0xb   : > { %s38_s25 = ssub.s32 %s1385_s20, %s1625_s23  ;;  %182 = sbr.rel (%p1080_p6) target bundleno = 27 (0x1b), region = 20 }
   0xc   : > { %s42_s26 = sor.u32 %s41_s24, %s38_s25 }
   0xd   : > { %p43_p5 = scmp.eq.s32.totalorder %s42_s26, 0 }
   0xf   : > { %s1470_s28 = scalar_select %p43_p5, %s1369_s16, %s45_s27  }
  0x12   : > { %185 = sbr.rel (!%p54_p3) target bundleno = 27 (0x1b), region = 24  ;;  %s187_s29 = sand.u32 (%p54_p3), 1, %s1369_s16  }
  0x13   : > { %s1082_s30 = sshll.u32 (%p54_p3), %s1381_s19, 2  ;;  %s1081_s5 = sshll.u32 (%p54_p3), %s187_s29, 5 }
  0x14   : > { %s1083_s6 = sshll.u32 (%p54_p3), %s1385_s20, 5  ;;  %s189_s12 = scalar_lea.vmem (%p54_p3), [#allocation3], %s1081_s5 }
  0x15   : > { %s195_s7 = sadd.s32 (%p54_p3), %s1083_s6, %s1082_s30 }
  0x16   : > { %s1084_s8 = sshll.u32 (%p54_p3), %s195_s7, 2 }
  0x17   : > { %s197_s11 = scalar_lea.vmem (%p54_p3), %s1609_s0, %s1084_s8 }
  0x18   : > { %v210_v0 = vld [vmem:[%s197_s11] sm:$0xff] (%p54_p3)  ;;  %v212_v1 = vld [vmem:[%s197_s11 + $0x8] sm:$0xff] (%p54_p3) }
  0x19   : > { %v214_v2 = vld [vmem:[%s197_s11 + $0x40] sm:$0xff]  ;;  %211 = vst [vmem:[%s189_s12] sm:$0xff] %v210_v0  ;;  %213 = vst [vmem:[%s189_s12 + $0x8] sm:$0xff] %v212_v1  ;;  %v216_v3 = vld [vmem:[%s197_s11 + $0x48] sm:$0xff] }
  0x1a   : > { %215 = vst [vmem:[%s189_s12 + $0x10] sm:$0xff] %v214_v2  ;;  %217 = vst [vmem:[%s189_s12 + $0x18] sm:$0xff] %v216_v3 }
  0x1b PF: > { %p1085_p7 = scmp.ge.s32.totalorder %s1389_s21, 1  ;;  %p222_p8 = scmp.lt.s32.totalorder %s1389_s21, 9 }
  0x1d   : > { %p223_p9 = pnand %p1085_p7, %p222_p8 }
  0x1e   : > { %s229_s13 = sand.u32 (!%p223_p9), 1, %s1365_s15   ;;  %p270_p10 = scmp.lt.s32.totalorder (!%p223_p9), %s1377_s18, 1 }
  0x1f   : > { %226 = sbr.rel (%p223_p9) target bundleno = 374 (0x176), region = 47  ;;  %s1086_s14 = sshll.u32 (!%p223_p9), %s229_s13, 5 }
  0x20   : > { %p289_p11 = scmp.eq.s32.totalorder (!%p223_p9), %s1373_s17, 0  ;;  %s1500_s9 = scalar_lea.vmem (!%p223_p9), [#allocation3], %s1086_s14 }
  0x26   : > { %s1627_s18 = smov (!%p270_p10, %s1377_s18), 1  ;;  %293 = sbr.rel (!%p289_p11) target bundleno = 45 (0x2d), region = 55 }
  0x27   : > { %s1167_s24 = sshll.u32 %s1627_s18, 5  ;;  %s1089_s25 = sshll.u32 %s1627_s18, 1  ;;  %v294_v4 = vlaneseq (%p289_p11)  ;;  %v1391_v5 = vmov (%p289_p11), 0.0  }
  0x28   : > { %s1488_s29 = scalar_lea.vmem %s1611_s2, %s1167_s24  ;;  %s1493_s6 = scalar_lea.vmem %s1612_s3, %s1089_s25 }
  0x29   : > { %s1498_s15 = scalar_lea.vmem %s1613_s4, %s1089_s25  ;;  %vm296_vm0 = vcmp.lt.s32.totalorder (%p289_p11), %v294_v4, 256 }
  0x2a   : > { %298 = vst.msk [vmem:[%s1493_s6] sm:$0x3] (%p289_p11), %vm296_vm0, %v1391_v5  ;;  %299 = vst.msk [vmem:[%s1498_s15] sm:$0x3] (%p289_p11), %vm296_vm0, %v1391_v5 }
  0x2d PF: > { %p1092_p12 = scmp.ne.s32.totalorder %s1373_s17, 0 }
  0x2e   : > { %v1392_v6 = vmov (!%p1092_p12), 0.0  }
  0x2f   : > { %302 = sbr.rel (%p1092_p12) target bundleno = 54 (0x36), region = 59  ;;  %303 = vst [vmem:[#allocation2] sm:$0xff] (!%p1092_p12), %v1392_v6  ;;  %304 = vst [vmem:[#allocation2 + $0x8] sm:$0xff] (!%p1092_p12), %v1392_v6 }
  0x30   : > { %305 = vst [vmem:[#allocation2 + $0x10] sm:$0xff] (!%p1092_p12), %v1392_v6  ;;  %306 = vst [vmem:[#allocation2 + $0x18] sm:$0xff] (!%p1092_p12), %v1392_v6 }
  0x36 PF: > { %s1093_s18 = sshll.u32 %s1373_s17, 9  ;;  %v1331_v7 = vld [vmem:[%s1500_s9 + $0x4] ss:$16 sps:$4 sm:$0xff]   ;;  %v1334_v54 = vld [vmem:[%s1500_s9 + $0xc] ss:$16 sps:$4 sm:$0xff]   ;;  %p1164_p13 = scmp.ne.s32.totalorder %s1373_s17, 3 }
  0x37   : > { %s1509_s12 = scalar_lea.vmem %s1610_s1, %s1093_s18  ;;  %757 = vmatprep.mubr.bf16.mxu1 %v1331_v7  ;;  %800 = vmatprep.mubr.bf16.mxu0 %v1334_v54 }
  0x38   : > { %v1233_v8 = vld [vmem:[%s1509_s12 + $0x4] ss:$8 sps:$4 sm:$0xff]   ;;  %v1237_v10 = vld [vmem:[%s1509_s12] ss:$8 sps:$4 sm:$0xff]   ;;  %v1239_v12 = vld [vmem:[%s1509_s12 + $0x14] ss:$8 sps:$4 sm:$0xff]  }
  0x39   : > { %v1235_v9 = vld [vmem:[%s1509_s12 + $0x104] ss:$8 sps:$4 sm:$0xff]   ;;  %725 = vmatprep.subr.bf16.mxu1 %v1233_v8  ;;  %v1238_v11 = vld [vmem:[%s1509_s12 + $0x100] ss:$8 sps:$4 sm:$0xff]   ;;  %v1241_v13 = vld [vmem:[%s1509_s12 + $0x114] ss:$8 sps:$4 sm:$0xff]  }
  0x3a   : > { %768 = vmatprep.subr.bf16.mxu0 %v1235_v9  ;;  %726 = vmatpush1.bf16.msra.mxu1 %v1237_v10  ;;  %v1243_v14 = vld [vmem:[%s1509_s12 + $0x10] ss:$8 sps:$4 sm:$0xff]   ;;  %v1245_v16 = vld [vmem:[%s1509_s12 + $0x24] ss:$8 sps:$4 sm:$0xff]   ;;  %v1249_v18 = vld [vmem:[%s1509_s12 + $0x20] ss:$8 sps:$4 sm:$0xff]  }
  0x3b   : > { %769 = vmatpush1.bf16.msra.mxu0 %v1238_v11  ;;  %727 = vmatprep.subr.bf16.mxu1 %v1239_v12  ;;  %v1244_v15 = vld [vmem:[%s1509_s12 + $0x110] ss:$8 sps:$4 sm:$0xff]   ;;  %v1247_v17 = vld [vmem:[%s1509_s12 + $0x124] ss:$8 sps:$4 sm:$0xff]   ;;  %v1250_v19 = vld [vmem:[%s1509_s12 + $0x120] ss:$8 sps:$4 sm:$0xff]  }
  0x3c   : > { %770 = vmatprep.subr.bf16.mxu0 %v1241_v13  ;;  %v1251_v20 = vld [vmem:[%s1509_s12 + $0x34] ss:$8 sps:$4 sm:$0xff]   ;;  %v1255_v22 = vld [vmem:[%s1509_s12 + $0x30] ss:$8 sps:$4 sm:$0xff]   ;;  %v1257_v24 = vld [vmem:[%s1509_s12 + $0x44] ss:$8 sps:$4 sm:$0xff]  }
  0x3d   : > { %v1253_v21 = vld [vmem:[%s1509_s12 + $0x134] ss:$8 sps:$4 sm:$0xff]   ;;  %v1256_v23 = vld [vmem:[%s1509_s12 + $0x130] ss:$8 sps:$4 sm:$0xff]   ;;  %v1259_v25 = vld [vmem:[%s1509_s12 + $0x144] ss:$8 sps:$4 sm:$0xff]  }
  0x3e   : > { %728 = vmatpush1.bf16.msra.mxu1 %v1243_v14  ;;  %v1261_v26 = vld [vmem:[%s1509_s12 + $0x40] ss:$8 sps:$4 sm:$0xff]   ;;  %v1263_v28 = vld [vmem:[%s1509_s12 + $0x54] ss:$8 sps:$4 sm:$0xff]   ;;  %v1267_v30 = vld [vmem:[%s1509_s12 + $0x50] ss:$8 sps:$4 sm:$0xff]  }
  0x3f   : > { %771 = vmatpush1.bf16.msra.mxu0 %v1244_v15  ;;  %729 = vmatprep.subr.bf16.mxu1 %v1245_v16  ;;  %v1262_v27 = vld [vmem:[%s1509_s12 + $0x140] ss:$8 sps:$4 sm:$0xff]   ;;  %v1265_v29 = vld [vmem:[%s1509_s12 + $0x154] ss:$8 sps:$4 sm:$0xff]   ;;  %v1268_v31 = vld [vmem:[%s1509_s12 + $0x150] ss:$8 sps:$4 sm:$0xff]  }
  0x40   : > { %772 = vmatprep.subr.bf16.mxu0 %v1247_v17  ;;  %v1269_v32 = vld [vmem:[%s1509_s12 + $0x64] ss:$8 sps:$4 sm:$0xff]   ;;  %v1273_v34 = vld [vmem:[%s1509_s12 + $0x60] ss:$8 sps:$4 sm:$0xff]   ;;  %v1275_v36 = vld [vmem:[%s1509_s12 + $0x74] ss:$8 sps:$4 sm:$0xff]  }
  0x41   : > { %v1271_v33 = vld [vmem:[%s1509_s12 + $0x164] ss:$8 sps:$4 sm:$0xff]   ;;  %v1274_v35 = vld [vmem:[%s1509_s12 + $0x160] ss:$8 sps:$4 sm:$0xff]   ;;  %v1277_v37 = vld [vmem:[%s1509_s12 + $0x174] ss:$8 sps:$4 sm:$0xff]  }
  0x42   : > { %730 = vmatpush1.bf16.msra.mxu1 %v1249_v18  ;;  %v1279_v38 = vld [vmem:[%s1509_s12 + $0x70] ss:$8 sps:$4 sm:$0xff]   ;;  %v1281_v40 = vld [vmem:[%s1509_s12 + $0x84] ss:$8 sps:$4 sm:$0xff]   ;;  %v1285_v42 = vld [vmem:[%s1509_s12 + $0x80] ss:$8 sps:$4 sm:$0xff]  }
  0x43   : > { %773 = vmatpush1.bf16.msra.mxu0 %v1250_v19  ;;  %731 = vmatprep.subr.bf16.mxu1 %v1251_v20  ;;  %v1280_v39 = vld [vmem:[%s1509_s12 + $0x170] ss:$8 sps:$4 sm:$0xff]   ;;  %v1283_v41 = vld [vmem:[%s1509_s12 + $0x184] ss:$8 sps:$4 sm:$0xff]   ;;  %v1286_v43 = vld [vmem:[%s1509_s12 + $0x180] ss:$8 sps:$4 sm:$0xff]  }
  0x44   : > { %774 = vmatprep.subr.bf16.mxu0 %v1253_v21  ;;  %v1287_v44 = vld [vmem:[%s1509_s12 + $0x94] ss:$8 sps:$4 sm:$0xff]   ;;  %v1291_v46 = vld [vmem:[%s1509_s12 + $0x90] ss:$8 sps:$4 sm:$0xff]   ;;  %v1293_v48 = vld [vmem:[%s1509_s12 + $0xa4] ss:$8 sps:$4 sm:$0xff]  }
  0x45   : > { %v1289_v45 = vld [vmem:[%s1509_s12 + $0x194] ss:$8 sps:$4 sm:$0xff]   ;;  %v1292_v47 = vld [vmem:[%s1509_s12 + $0x190] ss:$8 sps:$4 sm:$0xff]   ;;  %v1295_v49 = vld [vmem:[%s1509_s12 + $0x1a4] ss:$8 sps:$4 sm:$0xff]  }
  0x46   : > { %732 = vmatpush1.bf16.msra.mxu1 %v1255_v22  ;;  %v1297_v50 = vld [vmem:[%s1509_s12 + $0xa0] ss:$8 sps:$4 sm:$0xff]   ;;  %v1299_v52 = vld [vmem:[%s1509_s12 + $0xb4] ss:$8 sps:$4 sm:$0xff]   ;;  %v1303_v55 = vld [vmem:[%s1509_s12 + $0xb0] ss:$8 sps:$4 sm:$0xff]  }
  0x47   : > { %775 = vmatpush1.bf16.msra.mxu0 %v1256_v23  ;;  %733 = vmatprep.subr.bf16.mxu1 %v1257_v24  ;;  %v1298_v51 = vld [vmem:[%s1509_s12 + $0x1a0] ss:$8 sps:$4 sm:$0xff]   ;;  %v1301_v53 = vld [vmem:[%s1509_s12 + $0x1b4] ss:$8 sps:$4 sm:$0xff]   ;;  %v1304_v56 = vld [vmem:[%s1509_s12 + $0x1b0] ss:$8 sps:$4 sm:$0xff]  }
  0x48   : > { %776 = vmatprep.subr.bf16.mxu0 %v1259_v25  ;;  %v1305_v57 = vld [vmem:[%s1509_s12 + $0xc4] ss:$8 sps:$4 sm:$0xff]   ;;  %v1309_v59 = vld [vmem:[%s1509_s12 + $0xc0] ss:$8 sps:$4 sm:$0xff]   ;;  %v1311_v61 = vld [vmem:[%s1509_s12 + $0xd4] ss:$8 sps:$4 sm:$0xff]  }
  0x49   : > { %v1307_v58 = vld [vmem:[%s1509_s12 + $0x1c4] ss:$8 sps:$4 sm:$0xff]   ;;  %v1310_v60 = vld [vmem:[%s1509_s12 + $0x1c0] ss:$8 sps:$4 sm:$0xff]   ;;  %v1313_v62 = vld [vmem:[%s1509_s12 + $0x1d4] ss:$8 sps:$4 sm:$0xff]  }
  0x4a   : > { %734 = vmatpush1.bf16.msra.mxu1 %v1261_v26  ;;  %v1315_v63 = vld [vmem:[%s1509_s12 + $0xd0] ss:$8 sps:$4 sm:$0xff]   ;;  %v1317_v1 = vld [vmem:[%s1509_s12 + $0xe4] ss:$8 sps:$4 sm:$0xff]   ;;  %v1321_v3 = vld [vmem:[%s1509_s12 + $0xe0] ss:$8 sps:$4 sm:$0xff]  }
  0x4b   : > { %777 = vmatpush1.bf16.msra.mxu0 %v1262_v27  ;;  %735 = vmatprep.subr.bf16.mxu1 %v1263_v28  ;;  %v1316_v0 = vld [vmem:[%s1509_s12 + $0x1d0] ss:$8 sps:$4 sm:$0xff]   ;;  %v1319_v2 = vld [vmem:[%s1509_s12 + $0x1e4] ss:$8 sps:$4 sm:$0xff]   ;;  %v1322_v4 = vld [vmem:[%s1509_s12 + $0x1e0] ss:$8 sps:$4 sm:$0xff]  }
  0x4c   : > { %778 = vmatprep.subr.bf16.mxu0 %v1265_v29  ;;  %v1323_v5 = vld [vmem:[%s1509_s12 + $0xf4] ss:$8 sps:$4 sm:$0xff]   ;;  %v1327_v7 = vld [vmem:[%s1509_s12 + $0xf0] ss:$8 sps:$4 sm:$0xff]   ;;  %v308_v12 = vld [vmem:[#allocation2] sm:$0xff] }
  0x4d   : > { %v1325_v6 = vld [vmem:[%s1509_s12 + $0x1f4] ss:$8 sps:$4 sm:$0xff]   ;;  %v1328_v8 = vld [vmem:[%s1509_s12 + $0x1f0] ss:$8 sps:$4 sm:$0xff]   ;;  %v309_v16 = vld [vmem:[#allocation2 + $0x8] sm:$0xff] }
  0x4e   : > { %736 = vmatpush1.bf16.msra.mxu1 %v1267_v30  ;;  %v1329_v9 = vld [vmem:[%s1500_s9] ss:$16 sps:$4 sm:$0xff]   ;;  %v1332_v10 = vld [vmem:[%s1500_s9 + $0x8] ss:$16 sps:$4 sm:$0xff]  }
  0x4f   : > { %779 = vmatpush1.bf16.msra.mxu0 %v1268_v31  ;;  %737 = vmatprep.subr.bf16.mxu1 %v1269_v32  ;;  %v310_v20 = vld [vmem:[#allocation2 + $0x10] sm:$0xff]  ;;  %v311_v25 = vld [vmem:[#allocation2 + $0x18] sm:$0xff] }
  0x50   : > { %780 = vmatprep.subr.bf16.mxu0 %v1271_v33 }
  0x52   : > { %738 = vmatpush1.bf16.msra.mxu1 %v1273_v34 }
  0x53   : > { %781 = vmatpush1.bf16.msra.mxu0 %v1274_v35  ;;  %739 = vmatprep.subr.bf16.mxu1 %v1275_v36 }
  0x54   : > { %782 = vmatprep.subr.bf16.mxu0 %v1277_v37 }
  0x56   : > { %740 = vmatpush1.bf16.msra.mxu1 %v1279_v38 }
  0x57   : > { %783 = vmatpush1.bf16.msra.mxu0 %v1280_v39  ;;  %741 = vmatprep.subr.bf16.mxu1 %v1281_v40 }
  0x58   : > { %784 = vmatprep.subr.bf16.mxu0 %v1283_v41 }
  0x5a   : > { %742 = vmatpush1.bf16.msra.mxu1 %v1285_v42 }
  0x5b   : > { %785 = vmatpush1.bf16.msra.mxu0 %v1286_v43  ;;  %743 = vmatprep.subr.bf16.mxu1 %v1287_v44 }
  0x5c   : > { %786 = vmatprep.subr.bf16.mxu0 %v1289_v45 }
  0x5e   : > { %744 = vmatpush1.bf16.msra.mxu1 %v1291_v46 }
  0x5f   : > { %787 = vmatpush1.bf16.msra.mxu0 %v1292_v47  ;;  %745 = vmatprep.subr.bf16.mxu1 %v1293_v48 }
  0x60   : > { %788 = vmatprep.subr.bf16.mxu0 %v1295_v49  ;;  %v1393_v49 = vmov (!%p1164_p13), 1966171168  }
  0x62   : > { %746 = vmatpush1.bf16.msra.mxu1 %v1297_v50  ;;  %v850_v50 = vunpack.c.l.s4 (!%p1164_p13), %v1393_v49 }
  0x63   : > { %789 = vmatpush1.bf16.msra.mxu0 %v1298_v51  ;;  %747 = vmatprep.subr.bf16.mxu1 %v1299_v52  ;;  %v852_v51 = vlaneseq (!%p1164_p13) }
  0x64   : > { %790 = vmatprep.subr.bf16.mxu0 %v1301_v53 }
  0x65   : > { %vm867_vm1 = vcmp.lt.s32.totalorder (!%p1164_p13), %v852_v51, 256 }
  0x66   : > { %748 = vmatpush1.bf16.msra.mxu1 %v1303_v55 }
  0x67   : > { %791 = vmatpush1.bf16.msra.mxu0 %v1304_v56  ;;  %749 = vmatprep.subr.bf16.mxu1 %v1305_v57 }
  0x68   : > { %792 = vmatprep.subr.bf16.mxu0 %v1307_v58 }
  0x6a   : > { %750 = vmatpush1.bf16.msra.mxu1 %v1309_v59 }
  0x6b   : > { %793 = vmatpush1.bf16.msra.mxu0 %v1310_v60  ;;  %751 = vmatprep.subr.bf16.mxu1 %v1311_v61  ;;  %v851_v60 = vunpack.c.0.s8 (!%p1164_p13), %v850_v50  ;;  %v853_v61 = vshrl.u32 (!%p1164_p13), %v852_v51, 7 }
  0x6c   : > { %794 = vmatprep.subr.bf16.mxu0 %v1313_v62 }
  0x6e   : > { %752 = vmatpush1.bf16.msra.mxu1 %v1315_v63 }
  0x6f   : > { %795 = vmatpush1.bf16.msra.mxu0 %v1316_v0  ;;  %753 = vmatprep.subr.bf16.mxu1 %v1317_v1 }
  0x70   : > { %796 = vmatprep.subr.bf16.mxu0 %v1319_v2 }
  0x72   : > { %754 = vmatpush1.bf16.msra.mxu1 %v1321_v3 }
  0x73   : > { %797 = vmatpush1.bf16.msra.mxu0 %v1322_v4  ;;  %755 = vmatprep.subr.bf16.mxu1 %v1323_v5 }
  0x74   : > { %798 = vmatprep.subr.bf16.mxu0 %v1325_v6  ;;  %v854_v6 = vsub.s32 (!%p1164_p13), %v851_v60, %v853_v61 }
  0x76   : > { %756 = vmatpush1.bf16.msra.mxu1 %v1327_v7 }
  0x77   : > { %799 = vmatpush1.bf16.msra.mxu0 %v1328_v8 }
  0x79   : > { %758 = vmatmul.mubr.bf16.vlgmr.msra.gmra.mrb[0].mxu1 %v1329_v9 }
  0x7a   : > { %801 = vmatmul.mubr.bf16.vlgmr.msra.gmra.mrb[0].mxu0 %v1332_v10 }
 0x14c   : > { %v759_v11 = vpop.f32.mrb[0].mxu1 }
 0x14d   : > { %v802_v13 = vpop.f32.mrb[0].mxu0  ;;  %v761_v15 = vpop.f32.mrb[1].mxu1 }
 0x14e   : > { %v803_v14 = vadd.f32 %v802_v13, %v759_v11  ;;  %v804_v17 = vpop.f32.mrb[1].mxu0  ;;  %v763_v19 = vpop.f32.mrb[2].mxu1 }
 0x14f   : > { %v805_v18 = vadd.f32 %v804_v17, %v761_v15  ;;  %v806_v21 = vpop.f32.mrb[2].mxu0  ;;  %v765_v24 = vpop.f32.mrb[3].mxu1  ;;  %822 = sbr.rel (%p1164_p13) target bundleno = 374 (0x176), region = 63  ;;  %v870_v15 = vld [vmem:[%s1498_s15] sm:$0x3] (!%p1164_p13) }
 0x150   : > { %v811_v22 = vadd.f32 %v803_v14, %v308_v12  ;;  %v807_v23 = vadd.f32 %v806_v21, %v763_v19  ;;  %v808_v26 = vpop.f32.mrb[3].mxu0  ;;  %v831_v12 = vld [vmem:[%s1493_s6] sm:$0x3] (!%p1164_p13) }
 0x151   : > { %v812_v27 = vadd.f32 %v805_v18, %v309_v16  ;;  %v809_v28 = vadd.f32 %v808_v26, %v765_v24 }
 0x152   : > { %815 = vst [vmem:[#allocation2] sm:$0xff] %v811_v22  ;;  %v813_v29 = vadd.f32 %v807_v23, %v310_v20 }
 0x153   : > { %816 = vst [vmem:[#allocation2 + $0x8] sm:$0xff] %v812_v27  ;;  %v814_v30 = vadd.f32 %v809_v28, %v311_v25 }
 0x154   : > { %817 = vst [vmem:[#allocation2 + $0x10] sm:$0xff] %v813_v29 }
 0x155   : > { %818 = vst [vmem:[#allocation2 + $0x18] sm:$0xff] %v814_v30 }
 0x159   : > { %v823_v31 = vld [vmem:[#allocation2] sm:$0xff] }
 0x15a   : > { %v824_v32 = vld [vmem:[#allocation2 + $0x8] sm:$0xff]  ;;  %827 = vst [vmem:[%s1488_s29] sm:$0xff] %v823_v31  ;;  %v871_v34 = vmul.f32 %v823_v31, %v823_v31 }
 0x15b   : > { %v825_v33 = vld [vmem:[#allocation2 + $0x10] sm:$0xff]  ;;  %828 = vst [vmem:[%s1488_s29 + $0x8] sm:$0xff] %v824_v32  ;;  %v872_v35 = vmul.f32 %v824_v32, %v824_v32 }
 0x15c   : > { %829 = vst [vmem:[%s1488_s29 + $0x10] sm:$0xff] %v825_v33  ;;  %v832_v36 = vadd.f32 %v825_v33, %v823_v31  ;;  %v873_v37 = vmul.f32 %v825_v33, %v825_v33  ;;  %v826_v38 = vld [vmem:[#allocation2 + $0x18] sm:$0xff] }
 0x15d   : > { %830 = vst [vmem:[%s1488_s29 + $0x18] sm:$0xff] %v826_v38  ;;  %v839_v39 = vadd.f32 %v826_v38, %v824_v32  ;;  %v874_v40 = vmul.f32 %v826_v38, %v826_v38 }
 0x15e   : > { %v833_v41 = vrot.slane %v832_v36, 4  ;;  %v875_v42 = vadd.f32 %v873_v37, %v871_v34 }
 0x15f   : > { %v840_v43 = vrot.slane %v839_v39, 4  ;;  %v882_v44 = vadd.f32 %v874_v40, %v872_v35 }
 0x160   : > { %v834_v45 = vadd.f32 %v833_v41, %v832_v36  ;;  %v876_v46 = vrot.slane %v875_v42, 4 }
 0x161   : > { %v841_v47 = vadd.f32 %v840_v43, %v839_v39  ;;  %v883_v48 = vrot.slane %v882_v44, 4 }
 0x162   : > { %v835_v52 = vrot.slane %v834_v45, 2  ;;  %v877_v53 = vadd.f32 %v876_v46, %v875_v42 }
 0x163   : > { %v842_v54 = vrot.slane %v841_v47, 2  ;;  %v884_v55 = vadd.f32 %v883_v48, %v882_v44 }
 0x164   : > { %v836_v56 = vadd.f32 %v835_v52, %v834_v45  ;;  %v878_v57 = vrot.slane %v877_v53, 2 }
 0x165   : > { %v843_v58 = vadd.f32 %v842_v54, %v841_v47  ;;  %v885_v59 = vrot.slane %v884_v55, 2 }
 0x166   : > { %v837_v62 = vrot.slane %v836_v56, 1  ;;  %v879_v63 = vadd.f32 %v878_v57, %v877_v53 }
 0x167   : > { %v844_v0 = vrot.slane %v843_v58, 1  ;;  %v886_v1 = vadd.f32 %v885_v59, %v884_v55 }
 0x168   : > { %v838_v2 = vadd.f32 %v837_v62, %v836_v56  ;;  %v880_v3 = vrot.slane %v879_v63, 1 }
 0x169   : > { %v845_v4 = vadd.f32 %v844_v0, %v843_v58  ;;  %v887_v5 = vrot.slane %v886_v1, 1 }
 0x16a   : > { %v881_v7 = vadd.f32 %v880_v3, %v879_v63 }
 0x16b   : > { %v848_v8 = vcombine.low %v838_v2, %v845_v4  ;;  %v888_v9 = vadd.f32 %v887_v5, %v886_v1 }
 0x16d   : > { %v855_v10 = vrot.slane %v848_v8, %v854_v6  ;;  %v891_v11 = vcombine.low %v881_v7, %v888_v9 }
 0x16f   : > { %v862_v13 = vrot.slane %v855_v10, %v854_v6  ;;  %v898_v14 = vrot.slane %v891_v11, %v854_v6 }
 0x171   : > { %v864_v16 = vadd.f32 %v862_v13, %v831_v12  ;;  %v905_v17 = vrot.slane %v898_v14, %v854_v6 }
 0x173   : > { %869 = vst.msk [vmem:[%s1493_s6] sm:$0x3] %vm867_vm1, %v864_v16  ;;  %v907_v18 = vadd.f32 %v905_v17, %v870_v15 }
 0x175   : > { %908 = vst.msk [vmem:[%s1498_s15] sm:$0x3] %vm867_vm1, %v907_v18 }
 0x176 PF: > { %s15_s21 = sadd.s32 1, %s1389_s21   ;;  %s1614_s15 = smov %s1369_s16 }
 0x177   : > { %p12_p0 = scmp.ge.s32.totalorder %s15_s21, 10   ;;  %s1615_s16 = smov %s1470_s28 }
 0x178   : > { %s1616_s17 = smov %s1381_s19  ;;  %s1617_s18 = smov %s1385_s20 }
 0x179   : > { %s1618_s19 = smov %s1621_s22  ;;  %s1619_s20 = smov %s1625_s23 }
 0x17a   :  { %14 = sbr.rel (!%p12_p0) target bundleno = 4 (0x4), region = 123 }

// kernel: discriminator_forward.12
= control target key start
LH: loop header
LB: loop body
LE: loop exit
PB: predicated region body
PF: predicated region fallthrough
CT: control target
= control target key end

     0   :  { %s2131_s15 = smov 0   ;;  %s2133_s16 = smov 0   ;;  %s2394_s0 = inlined_call_operand.vmem [shape: bf16[2,16,4096], index: 0, kind: input, shape index: {}]   ;;  %s2395_s1 = inlined_call_operand.vmem [shape: bf16[4096,512], index: 1, kind: input, shape index: {}]   ;;  %s2396_s2 = inlined_call_operand.vmem [shape: f32[2,16,512], index: 2, kind: output, shape index: {0}]   ;;  %s2397_s3 = inlined_call_operand.vmem [shape: f32[2,1,512], index: 3, kind: output, shape index: {1}]   ;;  %s2398_s4 = inlined_call_operand.vmem [shape: f32[2,1,512], index: 4, kind: output, shape index: {2}]  }
   0x1   :  { %s2135_s17 = smov 0   ;;  %s2137_s18 = smov 0  }
   0x2   :  { %s2139_s19 = smov 0   ;;  %s2141_s20 = smov 0  }
   0x3   :  { %s2143_s21 = smov 0  }
   0x4 LB: > { %s27_s22 = sadd.s32 1, %s2093_s19  ;;  %s34_s23 = sadd.s32 1, %s2097_s20  ;;  %s2101_s21 = sphi %s2143_s21, %s15_s21   ;;  %s2097_s20 = sphi %s2141_s20, %s2404_s20   ;;  %s2093_s19 = sphi %s2139_s19, %s2403_s19   ;;  %s2089_s18 = sphi %s2137_s18, %s2402_s18   ;;  %s2085_s17 = sphi %s2135_s17, %s2401_s17   ;;  %s2081_s16 = sphi %s2133_s16, %s2400_s16   ;;  %s2077_s15 = sphi %s2131_s15, %s2399_s15  }
   0x5   : > { %p28_p0 = scmp.ge.s32.totalorder %s27_s22, 8  ;;  %p52_p1 = scmp.ne.s32.totalorder %s2081_s16, %s2077_s15 }
   0x6   : > { %p53_p2 = scmp.eq.s32.totalorder %s2101_s21, 0  ;;  %s45_s27 = sadd.s32 1, %s2081_s16 }
   0x7   : > { %s2406_s22 = smov (%p28_p0, %s27_s22), 0  ;;  %s2408_s23 = smov (!%p28_p0, %s34_s23), %s2097_s20 }
   0x8   : > { %p54_p3 = por %p53_p2, %p52_p1  ;;  %p36_p4 = scmp.ge.s32.totalorder %s2408_s23, 2 }
   0x9   : > { %s41_s24 = ssub.s32 %s2093_s19, %s2406_s22  ;;  %p1628_p6 = scmp.ge.s32.totalorder %s2101_s21, 16 }
   0xa   : > { %s2410_s23 = smov (%p36_p4, %s2408_s23), 0 }
   0xb   : > { %s38_s25 = ssub.s32 %s2097_s20, %s2410_s23  ;;  %182 = sbr.rel (%p1628_p6) target bundleno = 27 (0x1b), region = 20 }
   0xc   : > { %s42_s26 = sor.u32 %s41_s24, %s38_s25 }
   0xd   : > { %p43_p5 = scmp.eq.s32.totalorder %s42_s26, 0 }
   0xf   : > { %s2182_s28 = scalar_select %p43_p5, %s2081_s16, %s45_s27  }
  0x12   : > { %185 = sbr.rel (!%p54_p3) target bundleno = 27 (0x1b), region = 24  ;;  %s187_s29 = sand.u32 (%p54_p3), 1, %s2081_s16  }
  0x13   : > { %s1630_s30 = sshll.u32 (%p54_p3), %s2093_s19, 2  ;;  %s1629_s5 = sshll.u32 (%p54_p3), %s187_s29, 5 }
  0x14   : > { %s1631_s6 = sshll.u32 (%p54_p3), %s2097_s20, 6  ;;  %s189_s12 = scalar_lea.vmem (%p54_p3), [#allocation3], %s1629_s5 }
  0x15   : > { %s195_s7 = sadd.s32 (%p54_p3), %s1631_s6, %s1630_s30 }
  0x16   : > { %s1632_s8 = sshll.u32 (%p54_p3), %s195_s7, 2 }
  0x17   : > { %s197_s11 = scalar_lea.vmem (%p54_p3), %s2394_s0, %s1632_s8 }
  0x18   : > { %v210_v0 = vld [vmem:[%s197_s11] sm:$0xff] (%p54_p3)  ;;  %v212_v1 = vld [vmem:[%s197_s11 + $0x8] sm:$0xff] (%p54_p3) }
  0x19   : > { %v214_v2 = vld [vmem:[%s197_s11 + $0x80] sm:$0xff]  ;;  %211 = vst [vmem:[%s189_s12] sm:$0xff] %v210_v0  ;;  %213 = vst [vmem:[%s189_s12 + $0x8] sm:$0xff] %v212_v1  ;;  %v216_v3 = vld [vmem:[%s197_s11 + $0x88] sm:$0xff] }
  0x1a   : > { %215 = vst [vmem:[%s189_s12 + $0x10] sm:$0xff] %v214_v2  ;;  %217 = vst [vmem:[%s189_s12 + $0x18] sm:$0xff] %v216_v3 }
  0x1b PF: > { %p1633_p7 = scmp.ge.s32.totalorder %s2101_s21, 1  ;;  %p222_p8 = scmp.lt.s32.totalorder %s2101_s21, 17 }
  0x1d   : > { %p223_p9 = pnand %p1633_p7, %p222_p8 }
  0x1e   : > { %s229_s13 = sand.u32 (!%p223_p9), 1, %s2077_s15   ;;  %p270_p10 = scmp.lt.s32.totalorder (!%p223_p9), %s2089_s18, 1 }
  0x1f   : > { %226 = sbr.rel (%p223_p9) target bundleno = 440 (0x1b8), region = 47  ;;  %s1634_s14 = sshll.u32 (!%p223_p9), %s229_s13, 5 }
  0x20   : > { %p289_p11 = scmp.eq.s32.totalorder (!%p223_p9), %s2085_s17, 0  ;;  %s2212_s9 = scalar_lea.vmem (!%p223_p9), [#allocation3], %s1634_s14 }
  0x26   : > { %s2412_s18 = smov (!%p270_p10, %s2089_s18), 1  ;;  %293 = sbr.rel (!%p289_p11) target bundleno = 45 (0x2d), region = 55 }
  0x27   : > { %s1779_s24 = sshll.u32 %s2412_s18, 6  ;;  %s1637_s25 = sshll.u32 %s2412_s18, 2  ;;  %v294_v4 = vlaneseq (%p289_p11)  ;;  %v2103_v5 = vmov (%p289_p11), 0.0  }
  0x28   : > { %s2200_s29 = scalar_lea.vmem %s2396_s2, %s1779_s24  ;;  %s2205_s6 = scalar_lea.vmem %s2397_s3, %s1637_s25 }
  0x29   : > { %s2210_s15 = scalar_lea.vmem %s2398_s4, %s1637_s25  ;;  %vm296_vm0 = vcmp.lt.s32.totalorder (%p289_p11), %v294_v4, 512 }
  0x2a   : > { %298 = vst.msk [vmem:[%s2205_s6] sm:$0xf] (%p289_p11), %vm296_vm0, %v2103_v5  ;;  %299 = vst.msk [vmem:[%s2210_s15] sm:$0xf] (%p289_p11), %vm296_vm0, %v2103_v5 }
  0x2d PF: > { %p1640_p12 = scmp.ne.s32.totalorder %s2085_s17, 0 }
  0x2e   : > { %v2104_v6 = vmov (!%p1640_p12), 0.0  }
  0x2f   : > { %302 = sbr.rel (%p1640_p12) target bundleno = 54 (0x36), region = 59  ;;  %303 = vst [vmem:[#allocation2] sm:$0xff] (!%p1640_p12), %v2104_v6  ;;  %304 = vst [vmem:[#allocation2 + $0x8] sm:$0xff] (!%p1640_p12), %v2104_v6 }
  0x30   : > { %305 = vst [vmem:[#allocation2 + $0x10] sm:$0xff] (!%p1640_p12), %v2104_v6  ;;  %306 = vst [vmem:[#allocation2 + $0x18] sm:$0xff] (!%p1640_p12), %v2104_v6 }
  0x31   : > { %307 = vst [vmem:[#allocation2 + $0x20] sm:$0xff] (!%p1640_p12), %v2104_v6  ;;  %308 = vst [vmem:[#allocation2 + $0x28] sm:$0xff] (!%p1640_p12), %v2104_v6 }
  0x32   : > { %309 = vst [vmem:[#allocation2 + $0x30] sm:$0xff] (!%p1640_p12), %v2104_v6  ;;  %310 = vst [vmem:[#allocation2 + $0x38] sm:$0xff] (!%p1640_p12), %v2104_v6 }
  0x36 PF: > { %s1641_s18 = sshll.u32 %s2085_s17, 9  ;;  %v1947_v7 = vld [vmem:[%s2212_s9 + $0x4] ss:$16 sps:$4 sm:$0xff]   ;;  %p1776_p13 = scmp.ne.s32.totalorder %s2085_s17, 7 }
  0x37   : > { %s324_s10 = sshra.s32 %s1641_s18, 3  ;;  %1149 = vmatprep.mubr.bf16.mxu0 %v1947_v7  ;;  %1235 = vmatprep.mubr.bf16.mxu1 %v1947_v7 }
  0x38   : > { %s1781_s11 = sshll.u32 %s324_s10, 4 }
  0x39   : > { %s2222_s14 = scalar_lea.vmem %s2395_s1, %s1781_s11 }
  0x3a   : > { %v1849_v8 = vld [vmem:[%s2222_s14 + $0x4] ss:$16 sps:$4 sm:$0xff]   ;;  %v1851_v9 = vld [vmem:[%s2222_s14 + $0xc] ss:$16 sps:$4 sm:$0xff]   ;;  %v1853_v10 = vld [vmem:[%s2222_s14] ss:$16 sps:$4 sm:$0xff]  }
  0x3b   : > { %1117 = vmatprep.subr.bf16.mxu0 %v1849_v8  ;;  %v1854_v11 = vld [vmem:[%s2222_s14 + $0x8] ss:$16 sps:$4 sm:$0xff]   ;;  %1203 = vmatprep.subr.bf16.mxu1 %v1851_v9  ;;  %v1855_v12 = vld [vmem:[%s2222_s14 + $0x24] ss:$16 sps:$4 sm:$0xff]   ;;  %v1857_v13 = vld [vmem:[%s2222_s14 + $0x2c] ss:$16 sps:$4 sm:$0xff]  }
  0x3c   : > { %1118 = vmatpush1.bf16.msra.mxu0 %v1853_v10  ;;  %1204 = vmatpush1.bf16.msra.mxu1 %v1854_v11  ;;  %v1859_v14 = vld [vmem:[%s2222_s14 + $0x20] ss:$16 sps:$4 sm:$0xff]   ;;  %v1860_v15 = vld [vmem:[%s2222_s14 + $0x28] ss:$16 sps:$4 sm:$0xff]   ;;  %v1861_v16 = vld [vmem:[%s2222_s14 + $0x44] ss:$16 sps:$4 sm:$0xff]  }
  0x3d   : > { %1119 = vmatprep.subr.bf16.mxu0 %v1855_v12  ;;  %1205 = vmatprep.subr.bf16.mxu1 %v1857_v13  ;;  %v1863_v17 = vld [vmem:[%s2222_s14 + $0x4c] ss:$16 sps:$4 sm:$0xff]   ;;  %v1865_v18 = vld [vmem:[%s2222_s14 + $0x40] ss:$16 sps:$4 sm:$0xff]   ;;  %v1866_v19 = vld [vmem:[%s2222_s14 + $0x48] ss:$16 sps:$4 sm:$0xff]  }
  0x3e   : > { %v1867_v20 = vld [vmem:[%s2222_s14 + $0x64] ss:$16 sps:$4 sm:$0xff]   ;;  %v1869_v21 = vld [vmem:[%s2222_s14 + $0x6c] ss:$16 sps:$4 sm:$0xff]   ;;  %v1871_v22 = vld [vmem:[%s2222_s14 + $0x60] ss:$16 sps:$4 sm:$0xff]  }
  0x3f   : > { %v1872_v23 = vld [vmem:[%s2222_s14 + $0x68] ss:$16 sps:$4 sm:$0xff]   ;;  %v1873_v24 = vld [vmem:[%s2222_s14 + $0x84] ss:$16 sps:$4 sm:$0xff]   ;;  %v1875_v25 = vld [vmem:[%s2222_s14 + $0x8c] ss:$16 sps:$4 sm:$0xff]  }
  0x40   : > { %1120 = vmatpush1.bf16.msra.mxu0 %v1859_v14  ;;  %1206 = vmatpush1.bf16.msra.mxu1 %v1860_v15  ;;  %v1877_v26 = vld [vmem:[%s2222_s14 + $0x80] ss:$16 sps:$4 sm:$0xff]   ;;  %v1878_v27 = vld [vmem:[%s2222_s14 + $0x88] ss:$16 sps:$4 sm:$0xff]   ;;  %v1879_v28 = vld [vmem:[%s2222_s14 + $0xa4] ss:$16 sps:$4 sm:$0xff]  }
  0x41   : > { %1121 = vmatprep.subr.bf16.mxu0 %v1861_v16  ;;  %1207 = vmatprep.subr.bf16.mxu1 %v1863_v17  ;;  %v1881_v29 = vld [vmem:[%s2222_s14 + $0xac] ss:$16 sps:$4 sm:$0xff]   ;;  %v1883_v30 = vld [vmem:[%s2222_s14 + $0xa0] ss:$16 sps:$4 sm:$0xff]   ;;  %v1884_v31 = vld [vmem:[%s2222_s14 + $0xa8] ss:$16 sps:$4 sm:$0xff]  }
  0x42   : > { %v1885_v32 = vld [vmem:[%s2222_s14 + $0xc4] ss:$16 sps:$4 sm:$0xff]   ;;  %v1887_v33 = vld [vmem:[%s2222_s14 + $0xcc] ss:$16 sps:$4 sm:$0xff]   ;;  %v1889_v34 = vld [vmem:[%s2222_s14 + $0xc0] ss:$16 sps:$4 sm:$0xff]  }
  0x43   : > { %v1890_v35 = vld [vmem:[%s2222_s14 + $0xc8] ss:$16 sps:$4 sm:$0xff]   ;;  %v1891_v36 = vld [vmem:[%s2222_s14 + $0xe4] ss:$16 sps:$4 sm:$0xff]   ;;  %v1893_v37 = vld [vmem:[%s2222_s14 + $0xec] ss:$16 sps:$4 sm:$0xff]  }
  0x44   : > { %1122 = vmatpush1.bf16.msra.mxu0 %v1865_v18  ;;  %1208 = vmatpush1.bf16.msra.mxu1 %v1866_v19  ;;  %v1895_v38 = vld [vmem:[%s2222_s14 + $0xe0] ss:$16 sps:$4 sm:$0xff]   ;;  %v1896_v39 = vld [vmem:[%s2222_s14 + $0xe8] ss:$16 sps:$4 sm:$0xff]   ;;  %v1897_v40 = vld [vmem:[%s2222_s14 + $0x104] ss:$16 sps:$4 sm:$0xff]  }
  0x45   : > { %1123 = vmatprep.subr.bf16.mxu0 %v1867_v20  ;;  %1209 = vmatprep.subr.bf16.mxu1 %v1869_v21  ;;  %v1899_v41 = vld [vmem:[%s2222_s14 + $0x10c] ss:$16 sps:$4 sm:$0xff]   ;;  %v1901_v42 = vld [vmem:[%s2222_s14 + $0x100] ss:$16 sps:$4 sm:$0xff]   ;;  %v1902_v43 = vld [vmem:[%s2222_s14 + $0x108] ss:$16 sps:$4 sm:$0xff]  }
  0x46   : > { %v1903_v44 = vld [vmem:[%s2222_s14 + $0x124] ss:$16 sps:$4 sm:$0xff]   ;;  %v1905_v45 = vld [vmem:[%s2222_s14 + $0x12c] ss:$16 sps:$4 sm:$0xff]   ;;  %v1907_v46 = vld [vmem:[%s2222_s14 + $0x120] ss:$16 sps:$4 sm:$0xff]  }
  0x47   : > { %v1908_v47 = vld [vmem:[%s2222_s14 + $0x128] ss:$16 sps:$4 sm:$0xff]   ;;  %v1909_v48 = vld [vmem:[%s2222_s14 + $0x144] ss:$16 sps:$4 sm:$0xff]   ;;  %v1911_v49 = vld [vmem:[%s2222_s14 + $0x14c] ss:$16 sps:$4 sm:$0xff]  }
  0x48   : > { %1124 = vmatpush1.bf16.msra.mxu0 %v1871_v22  ;;  %1210 = vmatpush1.bf16.msra.mxu1 %v1872_v23  ;;  %v1913_v50 = vld [vmem:[%s2222_s14 + $0x140] ss:$16 sps:$4 sm:$0xff]   ;;  %v1914_v51 = vld [vmem:[%s2222_s14 + $0x148] ss:$16 sps:$4 sm:$0xff]   ;;  %v1915_v52 = vld [vmem:[%s2222_s14 + $0x164] ss:$16 sps:$4 sm:$0xff]  }
  0x49   : > { %1125 = vmatprep.subr.bf16.mxu0 %v1873_v24  ;;  %1211 = vmatprep.subr.bf16.mxu1 %v1875_v25  ;;  %v1917_v53 = vld [vmem:[%s2222_s14 + $0x16c] ss:$16 sps:$4 sm:$0xff]   ;;  %v1919_v54 = vld [vmem:[%s2222_s14 + $0x160] ss:$16 sps:$4 sm:$0xff]   ;;  %v1920_v55 = vld [vmem:[%s2222_s14 + $0x168] ss:$16 sps:$4 sm:$0xff]  }
  0x4a   : > { %v1921_v56 = vld [vmem:[%s2222_s14 + $0x184] ss:$16 sps:$4 sm:$0xff]   ;;  %v1923_v57 = vld [vmem:[%s2222_s14 + $0x18c] ss:$16 sps:$4 sm:$0xff]   ;;  %v1925_v58 = vld [vmem:[%s2222_s14 + $0x180] ss:$16 sps:$4 sm:$0xff]  }
  0x4b   : > { %v1926_v59 = vld [vmem:[%s2222_s14 + $0x188] ss:$16 sps:$4 sm:$0xff]   ;;  %v1927_v60 = vld [vmem:[%s2222_s14 + $0x1a4] ss:$16 sps:$4 sm:$0xff]   ;;  %v1929_v61 = vld [vmem:[%s2222_s14 + $0x1ac] ss:$16 sps:$4 sm:$0xff]  }
  0x4c   : > { %1126 = vmatpush1.bf16.msra.mxu0 %v1877_v26  ;;  %1212 = vmatpush1.bf16.msra.mxu1 %v1878_v27  ;;  %v1931_v62 = vld [vmem:[%s2222_s14 + $0x1a0] ss:$16 sps:$4 sm:$0xff]   ;;  %v1932_v63 = vld [vmem:[%s2222_s14 + $0x1a8] ss:$16 sps:$4 sm:$0xff]   ;;  %v1933_v0 = vld [vmem:[%s2222_s14 + $0x1c4] ss:$16 sps:$4 sm:$0xff]  }
  0x4d   : > { %1127 = vmatprep.subr.bf16.mxu0 %v1879_v28  ;;  %1213 = vmatprep.subr.bf16.mxu1 %v1881_v29  ;;  %v1935_v1 = vld [vmem:[%s2222_s14 + $0x1cc] ss:$16 sps:$4 sm:$0xff]   ;;  %v1937_v2 = vld [vmem:[%s2222_s14 + $0x1c0] ss:$16 sps:$4 sm:$0xff]   ;;  %v1938_v3 = vld [vmem:[%s2222_s14 + $0x1c8] ss:$16 sps:$4 sm:$0xff]  }
  0x4e   : > { %v1939_v4 = vld [vmem:[%s2222_s14 + $0x1e4] ss:$16 sps:$4 sm:$0xff]   ;;  %v1941_v5 = vld [vmem:[%s2222_s14 + $0x1ec] ss:$16 sps:$4 sm:$0xff]   ;;  %v1943_v6 = vld [vmem:[%s2222_s14 + $0x1e0] ss:$16 sps:$4 sm:$0xff]  }
  0x4f   : > { %v1944_v7 = vld [vmem:[%s2222_s14 + $0x1e8] ss:$16 sps:$4 sm:$0xff]   ;;  %v1950_v8 = vld [vmem:[%s2222_s14 + $0x204] ss:$16 sps:$4 sm:$0xff]   ;;  %v1953_v9 = vld [vmem:[%s2222_s14 + $0x20c] ss:$16 sps:$4 sm:$0xff]  }
  0x50   : > { %1128 = vmatpush1.bf16.msra.mxu0 %v1883_v30  ;;  %1214 = vmatpush1.bf16.msra.mxu1 %v1884_v31  ;;  %v1945_v10 = vld [vmem:[%s2212_s9] ss:$16 sps:$4 sm:$0xff]   ;;  %v1951_v12 = vld [vmem:[%s2222_s14 + $0x208] ss:$16 sps:$4 sm:$0xff]   ;;  %v1956_v13 = vld [vmem:[%s2222_s14 + $0x224] ss:$16 sps:$4 sm:$0xff]  }
  0x51   : > { %1129 = vmatprep.subr.bf16.mxu0 %v1885_v32  ;;  %1215 = vmatprep.subr.bf16.mxu1 %v1887_v33  ;;  %v1948_v11 = vld [vmem:[%s2222_s14 + $0x200] ss:$16 sps:$4 sm:$0xff]   ;;  %v1959_v14 = vld [vmem:[%s2222_s14 + $0x22c] ss:$16 sps:$4 sm:$0xff]   ;;  %v1957_v16 = vld [vmem:[%s2222_s14 + $0x228] ss:$16 sps:$4 sm:$0xff]  }
  0x52   : > { %v1954_v15 = vld [vmem:[%s2222_s14 + $0x220] ss:$16 sps:$4 sm:$0xff]   ;;  %v1962_v17 = vld [vmem:[%s2222_s14 + $0x244] ss:$16 sps:$4 sm:$0xff]   ;;  %v1965_v18 = vld [vmem:[%s2222_s14 + $0x24c] ss:$16 sps:$4 sm:$0xff]  }
  0x53   : > { %v1960_v19 = vld [vmem:[%s2222_s14 + $0x240] ss:$16 sps:$4 sm:$0xff]   ;;  %v1963_v20 = vld [vmem:[%s2222_s14 + $0x248] ss:$16 sps:$4 sm:$0xff]   ;;  %v1968_v21 = vld [vmem:[%s2222_s14 + $0x264] ss:$16 sps:$4 sm:$0xff]  }
  0x54   : > { %1130 = vmatpush1.bf16.msra.mxu0 %v1889_v34  ;;  %1216 = vmatpush1.bf16.msra.mxu1 %v1890_v35  ;;  %v1971_v22 = vld [vmem:[%s2222_s14 + $0x26c] ss:$16 sps:$4 sm:$0xff]   ;;  %v1966_v23 = vld [vmem:[%s2222_s14 + $0x260] ss:$16 sps:$4 sm:$0xff]   ;;  %v1969_v24 = vld [vmem:[%s2222_s14 + $0x268] ss:$16 sps:$4 sm:$0xff]  }
  0x55   : > { %1131 = vmatprep.subr.bf16.mxu0 %v1891_v36  ;;  %1217 = vmatprep.subr.bf16.mxu1 %v1893_v37  ;;  %v1974_v25 = vld [vmem:[%s2222_s14 + $0x284] ss:$16 sps:$4 sm:$0xff]   ;;  %v1977_v26 = vld [vmem:[%s2222_s14 + $0x28c] ss:$16 sps:$4 sm:$0xff]   ;;  %v1972_v27 = vld [vmem:[%s2222_s14 + $0x280] ss:$16 sps:$4 sm:$0xff]  }
  0x56   : > { %v1975_v28 = vld [vmem:[%s2222_s14 + $0x288] ss:$16 sps:$4 sm:$0xff]   ;;  %v1980_v29 = vld [vmem:[%s2222_s14 + $0x2a4] ss:$16 sps:$4 sm:$0xff]   ;;  %v1983_v30 = vld [vmem:[%s2222_s14 + $0x2ac] ss:$16 sps:$4 sm:$0xff]  }
  0x57   : > { %v1978_v31 = vld [vmem:[%s2222_s14 + $0x2a0] ss:$16 sps:$4 sm:$0xff]   ;;  %v1981_v32 = vld [vmem:[%s2222_s14 + $0x2a8] ss:$16 sps:$4 sm:$0xff]   ;;  %v1986_v33 = vld [vmem:[%s2222_s14 + $0x2c4] ss:$16 sps:$4 sm:$0xff]  }
  0x58   : > { %1132 = vmatpush1.bf16.msra.mxu0 %v1895_v38  ;;  %1218 = vmatpush1.bf16.msra.mxu1 %v1896_v39  ;;  %v1989_v34 = vld [vmem:[%s2222_s14 + $0x2cc] ss:$16 sps:$4 sm:$0xff]   ;;  %v1984_v36 = vld [vmem:[%s2222_s14 + $0x2c0] ss:$16 sps:$4 sm:$0xff]   ;;  %v1987_v37 = vld [vmem:[%s2222_s14 + $0x2c8] ss:$16 sps:$4 sm:$0xff]  }
  0x59   : > { %1133 = vmatprep.subr.bf16.mxu0 %v1897_v40  ;;  %1219 = vmatprep.subr.bf16.mxu1 %v1899_v41  ;;  %v2046_v35 = vld [vmem:[%s2212_s9 + $0xc] ss:$16 sps:$4 sm:$0xff]   ;;  %v1992_v38 = vld [vmem:[%s2222_s14 + $0x2e4] ss:$16 sps:$4 sm:$0xff]   ;;  %v1990_v40 = vld [vmem:[%s2222_s14 + $0x2e0] ss:$16 sps:$4 sm:$0xff]  }
  0x5a   : > { %v1995_v39 = vld [vmem:[%s2222_s14 + $0x2ec] ss:$16 sps:$4 sm:$0xff]   ;;  %v1993_v41 = vld [vmem:[%s2222_s14 + $0x2e8] ss:$16 sps:$4 sm:$0xff]  }
  0x5c   : > { %1134 = vmatpush1.bf16.msra.mxu0 %v1901_v42  ;;  %1220 = vmatpush1.bf16.msra.mxu1 %v1902_v43  ;;  %v1998_v42 = vld [vmem:[%s2222_s14 + $0x304] ss:$16 sps:$4 sm:$0xff]   ;;  %v2001_v43 = vld [vmem:[%s2222_s14 + $0x30c] ss:$16 sps:$4 sm:$0xff]  }
  0x5d   : > { %1135 = vmatprep.subr.bf16.mxu0 %v1903_v44  ;;  %1221 = vmatprep.subr.bf16.mxu1 %v1905_v45  ;;  %v1996_v44 = vld [vmem:[%s2222_s14 + $0x300] ss:$16 sps:$4 sm:$0xff]   ;;  %v1999_v45 = vld [vmem:[%s2222_s14 + $0x308] ss:$16 sps:$4 sm:$0xff]  }
  0x60   : > { %1136 = vmatpush1.bf16.msra.mxu0 %v1907_v46  ;;  %1222 = vmatpush1.bf16.msra.mxu1 %v1908_v47  ;;  %v2004_v46 = vld [vmem:[%s2222_s14 + $0x324] ss:$16 sps:$4 sm:$0xff]   ;;  %v2007_v47 = vld [vmem:[%s2222_s14 + $0x32c] ss:$16 sps:$4 sm:$0xff]  }
  0x61   : > { %1137 = vmatprep.subr.bf16.mxu0 %v1909_v48  ;;  %1223 = vmatprep.subr.bf16.mxu1 %v1911_v49  ;;  %v2002_v48 = vld [vmem:[%s2222_s14 + $0x320] ss:$16 sps:$4 sm:$0xff]   ;;  %v2005_v49 = vld [vmem:[%s2222_s14 + $0x328] ss:$16 sps:$4 sm:$0xff]  }
  0x64   : > { %1138 = vmatpush1.bf16.msra.mxu0 %v1913_v50  ;;  %1224 = vmatpush1.bf16.msra.mxu1 %v1914_v51  ;;  %v2010_v50 = vld [vmem:[%s2222_s14 + $0x344] ss:$16 sps:$4 sm:$0xff]   ;;  %v2013_v51 = vld [vmem:[%s2222_s14 + $0x34c] ss:$16 sps:$4 sm:$0xff]  }
  0x65   : > { %1139 = vmatprep.subr.bf16.mxu0 %v1915_v52  ;;  %1225 = vmatprep.subr.bf16.mxu1 %v1917_v53  ;;  %v2008_v52 = vld [vmem:[%s2222_s14 + $0x340] ss:$16 sps:$4 sm:$0xff]   ;;  %v2011_v53 = vld [vmem:[%s2222_s14 + $0x348] ss:$16 sps:$4 sm:$0xff]  }
  0x68   : > { %1140 = vmatpush1.bf16.msra.mxu0 %v1919_v54  ;;  %1226 = vmatpush1.bf16.msra.mxu1 %v1920_v55  ;;  %v2016_v54 = vld [vmem:[%s2222_s14 + $0x364] ss:$16 sps:$4 sm:$0xff]   ;;  %v2019_v55 = vld [vmem:[%s2222_s14 + $0x36c] ss:$16 sps:$4 sm:$0xff]  }
  0x69   : > { %1141 = vmatprep.subr.bf16.mxu0 %v1921_v56  ;;  %1227 = vmatprep.subr.bf16.mxu1 %v1923_v57  ;;  %v2014_v56 = vld [vmem:[%s2222_s14 + $0x360] ss:$16 sps:$4 sm:$0xff]   ;;  %v2017_v57 = vld [vmem:[%s2222_s14 + $0x368] ss:$16 sps:$4 sm:$0xff]  }
  0x6c   : > { %1142 = vmatpush1.bf16.msra.mxu0 %v1925_v58  ;;  %1228 = vmatpush1.bf16.msra.mxu1 %v1926_v59  ;;  %v2022_v58 = vld [vmem:[%s2222_s14 + $0x384] ss:$16 sps:$4 sm:$0xff]   ;;  %v2025_v59 = vld [vmem:[%s2222_s14 + $0x38c] ss:$16 sps:$4 sm:$0xff]  }
  0x6d   : > { %1143 = vmatprep.subr.bf16.mxu0 %v1927_v60  ;;  %1229 = vmatprep.subr.bf16.mxu1 %v1929_v61  ;;  %v2020_v60 = vld [vmem:[%s2222_s14 + $0x380] ss:$16 sps:$4 sm:$0xff]   ;;  %v2023_v61 = vld [vmem:[%s2222_s14 + $0x388] ss:$16 sps:$4 sm:$0xff]  }
  0x70   : > { %1144 = vmatpush1.bf16.msra.mxu0 %v1931_v62  ;;  %1230 = vmatpush1.bf16.msra.mxu1 %v1932_v63  ;;  %v2028_v62 = vld [vmem:[%s2222_s14 + $0x3a4] ss:$16 sps:$4 sm:$0xff]   ;;  %v2031_v63 = vld [vmem:[%s2222_s14 + $0x3ac] ss:$16 sps:$4 sm:$0xff]  }
  0x71   : > { %1145 = vmatprep.subr.bf16.mxu0 %v1933_v0  ;;  %1231 = vmatprep.subr.bf16.mxu1 %v1935_v1  ;;  %v2026_v0 = vld [vmem:[%s2222_s14 + $0x3a0] ss:$16 sps:$4 sm:$0xff]   ;;  %v2029_v1 = vld [vmem:[%s2222_s14 + $0x3a8] ss:$16 sps:$4 sm:$0xff]  }
  0x74   : > { %1146 = vmatpush1.bf16.msra.mxu0 %v1937_v2  ;;  %1232 = vmatpush1.bf16.msra.mxu1 %v1938_v3  ;;  %v2034_v2 = vld [vmem:[%s2222_s14 + $0x3c4] ss:$16 sps:$4 sm:$0xff]   ;;  %v2037_v3 = vld [vmem:[%s2222_s14 + $0x3cc] ss:$16 sps:$4 sm:$0xff]  }
  0x75   : > { %1147 = vmatprep.subr.bf16.mxu0 %v1939_v4  ;;  %1233 = vmatprep.subr.bf16.mxu1 %v1941_v5  ;;  %v2032_v4 = vld [vmem:[%s2222_s14 + $0x3c0] ss:$16 sps:$4 sm:$0xff]   ;;  %v2035_v5 = vld [vmem:[%s2222_s14 + $0x3c8] ss:$16 sps:$4 sm:$0xff]  }
  0x78   : > { %1148 = vmatpush1.bf16.msra.mxu0 %v1943_v6  ;;  %1234 = vmatpush1.bf16.msra.mxu1 %v1944_v7  ;;  %v2040_v6 = vld [vmem:[%s2222_s14 + $0x3e4] ss:$16 sps:$4 sm:$0xff]   ;;  %v2043_v7 = vld [vmem:[%s2222_s14 + $0x3ec] ss:$16 sps:$4 sm:$0xff]  }
  0x79   : > { %1160 = vmatprep.subr.bf16.mxu0 %v1950_v8  ;;  %1246 = vmatprep.subr.bf16.mxu1 %v1953_v9  ;;  %v2038_v8 = vld [vmem:[%s2222_s14 + $0x3e0] ss:$16 sps:$4 sm:$0xff]   ;;  %v2041_v9 = vld [vmem:[%s2222_s14 + $0x3e8] ss:$16 sps:$4 sm:$0xff]  }
  0x7b   : > { %1150 = vmatmul.mubr.bf16.vlgmr.msra.gmra.mrb[0].mxu0 %v1945_v10  ;;  %1236 = vmatmul.mubr.bf16.vlgmr.msra.gmra.mrb[0].mxu1 %v1945_v10  ;;  %v2044_v10 = vld [vmem:[%s2212_s9 + $0x8] ss:$16 sps:$4 sm:$0xff]  }
  0x7c   : > { %1161 = vmatpush1.bf16.msra.mxu0 %v1948_v11  ;;  %1247 = vmatpush1.bf16.msra.mxu1 %v1951_v12  ;;  %v312_v11 = vld [vmem:[#allocation2] sm:$0xff]  ;;  %v314_v12 = vld [vmem:[#allocation2 + $0x10] sm:$0xff] }
  0x7d   : > { %1162 = vmatprep.subr.bf16.mxu0 %v1956_v13  ;;  %1248 = vmatprep.subr.bf16.mxu1 %v1959_v14  ;;  %v313_v13 = vld [vmem:[#allocation2 + $0x8] sm:$0xff]  ;;  %v315_v14 = vld [vmem:[#allocation2 + $0x18] sm:$0xff] }
  0x7e   : > { %1192 = vmatprep.mubr.bf16.mxu0 %v2046_v35  ;;  %1278 = vmatprep.mubr.bf16.mxu1 %v2046_v35 }
  0x80   : > { %1163 = vmatpush1.bf16.msra.mxu0 %v1954_v15  ;;  %1249 = vmatpush1.bf16.msra.mxu1 %v1957_v16 }
  0x81   : > { %1164 = vmatprep.subr.bf16.mxu0 %v1962_v17  ;;  %1250 = vmatprep.subr.bf16.mxu1 %v1965_v18  ;;  %v316_v17 = vld [vmem:[#allocation2 + $0x20] sm:$0xff]  ;;  %v318_v18 = vld [vmem:[#allocation2 + $0x30] sm:$0xff] }
  0x84   : > { %1165 = vmatpush1.bf16.msra.mxu0 %v1960_v19  ;;  %1251 = vmatpush1.bf16.msra.mxu1 %v1963_v20 }
  0x85   : > { %1166 = vmatprep.subr.bf16.mxu0 %v1968_v21  ;;  %1252 = vmatprep.subr.bf16.mxu1 %v1971_v22 }
  0x88   : > { %1167 = vmatpush1.bf16.msra.mxu0 %v1966_v23  ;;  %1253 = vmatpush1.bf16.msra.mxu1 %v1969_v24  ;;  %v317_v23 = vld [vmem:[#allocation2 + $0x28] sm:$0xff]  ;;  %v319_v24 = vld [vmem:[#allocation2 + $0x38] sm:$0xff] }
  0x89   : > { %1168 = vmatprep.subr.bf16.mxu0 %v1974_v25  ;;  %1254 = vmatprep.subr.bf16.mxu1 %v1977_v26 }
  0x8c   : > { %1169 = vmatpush1.bf16.msra.mxu0 %v1972_v27  ;;  %1255 = vmatpush1.bf16.msra.mxu1 %v1975_v28 }
  0x8d   : > { %1170 = vmatprep.subr.bf16.mxu0 %v1980_v29  ;;  %1256 = vmatprep.subr.bf16.mxu1 %v1983_v30 }
  0x90   : > { %1171 = vmatpush1.bf16.msra.mxu0 %v1978_v31  ;;  %1257 = vmatpush1.bf16.msra.mxu1 %v1981_v32 }
  0x91   : > { %1172 = vmatprep.subr.bf16.mxu0 %v1986_v33  ;;  %1258 = vmatprep.subr.bf16.mxu1 %v1989_v34 }
  0x94   : > { %1173 = vmatpush1.bf16.msra.mxu0 %v1984_v36  ;;  %1259 = vmatpush1.bf16.msra.mxu1 %v1987_v37 }
  0x95   : > { %1174 = vmatprep.subr.bf16.mxu0 %v1992_v38  ;;  %1260 = vmatprep.subr.bf16.mxu1 %v1995_v39  ;;  %v1363_v38 = vlaneseq (!%p1776_p13) }
  0x97   : > { %vm1386_vm1 = vcmp.lt.s32.totalorder (!%p1776_p13), %v1363_v38, 512 }
  0x98   : > { %1175 = vmatpush1.bf16.msra.mxu0 %v1990_v40  ;;  %1261 = vmatpush1.bf16.msra.mxu1 %v1993_v41 }
  0x99   : > { %1176 = vmatprep.subr.bf16.mxu0 %v1998_v42  ;;  %1262 = vmatprep.subr.bf16.mxu1 %v2001_v43 }
  0x9c   : > { %1177 = vmatpush1.bf16.msra.mxu0 %v1996_v44  ;;  %1263 = vmatpush1.bf16.msra.mxu1 %v1999_v45  ;;  %v2105_v45 = vmov (!%p1776_p13), 1966171168  }
  0x9d   : > { %1178 = vmatprep.subr.bf16.mxu0 %v2004_v46  ;;  %1264 = vmatprep.subr.bf16.mxu1 %v2007_v47  ;;  %v2359_v46 = vunpack.c.l.s4 (!%p1776_p13), %v2105_v45 }
  0x9f   : > { %v1362_v45 = vunpack.c.0.s8 (!%p1776_p13), %v2359_v46 }
  0xa0   : > { %1179 = vmatpush1.bf16.msra.mxu0 %v2002_v48  ;;  %1265 = vmatpush1.bf16.msra.mxu1 %v2005_v49 }
  0xa1   : > { %1180 = vmatprep.subr.bf16.mxu0 %v2010_v50  ;;  %1266 = vmatprep.subr.bf16.mxu1 %v2013_v51 }
  0xa4   : > { %1181 = vmatpush1.bf16.msra.mxu0 %v2008_v52  ;;  %1267 = vmatpush1.bf16.msra.mxu1 %v2011_v53 }
  0xa5   : > { %1182 = vmatprep.subr.bf16.mxu0 %v2016_v54  ;;  %1268 = vmatprep.subr.bf16.mxu1 %v2019_v55 }
  0xa8   : > { %1183 = vmatpush1.bf16.msra.mxu0 %v2014_v56  ;;  %1269 = vmatpush1.bf16.msra.mxu1 %v2017_v57 }
  0xa9   : > { %1184 = vmatprep.subr.bf16.mxu0 %v2022_v58  ;;  %1270 = vmatprep.subr.bf16.mxu1 %v2025_v59 }
  0xac   : > { %1185 = vmatpush1.bf16.msra.mxu0 %v2020_v60  ;;  %1271 = vmatpush1.bf16.msra.mxu1 %v2023_v61 }
  0xad   : > { %1186 = vmatprep.subr.bf16.mxu0 %v2028_v62  ;;  %1272 = vmatprep.subr.bf16.mxu1 %v2031_v63 }
  0xb0   : > { %1187 = vmatpush1.bf16.msra.mxu0 %v2026_v0  ;;  %1273 = vmatpush1.bf16.msra.mxu1 %v2029_v1 }
  0xb1   : > { %1188 = vmatprep.subr.bf16.mxu0 %v2034_v2  ;;  %1274 = vmatprep.subr.bf16.mxu1 %v2037_v3 }
  0xb4   : > { %1189 = vmatpush1.bf16.msra.mxu0 %v2032_v4  ;;  %1275 = vmatpush1.bf16.msra.mxu1 %v2035_v5 }
  0xb5   : > { %1190 = vmatprep.subr.bf16.mxu0 %v2040_v6  ;;  %1276 = vmatprep.subr.bf16.mxu1 %v2043_v7 }
  0xb8   : > { %1191 = vmatpush1.bf16.msra.mxu0 %v2038_v8  ;;  %1277 = vmatpush1.bf16.msra.mxu1 %v2041_v9 }
  0xbb   : > { %1193 = vmatmul.mubr.bf16.vlgmr.msra.gmra.mrb[0].mxu0 %v2044_v10  ;;  %1279 = vmatmul.mubr.bf16.vlgmr.msra.gmra.mrb[0].mxu1 %v2044_v10 }
 0x18e   : > { %v1194_v15 = vpop.f32.mrb[0].mxu0  ;;  %v1280_v16 = vpop.f32.mrb[0].mxu1  ;;  %1308 = sbr.rel (%p1776_p13) target bundleno = 440 (0x1b8), region = 63 }
 0x18f   : > { %v1289_v19 = vadd.f32 %v1194_v15, %v312_v11  ;;  %v1291_v20 = vadd.f32 %v1280_v16, %v314_v12  ;;  %v1196_v21 = vpop.f32.mrb[1].mxu0  ;;  %v1282_v22 = vpop.f32.mrb[1].mxu1 }
 0x190   : > { %v1290_v25 = vadd.f32 %v1196_v21, %v313_v13  ;;  %v1292_v26 = vadd.f32 %v1282_v22, %v315_v14  ;;  %v1198_v27 = vpop.f32.mrb[2].mxu0  ;;  %v1284_v28 = vpop.f32.mrb[2].mxu1 }
 0x191   : > { %1297 = vst [vmem:[#allocation2] sm:$0xff] %v1289_v19  ;;  %1299 = vst [vmem:[#allocation2 + $0x10] sm:$0xff] %v1291_v20  ;;  %v1293_v29 = vadd.f32 %v1198_v27, %v316_v17  ;;  %v1295_v30 = vadd.f32 %v1284_v28, %v318_v18  ;;  %v1200_v31 = vpop.f32.mrb[3].mxu0  ;;  %v1286_v32 = vpop.f32.mrb[3].mxu1 }
 0x192   : > { %1298 = vst [vmem:[#allocation2 + $0x8] sm:$0xff] %v1290_v25  ;;  %1300 = vst [vmem:[#allocation2 + $0x18] sm:$0xff] %v1292_v26  ;;  %v1294_v33 = vadd.f32 %v1200_v31, %v317_v23  ;;  %v1296_v34 = vadd.f32 %v1286_v32, %v319_v24 }
 0x193   : > { %1301 = vst [vmem:[#allocation2 + $0x20] sm:$0xff] %v1293_v29  ;;  %1303 = vst [vmem:[#allocation2 + $0x30] sm:$0xff] %v1295_v30 }
 0x194   : > { %1302 = vst [vmem:[#allocation2 + $0x28] sm:$0xff] %v1294_v33  ;;  %1304 = vst [vmem:[#allocation2 + $0x38] sm:$0xff] %v1296_v34 }
 0x198   : > { %v1309_v35 = vld [vmem:[#allocation2] sm:$0xff]  ;;  %v1311_v37 = vld [vmem:[#allocation2 + $0x10] sm:$0xff] }
 0x199   : > { %v1310_v36 = vld [vmem:[#allocation2 + $0x8] sm:$0xff]  ;;  %1317 = vst [vmem:[%s2200_s29] sm:$0xff] %v1309_v35  ;;  %v1390_v39 = vmul.f32 %v1309_v35, %v1309_v35  ;;  %1319 = vst [vmem:[%s2200_s29 + $0x10] sm:$0xff] %v1311_v37  ;;  %v1392_v41 = vmul.f32 %v1311_v37, %v1311_v37  ;;  %v1312_v42 = vld [vmem:[#allocation2 + $0x18] sm:$0xff] }
 0x19a   : > { %1318 = vst [vmem:[%s2200_s29 + $0x8] sm:$0xff] %v1310_v36  ;;  %v1391_v40 = vmul.f32 %v1310_v36, %v1310_v36  ;;  %v1313_v43 = vld [vmem:[#allocation2 + $0x20] sm:$0xff]  ;;  %1320 = vst [vmem:[%s2200_s29 + $0x18] sm:$0xff] %v1312_v42  ;;  %v1393_v47 = vmul.f32 %v1312_v42, %v1312_v42  ;;  %v1315_v51 = vld [vmem:[#allocation2 + $0x30] sm:$0xff] }
 0x19b   : > { %v1314_v44 = vld [vmem:[#allocation2 + $0x28] sm:$0xff]  ;;  %1321 = vst [vmem:[%s2200_s29 + $0x20] sm:$0xff] %v1313_v43  ;;  %v1326_v48 = vadd.f32 %v1313_v43, %v1309_v35  ;;  %v1394_v49 = vmul.f32 %v1313_v43, %v1313_v43  ;;  %v1316_v52 = vld [vmem:[#allocation2 + $0x38] sm:$0xff]  ;;  %1323 = vst [vmem:[%s2200_s29 + $0x30] sm:$0xff] %v1315_v51  ;;  %v1340_v54 = vadd.f32 %v1315_v51, %v1311_v37 }
 0x19c   : > { %1322 = vst [vmem:[%s2200_s29 + $0x28] sm:$0xff] %v1314_v44  ;;  %v1333_v50 = vadd.f32 %v1314_v44, %v1310_v36  ;;  %v1395_v53 = vmul.f32 %v1314_v44, %v1314_v44  ;;  %v1396_v55 = vmul.f32 %v1315_v51, %v1315_v51  ;;  %1324 = vst [vmem:[%s2200_s29 + $0x38] sm:$0xff] %v1316_v52 }
 0x19d   : > { %v1347_v56 = vadd.f32 %v1316_v52, %v1312_v42  ;;  %v1327_v57 = vrot.slane %v1326_v48, 4  ;;  %v1398_v58 = vadd.f32 %v1394_v49, %v1390_v39  ;;  %v1397_v60 = vmul.f32 %v1316_v52, %v1316_v52 }
 0x19e   : > { %v1334_v59 = vrot.slane %v1333_v50, 4  ;;  %v1405_v61 = vadd.f32 %v1395_v53, %v1391_v40  ;;  %v1341_v62 = vrot.slane %v1340_v54, 4  ;;  %v1412_v63 = vadd.f32 %v1396_v55, %v1392_v41 }
 0x19f   : > { %v1348_v0 = vrot.slane %v1347_v56, 4  ;;  %v1328_v1 = vadd.f32 %v1327_v57, %v1326_v48  ;;  %v1399_v2 = vrot.slane %v1398_v58, 4  ;;  %v1419_v4 = vadd.f32 %v1397_v60, %v1393_v47  ;;  %v1325_v60 = vld [vmem:[%s2205_s6] sm:$0xf] }
 0x1a0   : > { %v1335_v3 = vadd.f32 %v1334_v59, %v1333_v50  ;;  %v1406_v5 = vrot.slane %v1405_v61, 4  ;;  %v1342_v6 = vadd.f32 %v1341_v62, %v1340_v54  ;;  %v1413_v7 = vrot.slane %v1412_v63, 4  ;;  %v1389_v62 = vld [vmem:[%s2210_s15] sm:$0xf] }
 0x1a1   : > { %v1349_v8 = vadd.f32 %v1348_v0, %v1347_v56  ;;  %v1329_v9 = vrot.slane %v1328_v1, 2  ;;  %v1400_v10 = vadd.f32 %v1399_v2, %v1398_v58  ;;  %v1420_v12 = vrot.slane %v1419_v4, 4 }
 0x1a2   : > { %v1336_v11 = vrot.slane %v1335_v3, 2  ;;  %v1407_v13 = vadd.f32 %v1406_v5, %v1405_v61  ;;  %v1343_v14 = vrot.slane %v1342_v6, 2  ;;  %v1414_v15 = vadd.f32 %v1413_v7, %v1412_v63 }
 0x1a3   : > { %v1350_v16 = vrot.slane %v1349_v8, 2  ;;  %v1330_v17 = vadd.f32 %v1329_v9, %v1328_v1  ;;  %v1401_v18 = vrot.slane %v1400_v10, 2  ;;  %v1421_v20 = vadd.f32 %v1420_v12, %v1419_v4 }
 0x1a4   : > { %v1337_v19 = vadd.f32 %v1336_v11, %v1335_v3  ;;  %v1408_v21 = vrot.slane %v1407_v13, 2  ;;  %v1344_v22 = vadd.f32 %v1343_v14, %v1342_v6  ;;  %v1415_v23 = vrot.slane %v1414_v15, 2 }
 0x1a5   : > { %v1351_v24 = vadd.f32 %v1350_v16, %v1349_v8  ;;  %v1331_v25 = vrot.slane %v1330_v17, 1  ;;  %v1402_v26 = vadd.f32 %v1401_v18, %v1400_v10  ;;  %v1422_v28 = vrot.slane %v1421_v20, 2 }
 0x1a6   : > { %v1338_v27 = vrot.slane %v1337_v19, 1  ;;  %v1409_v29 = vadd.f32 %v1408_v21, %v1407_v13  ;;  %v1345_v30 = vrot.slane %v1344_v22, 1  ;;  %v1416_v31 = vadd.f32 %v1415_v23, %v1414_v15 }
 0x1a7   : > { %v1352_v32 = vrot.slane %v1351_v24, 1  ;;  %v1332_v33 = vadd.f32 %v1331_v25, %v1330_v17  ;;  %v1403_v34 = vrot.slane %v1402_v26, 1  ;;  %v1423_v36 = vadd.f32 %v1422_v28, %v1421_v20 }
 0x1a8   : > { %v1339_v35 = vadd.f32 %v1338_v27, %v1337_v19  ;;  %v1410_v37 = vrot.slane %v1409_v29, 1  ;;  %v1346_v39 = vadd.f32 %v1345_v30, %v1344_v22  ;;  %v1417_v40 = vrot.slane %v1416_v31, 1 }
 0x1a9   : > { %v1353_v41 = vadd.f32 %v1352_v32, %v1351_v24  ;;  %v1404_v42 = vadd.f32 %v1403_v34, %v1402_v26  ;;  %v1424_v43 = vrot.slane %v1423_v36, 1  ;;  %v1364_v50 = vshrl.u32 %v1363_v38, 7 }
 0x1aa   : > { %v1358_v44 = vcombine.low %v1332_v33, %v1339_v35  ;;  %v1411_v47 = vadd.f32 %v1410_v37, %v1409_v29  ;;  %v1418_v48 = vadd.f32 %v1417_v40, %v1416_v31 }
 0x1ab   : > { %v1359_v49 = vcombine.low %v1346_v39, %v1353_v41  ;;  %v1425_v51 = vadd.f32 %v1424_v43, %v1423_v36  ;;  %v1365_v52 = vsub.s32 %v1362_v45, %v1364_v50 }
 0x1ac   : > { %v1430_v53 = vcombine.low %v1404_v42, %v1411_v47 }
 0x1ad   : > { %v1431_v54 = vcombine.low %v1418_v48, %v1425_v51  ;;  %v1366_v55 = vrot.slane %v1358_v44, %v1365_v52  ;;  %v1373_v56 = vrot.slane %v1359_v49, %v1365_v52 }
 0x1ae   : > { %v1438_v57 = vrot.slane %v1430_v53, %v1365_v52 }
 0x1af   : > { %v1445_v58 = vrot.slane %v1431_v54, %v1365_v52  ;;  %v1374_v59 = vcombine.low %v1366_v55, %v1373_v56 }
 0x1b1   : > { %v1446_v61 = vcombine.low %v1438_v57, %v1445_v58  ;;  %v1381_v46 = vrot.slane %v1374_v59, %v1365_v52 }
 0x1b3   : > { %v1453_v63 = vrot.slane %v1446_v61, %v1365_v52  ;;  %v1383_v0 = vadd.f32 %v1381_v46, %v1325_v60 }
 0x1b5   : > { %v1455_v1 = vadd.f32 %v1453_v63, %v1389_v62  ;;  %1388 = vst.msk [vmem:[%s2205_s6] sm:$0xf] %vm1386_vm1, %v1383_v0 }
 0x1b7   : > { %1456 = vst.msk [vmem:[%s2210_s15] sm:$0xf] %vm1386_vm1, %v1455_v1 }
 0x1b8 PF: > { %s15_s21 = sadd.s32 1, %s2101_s21   ;;  %s2399_s15 = smov %s2081_s16 }
 0x1b9   : > { %p12_p0 = scmp.ge.s32.totalorder %s15_s21, 18   ;;  %s2400_s16 = smov %s2182_s28 }
 0x1ba   : > { %s2401_s17 = smov %s2093_s19  ;;  %s2402_s18 = smov %s2097_s20 }
 0x1bb   : > { %s2403_s19 = smov %s2406_s22  ;;  %s2404_s20 = smov %s2410_s23 }
 0x1bc   :  { %14 = sbr.rel (!%p12_p0) target bundleno = 4 (0x4), region = 123 }

// kernel: discriminator_forward.13
= control target key start
LH: loop header
LB: loop body
LE: loop exit
PB: predicated region body
PF: predicated region fallthrough
CT: control target
= control target key end

     0   :  { %s588_s12 = smov 0   ;;  %s590_s13 = smov 0   ;;  %s632_s0 = inlined_call_operand.vmem [shape: f32[2,16,512], index: 0, kind: input, shape index: {}]   ;;  %s633_s1 = inlined_call_operand.vmem [shape: f32[2,1,512], index: 1, kind: input, shape index: {}]   ;;  %s634_s2 = inlined_call_operand.vmem [shape: f32[2,1,512], index: 2, kind: input, shape index: {}]   ;;  %s635_s3 = inlined_call_operand.vmem [shape: bf16[2,16,512], index: 3, kind: output, shape index: {}]  }
   0x1   :  { %s592_s14 = smov 0  }
   0x2 LB: > { %s25_s15 = sadd.s32 1, %s562_s13  ;;  %p499_p0 = scmp.ge.s32.totalorder %s566_s14, 1  ;;  %s566_s14 = sphi %s592_s14, %s13_s14   ;;  %s562_s13 = sphi %s590_s13, %s637_s13   ;;  %s558_s12 = sphi %s588_s12, %s636_s12  }
   0x3   : > { %p27_p1 = scmp.ge.s32.totalorder %s25_s15, 2  ;;  %p177_p2 = scmp.lt.s32.totalorder %s566_s14, 3 }
   0x5   : > { %s639_s15 = smov (%p27_p1, %s25_s15), 0  ;;  %p178_p3 = pnand %p499_p0, %p177_p2 }
   0x6   : > { %p220_p4 = scmp.lt.s32.totalorder (!%p178_p3), %s558_s12, 1  ;;  %v264_v4 = vlaneseq (!%p178_p3) }
   0x7   : > { %181 = sbr.rel (%p178_p3) target bundleno = 52 (0x34), region = 32 }
   0x8   : > { %v265_v7 = vshrl.u32 (!%p178_p3), %v264_v4, 7 }
   0xa   : > { %v266_v9 = vsub.s32 (!%p178_p3), 0, %v265_v7  ;;  %v270_v10 = vsub.s32 (!%p178_p3), 1, %v265_v7  ;;  %v274_v11 = vsub.s32 (!%p178_p3), 2, %v265_v7  ;;  %v278_v12 = vsub.s32 (!%p178_p3), 3, %v265_v7 }
   0xe   : > { %s641_s12 = smov (!%p220_p4, %s558_s12), 1 }
   0xf   : > { %s502_s16 = sshll.u32 %s641_s12, 2  ;;  %s512_s23 = sshll.u32 %s641_s12, 6 }
  0x10   : > { %s233_s19 = scalar_lea.vmem %s633_s1, %s502_s16  ;;  %s237_s22 = scalar_lea.vmem %s634_s2, %s502_s16 }
  0x11   : > { %v257_v0 = vld [vmem:[%s233_s19] sm:$0xf]  ;;  %s228_s26 = scalar_lea.vmem %s632_s0, %s512_s23  ;;  %s513_s27 = sshll.u32 %s641_s12, 5 }
  0x12   : > { %v258_v1 = vmul.f32 0.25, %v257_v0  ;;  %v259_v2 = vld [vmem:[%s237_s22] sm:$0xf]  ;;  %v250_v14 = vld [vmem:[%s228_s26 + $0x8] sm:$0xff]  ;;  %v251_v19 = vld [vmem:[%s228_s26 + $0x10] sm:$0xff]  ;;  %s247_s30 = scalar_lea.vmem %s635_s3, %s513_s27 }
  0x13   : > { %v260_v3 = vmul.f32 0.25, %v259_v2  ;;  %v249_v13 = vld [vmem:[%s228_s26] sm:$0xff]  ;;  %v252_v20 = vld [vmem:[%s228_s26 + $0x18] sm:$0xff]  ;;  %v254_v22 = vld [vmem:[%s228_s26 + $0x28] sm:$0xff] }
  0x14   : > { %v261_v5 = vmul.f32 %v258_v1, %v258_v1  ;;  %v267_v15 = vrot.slane %v258_v1, %v266_v9  ;;  %v271_v16 = vrot.slane %v258_v1, %v270_v10  ;;  %v275_v17 = vrot.slane %v258_v1, %v274_v11  ;;  %v253_v21 = vld [vmem:[%s228_s26 + $0x20] sm:$0xff]  ;;  %v255_v23 = vld [vmem:[%s228_s26 + $0x30] sm:$0xff]  ;;  %v256_v24 = vld [vmem:[%s228_s26 + $0x38] sm:$0xff] }
  0x15   : > { %v279_v18 = vrot.slane %v258_v1, %v278_v12 }
  0x16   : > { %v262_v6 = vsub.f32 %v260_v3, %v261_v5  ;;  %v284_v25 = vsub.f32 %v249_v13, %v267_v15  ;;  %v285_v26 = vsub.f32 %v250_v14, %v271_v16  ;;  %v286_v27 = vsub.f32 %v251_v19, %v275_v17 }
  0x17   : > { %v287_v28 = vsub.f32 %v252_v20, %v279_v18  ;;  %v288_v30 = vsub.f32 %v253_v21, %v267_v15  ;;  %v289_v31 = vsub.f32 %v254_v22, %v271_v16  ;;  %v290_v32 = vsub.f32 %v255_v23, %v275_v17 }
  0x18   : > { %v292_v8 = vadd.f32 1e-05, %v262_v6  ;;  %v291_v33 = vsub.f32 %v256_v24, %v279_v18 }
  0x1a   : > { %542 = vrsqrt.f32 %v292_v8 }
  0x24   : > { %v543_v29 = vpop.eup %542 }
  0x25   : > { %v298_v34 = vrot.slane %v543_v29, %v266_v9  ;;  %v302_v35 = vrot.slane %v543_v29, %v270_v10  ;;  %v306_v36 = vrot.slane %v543_v29, %v274_v11  ;;  %v310_v37 = vrot.slane %v543_v29, %v278_v12 }
  0x27   : > { %v315_v38 = vmul.f32 %v298_v34, %v284_v25  ;;  %v316_v39 = vmul.f32 %v302_v35, %v285_v26  ;;  %v317_v40 = vmul.f32 %v306_v36, %v286_v27  ;;  %v318_v41 = vmul.f32 %v310_v37, %v287_v28 }
  0x28   : > { %v319_v42 = vmul.f32 %v298_v34, %v288_v30  ;;  %v320_v43 = vmul.f32 %v302_v35, %v289_v31  ;;  %v321_v44 = vmul.f32 %v306_v36, %v290_v32  ;;  %v322_v45 = vmul.f32 %v310_v37, %v291_v33 }
  0x29   : > { %vm323_vm0 = vcmp.gt.f32.partialorder %v315_v38, 0.0  ;;  %vm324_vm1 = vcmp.gt.f32.partialorder %v316_v39, 0.0  ;;  %v331_v46 = vmul.f32 0.2, %v315_v38  ;;  %v332_v47 = vmul.f32 0.2, %v316_v39 }
  0x2a   : > { %vm325_vm2 = vcmp.gt.f32.partialorder %v317_v40, 0.0  ;;  %vm326_vm3 = vcmp.gt.f32.partialorder %v318_v41, 0.0  ;;  %v333_v48 = vmul.f32 0.2, %v317_v40  ;;  %v334_v49 = vmul.f32 0.2, %v318_v41 }
  0x2b   : > { %v339_v50 = vsel %vm323_vm0, %v315_v38, %v331_v46  ;;  %v340_v51 = vsel %vm324_vm1, %v316_v39, %v332_v47  ;;  %vm327_vm4 = vcmp.gt.f32.partialorder %v319_v42, 0.0  ;;  %vm328_vm5 = vcmp.gt.f32.partialorder %v320_v43, 0.0 }
  0x2c   : > { %v514_v52 = vpack.c.bf16 %v340_v51, %v339_v50  ;;  %v341_v53 = vsel %vm325_vm2, %v317_v40, %v333_v48  ;;  %v342_v54 = vsel %vm326_vm3, %v318_v41, %v334_v49  ;;  %v335_v55 = vmul.f32 0.2, %v319_v42 }
  0x2d   : > { %v515_v56 = vpack.c.bf16 %v342_v54, %v341_v53  ;;  %v336_v57 = vmul.f32 0.2, %v320_v43  ;;  %vm329_vm6 = vcmp.gt.f32.partialorder %v321_v44, 0.0  ;;  %vm330_vm7 = vcmp.gt.f32.partialorder %v322_v45, 0.0 }
  0x2e   : > { %371 = vst [vmem:[%s247_s30] sm:$0xff] %v514_v52  ;;  %v343_v58 = vsel %vm327_vm4, %v319_v42, %v335_v55  ;;  %v337_v59 = vmul.f32 0.2, %v321_v44  ;;  %v338_v60 = vmul.f32 0.2, %v322_v45 }
  0x2f   : > { %372 = vst [vmem:[%s247_s30 + $0x8] sm:$0xff] %v515_v56  ;;  %v344_v61 = vsel %vm328_vm5, %v320_v43, %v336_v57 }
  0x30   : > { %v516_v62 = vpack.c.bf16 %v344_v61, %v343_v58  ;;  %v345_v63 = vsel %vm329_vm6, %v321_v44, %v337_v59  ;;  %v346_v0 = vsel %vm330_vm7, %v322_v45, %v338_v60 }
  0x31   : > { %v517_v1 = vpack.c.bf16 %v346_v0, %v345_v63 }
  0x32   : > { %373 = vst [vmem:[%s247_s30 + $0x10] sm:$0xff] %v516_v62 }
  0x33   : > { %374 = vst [vmem:[%s247_s30 + $0x18] sm:$0xff] %v517_v1 }
  0x34 PF: > { %s13_s14 = sadd.s32 1, %s566_s14   ;;  %s636_s12 = smov %s562_s13 }
  0x35   : > { %p10_p5 = scmp.ge.s32.totalorder %s13_s14, 4   ;;  %s637_s13 = smov %s639_s15 }
  0x37   :  { %12 = sbr.rel (!%p10_p5) target bundleno = 2 (0x2), region = 68 }

</bundles_post_ra>
